<compile_context>
chip_gen: v7x
topology: tpu7x:2x2x1
jax: 0.10.0
libtpu: 0.0.40
codegen_flags: <defaults>
</compile_context>

<pallas_src>
import functools

import jax
import jax.numpy as jnp
from jax.experimental import pallas as pl
from jax.experimental.pallas import tpu as pltpu

_VMEM_LIMIT = 32 * 1024 * 1024  # above v5e's 16 MiB scoped default, safe on v6e/v7x


def _round_up(x, m):
    return (x + m - 1) // m * m


# ----------------------------------------------------------------------------
# Kernel 1: M/K-tiled matmul + bias + ReLU   (used for the fused 1x1 convs)
# ----------------------------------------------------------------------------
def _matmul_bias_relu_kernel(a_ref, w_ref, b_ref, o_ref, acc_ref):
    """o = relu(a @ w + b); grid = (M tiles, K tiles), f32 accumulator scratch."""

    @pl.when(pl.program_id(1) == 0)
    def _init():
        acc_ref[...] = jnp.zeros_like(acc_ref)

    acc_ref[...] += jnp.dot(
        a_ref[...].astype(jnp.bfloat16),          # bf16 MXU inputs
        w_ref[...],                               # already bf16
        preferred_element_type=jnp.float32)       # f32 accumulation

    @pl.when(pl.program_id(1) == pl.num_programs(1) - 1)
    def _finalize():
        o_ref[...] = jnp.maximum(acc_ref[...] + b_ref[...], 0.0).astype(o_ref.dtype)


def matmul_bias_relu(a, w_bf16, b):
    """relu(a @ w + b).  a:(M,K) f32, w:(K,N) bf16, b:(1,N) f32  ->  (M,N) f32."""
    M, K = a.shape
    _, N = w_bf16.shape

    # M tile: 256 matches the 256-wide MXU on v6e/v7x and keeps 2x buffers small;
    # bigger M uses 512-row tiles (fits easily once K is tiled).
    if M >= 1024:
        tm = 512
    elif M >= 256:
        tm = 256
    elif M >= 128:
        tm = 128
    else:
        tm = _round_up(M, 8)
    Mp = _round_up(M, tm)

    # K tile: single block for small K, 512-wide reduction tiles otherwise.
    if K <= 512:
        tk, Kp = K, K
    else:
        tk = 512
        Kp = _round_up(K, tk)

    if Mp != M or Kp != K:
        a = jnp.pad(a, ((0, Mp - M), (0, Kp - K)))          # zero rows/cols: no effect
    if Kp != K:
        w_bf16 = jnp.pad(w_bf16, ((0, Kp - K), (0, 0)))

    grid = (Mp // tm, Kp // tk)
    out = pl.pallas_call(
        _matmul_bias_relu_kernel,
        out_shape=jax.ShapeDtypeStruct((Mp, N), jnp.float32),
        grid_spec=pltpu.PrefetchScalarGridSpec(
            num_scalar_prefetch=0,
            grid=grid,
            in_specs=[
                pl.BlockSpec((tm, tk), lambda i, k: (i, k)),
                pl.BlockSpec((tk, N), lambda i, k: (k, 0)),
                pl.BlockSpec((1, N), lambda i, k: (0, 0)),
            ],
            out_specs=pl.BlockSpec((tm, N), lambda i, k: (i, 0)),
            scratch_shapes=[pltpu.VMEM((tm, N), jnp.float32)],
        ),
        compiler_params=pltpu.CompilerParams(
            dimension_semantics=("parallel", "arbitrary"),
            vmem_limit_bytes=_VMEM_LIMIT,
        ),
    )(a, w_bf16, b)
    if Mp != M:
        out = out[:M]
    return out


def fused_conv1x1_relu(x_nhwc, weight_bias_list):
    """Fuse several 1x1 conv+ReLU sharing the same input into one wide matmul."""
    N, H, W, C = x_nhwc.shape
    wmats = [jnp.transpose(w[:, :, 0, 0]) for w, _ in weight_bias_list]   # (C, Cout_i)
    wcat = jnp.concatenate(wmats, axis=1).astype(jnp.bfloat16)            # (C, sumCout)
    bcat = jnp.concatenate([b for _, b in weight_bias_list], axis=0)
    bcat = bcat.reshape(1, -1).astype(jnp.float32)
    a = x_nhwc.reshape(N * H * W, C)                                      # free reshape
    out = matmul_bias_relu(a, wcat, bcat).reshape(N, H, W, -1)
    pieces, off = [], 0
    for w, _ in weight_bias_list:
        co = w.shape[0]
        pieces.append(out[..., off:off + co])
        off += co
    return pieces


# ----------------------------------------------------------------------------
# Kernel 2: direct conv (tap accumulation in VMEM, no HBM im2col) + bias + ReLU
# ----------------------------------------------------------------------------
def _conv_taps_bias_relu_kernel(H, W, taps, x_ref, w_ref, b_ref, o_ref):
    """x_ref:(Hp,Wp,C) padded plane, w_ref:(n_taps,C,Cout) bf16, o_ref:(H*W,Cout)."""
    C = x_ref.shape[-1]
    Cout = o_ref.shape[-1]
    acc = jnp.zeros((H * W, Cout), jnp.float32)
    for t, (di, dj) in enumerate(taps):                      # static, <= 9 taps
        a = x_ref[di:di + H, dj:dj + W, :].reshape(H * W, C).astype(jnp.bfloat16)
        acc = acc + jnp.dot(a, w_ref[t], preferred_element_type=jnp.float32)
    o_ref[...] = jnp.maximum(acc + b_ref[...], 0.0).astype(o_ref.dtype)


def conv_taps_bias_relu(xp, weight, bias, taps, H, W):
    """Stride-1 conv + bias + ReLU on an already-padded NHWC input.

    xp:     (N, Hp, Wp, C) padded input, f32
    weight: (Cout, Cin, kh, kw) PyTorch OIHW
    taps:   tuple of absolute (di, dj) offsets into xp, row-major over (kh, kw)
    """
    N, Hp, Wp, C = xp.shape
    Cout, Cin, kh, kw = weight.shape
    n_taps = kh * kw
    assert len(taps) == n_taps and Cin == C
    wtap = jnp.transpose(weight, (2, 3, 1, 0)).reshape(n_taps, C, Cout)
    wtap = wtap.astype(jnp.bfloat16)
    b2 = bias.reshape(1, Cout).astype(jnp.float32)

    out = pl.pallas_call(
        functools.partial(_conv_taps_bias_relu_kernel, H, W, tuple(taps)),
        out_shape=jax.ShapeDtypeStruct((N, H * W, Cout), jnp.float32),
        grid_spec=pl.GridSpec(
            grid=(N,),
            in_specs=[
                pl.BlockSpec((None, Hp, Wp, C), lambda n: (n, 0, 0, 0)),
                pl.BlockSpec((n_taps, C, Cout), lambda n: (0, 0, 0)),
                pl.BlockSpec((1, Cout), lambda n: (0, 0)),
            ],
            out_specs=pl.BlockSpec((None, H * W, Cout), lambda n: (n, 0, 0)),
        ),
        compiler_params=pltpu.CompilerParams(
            dimension_semantics=("parallel",),
            vmem_limit_bytes=_VMEM_LIMIT,
        ),
    )(xp, wtap, b2)
    return out.reshape(N, H, W, Cout)


# ----------------------------------------------------------------------------
# Kernel 3: fused 3x3/stride-1 avg-pool + 1x1 conv + bias + ReLU (branch 4)
# ----------------------------------------------------------------------------
def _avgpool3_conv1x1_relu_kernel(H, W, x_ref, w_ref, b_ref, o_ref):
    C = x_ref.shape[-1]
    pooled = jnp.zeros((H, W, C), jnp.float32)
    for di in range(3):
        for dj in range(3):
            pooled = pooled + x_ref[di:di + H, dj:dj + W, :].astype(jnp.float32)
    a = (pooled * (1.0 / 9.0)).reshape(H * W, C).astype(jnp.bfloat16)
    acc = jnp.dot(a, w_ref[...], preferred_element_type=jnp.float32)
    o_ref[...] = jnp.maximum(acc + b_ref[...], 0.0).astype(o_ref.dtype)


def avgpool3_conv1x1_relu(xp, weight, bias, H, W):
    """xp: (N, H+2, W+2, C) padded input; weight: (Cout, C, 1, 1)."""
    N, Hp, Wp, C = xp.shape
    Cout = weight.shape[0]
    w2 = jnp.transpose(weight[:, :, 0, 0]).astype(jnp.bfloat16)   # (C, Cout)
    b2 = bias.reshape(1, Cout).astype(jnp.float32)
    out = pl.pallas_call(
        functools.partial(_avgpool3_conv1x1_relu_kernel, H, W),
        out_shape=jax.ShapeDtypeStruct((N, H * W, Cout), jnp.float32),
        grid_spec=pl.GridSpec(
            grid=(N,),
            in_specs=[
                pl.BlockSpec((None, Hp, Wp, C), lambda n: (n, 0, 0, 0)),
                pl.BlockSpec((C, Cout), lambda n: (0, 0)),
                pl.BlockSpec((1, Cout), lambda n: (0, 0)),
            ],
            out_specs=pl.BlockSpec((None, H * W, Cout), lambda n: (n, 0, 0)),
        ),
        compiler_params=pltpu.CompilerParams(
            dimension_semantics=("parallel",),
            vmem_limit_bytes=_VMEM_LIMIT,
        ),
    )(xp, w2, b2)
    return out.reshape(N, H, W, Cout)


# ----------------------------------------------------------------------------
# Parameter init (deterministic, synthetic)
# ----------------------------------------------------------------------------
def _init_conv(key, cout, cin, kh, kw):
    k1, k2 = jax.random.split(key)
    fan_in = cin * kh * kw
    w = jax.random.normal(k1, (cout, cin, kh, kw), jnp.float32) / jnp.sqrt(float(fan_in))
    b = 0.01 * jax.random.normal(k2, (cout,), jnp.float32)
    return w, b


def make_module_e_params(key, in_channel, out1_1, out2_1, out2_3, out3_1, out3_3, out4_1):
    ks = jax.random.split(key, 9)
    return {
        "b1":     _init_conv(ks[0], out1_1, in_channel, 1, 1),
        "b2_1":   _init_conv(ks[1], out2_1, in_channel, 1, 1),
        "b2_2_1": _init_conv(ks[2], out2_3, out2_1, 1, 3),
        "b2_2_2": _init_conv(ks[3], out2_3, out2_1, 3, 1),
        "b3_1a":  _init_conv(ks[4], out3_1, in_channel, 1, 1),
        "b3_1b":  _init_conv(ks[5], out3_3, out3_1, 3, 3),
        "b3_2_1": _init_conv(ks[6], out3_3, out3_3, 1, 3),
        "b3_2_2": _init_conv(ks[7], out3_3, out3_3, 3, 1),
        "b4":     _init_conv(ks[8], out4_1, in_channel, 1, 1),
    }


# ----------------------------------------------------------------------------
# ModuleE forward (Pallas)
# ----------------------------------------------------------------------------
_TAPS_1x3 = ((1, 0), (1, 1), (1, 2))   # on a (1,1,1,1)-padded plane
_TAPS_3x1 = ((0, 1), (1, 1), (2, 1))   # on the same padded plane
_TAPS_3x3 = tuple((di, dj) for di in range(3) for dj in range(3))


def _pad1(t):
    return jnp.pad(t, ((0, 0), (1, 1), (1, 1), (0, 0)))


def module_e_forward(params, x_nchw):
    x = jnp.transpose(x_nchw, (0, 2, 3, 1)).astype(jnp.float32)   # NCHW -> NHWC
    N, H, W, C = x.shape

    # branches 1/2/3 heads: three 1x1 convs fused into one tiled matmul (x read once)
    f1, f2_1, f3_1a = fused_conv1x1_relu(
        x, [params["b1"], params["b2_1"], params["b3_1a"]])

    # branch 2: {1x3, 3x1} convs share one padded plane of f2_1
    # TODO(synk): the 1x3/3x1 pair could also be fused into one kernel writing a
    # single lane-dense (2*out2_3)-channel output block.
    f2_1p = _pad1(f2_1)
    f2a = conv_taps_bias_relu(f2_1p, *params["b2_2_1"], _TAPS_1x3, H, W)
    f2b = conv_taps_bias_relu(f2_1p, *params["b2_2_2"], _TAPS_3x1, H, W)

    # branch 3: 1x1 -> 3x3 -> {1x3, 3x1}
    f3_1 = conv_taps_bias_relu(_pad1(f3_1a), *params["b3_1b"], _TAPS_3x3, H, W)
    f3_1p = _pad1(f3_1)
    f3a = conv_taps_bias_relu(f3_1p, *params["b3_2_1"], _TAPS_1x3, H, W)
    f3b = conv_taps_bias_relu(f3_1p, *params["b3_2_2"], _TAPS_3x1, H, W)

    # branch 4: fused avg-pool(3x3, s1, p1) + 1x1 conv + relu
    f4 = avgpool3_conv1x1_relu(_pad1(x), *params["b4"], H, W)

    out = jnp.concatenate([f1, f2a, f2b, f3a, f3b, f4], axis=-1)
    return jnp.transpose(out, (0, 3, 1, 2))                      # NHWC -> NCHW


# ----------------------------------------------------------------------------
# Pure-JAX reference (for correctness checking only)
# ----------------------------------------------------------------------------
def _ref_conv_relu(x, w, b, pad):
    y = jax.lax.conv_general_dilated(
        x, w, window_strides=(1, 1),
        padding=((pad[0], pad[0]), (pad[1], pad[1])),
        dimension_numbers=("NCHW", "OIHW", "NCHW"))
    return jax.nn.relu(y + b[None, :, None, None])


def module_e_reference(params, x):
    f1 = _ref_conv_relu(x, *params["b1"], (0, 0))
    f2_1 = _ref_conv_relu(x, *params["b2_1"], (0, 0))
    f2a = _ref_conv_relu(f2_1, *params["b2_2_1"], (0, 1))
    f2b = _ref_conv_relu(f2_1, *params["b2_2_2"], (1, 0))
    f3_1 = _ref_conv_relu(_ref_conv_relu(x, *params["b3_1a"], (0, 0)),
                          *params["b3_1b"], (1, 1))
    f3a = _ref_conv_relu(f3_1, *params["b3_2_1"], (0, 1))
    f3b = _ref_conv_relu(f3_1, *params["b3_2_2"], (1, 0))
    xpad = jnp.pad(x, ((0, 0), (0, 0), (1, 1), (1, 1)))
    pooled = jax.lax.reduce_window(xpad, 0.0, jax.lax.add,
                                   (1, 1, 3, 3), (1, 1, 1, 1), "VALID") / 9.0
    f4 = _ref_conv_relu(pooled, *params["b4"], (0, 0))
    return jnp.concatenate([f1, f2a, f2b, f3a, f3b, f4], axis=1)


# ----------------------------------------------------------------------------
if __name__ == "__main__":
    key = jax.random.PRNGKey(0)
    kx, kp = jax.random.split(key)

    # small ModuleE config
    in_channel, out1_1, out2_1, out2_3, out3_1, out3_3, out4_1 = 4, 8, 6, 8, 6, 8, 8
    params = make_module_e_params(kp, in_channel, out1_1, out2_1, out2_3,
                                  out3_1, out3_3, out4_1)

    x = jax.random.normal(kx, (2, in_channel, 16, 16), jnp.float32)  # NCHW

    fwd = jax.jit(module_e_forward)
    y = fwd(params, x)
    jax.block_until_ready(y)

    expected_c = out1_1 + 2 * out2_3 + 2 * out3_3 + out4_1
    assert y.shape == (2, expected_c, 16, 16), y.shape
    assert bool(jnp.all(jnp.isfinite(y)))

    # correctness vs. pure-JAX reference (generous tolerance: bf16 MXU inputs)
    y_ref = jax.jit(module_e_reference)(params, x)
    jax.block_until_ready(y_ref)
    assert bool(jnp.allclose(y, y_ref, atol=1e-1, rtol=1e-1)), (
        float(jnp.max(jnp.abs(y - y_ref))))

    print("KERNEL_OK")
</pallas_src>

<mosaic_0001>
module attributes {stable_mosaic.version = 11 : i64} {
  func.func @_matmul_bias_relu_kernel(%arg0: i32, %arg1: i32, %arg2: memref<256x4xf32, #tpu.memory_space<vmem>>, %arg3: memref<4x20xbf16, #tpu.memory_space<vmem>>, %arg4: memref<1x20xf32, #tpu.memory_space<vmem>>, %arg5: memref<256x20xf32, #tpu.memory_space<vmem>>, %arg6: memref<256x20xf32, #tpu.memory_space<vmem>>) attributes {dimension_semantics = [#tpu.dimension_semantics<parallel>, #tpu.dimension_semantics<arbitrary>], iteration_bounds = array<i64: 2, 1>, scalar_prefetch = 0 : i64, scratch_operands = 1 : i64, tpu.core_type = #tpu.core_type<tc>, window_params = [{transform_indices = @transform_0, window_bounds = array<i64: 256, 4>}, {transform_indices = @transform_1, window_bounds = array<i64: 4, 20>}, {pipeline_mode = #tpu.pipeline_mode<synchronous>, transform_indices = @transform_2, window_bounds = array<i64: 1, 20>}, {transform_indices = @transform_3, window_bounds = array<i64: 256, 20>}]} {
    %c0_i32 = arith.constant 0 : i32
    %0 = arith.cmpi eq, %arg1, %c0_i32 : i32
    %1 = arith.extui %0 : i1 to i32
    %c0_i32_0 = arith.constant 0 : i32
    %2 = arith.cmpi ne, %1, %c0_i32_0 : i32
    scf.if %2 {
      %cst_10 = arith.constant 0.000000e+00 : f32
      %13 = vector.broadcast %cst_10 : f32 to vector<256x20xf32>
      %c0_11 = arith.constant 0 : index
      %c0_12 = arith.constant 0 : index
      %14 = vector.load %arg6[%c0_11, %c0_12] : memref<256x20xf32, #tpu.memory_space<vmem>>, vector<256x20xf32>
      tpu.vector_store %arg6[%c0_11, %c0_12], %13 {strides = array<i32>} : memref<256x20xf32, #tpu.memory_space<vmem>>, vector<256x20xf32>,
    } else {
    }
    %c0 = arith.constant 0 : index
    %c0_1 = arith.constant 0 : index
    %3 = vector.load %arg6[%c0, %c0_1] : memref<256x20xf32, #tpu.memory_space<vmem>>, vector<256x20xf32>
    %c0_2 = arith.constant 0 : index
    %c0_3 = arith.constant 0 : index
    %4 = vector.load %arg2[%c0_2, %c0_3] : memref<256x4xf32, #tpu.memory_space<vmem>>, vector<256x4xf32>
    %5 = arith.truncf %4 : vector<256x4xf32> to vector<256x4xbf16>
    %c0_4 = arith.constant 0 : index
    %c0_5 = arith.constant 0 : index
    %6 = vector.load %arg3[%c0_4, %c0_5] : memref<4x20xbf16, #tpu.memory_space<vmem>>, vector<4x20xbf16>
    %cst = arith.constant dense<0.000000e+00> : vector<256x20xf32>
    %7 = tpu.matmul %5, %6, %cst {dimension_numbers = #tpu.dot_dimension_numbers<[1], [0], [0], [1], [0, 0, 1, 1], [], []>} : vector<256x4xbf16>, vector<4x20xbf16>, vector<256x20xf32> -> vector<256x20xf32>
    %8 = arith.addf %3, %7 : vector<256x20xf32>
    %c0_6 = arith.constant 0 : index
    %c0_7 = arith.constant 0 : index
    %9 = vector.load %arg6[%c0_6, %c0_7] : memref<256x20xf32, #tpu.memory_space<vmem>>, vector<256x20xf32>
    tpu.vector_store %arg6[%c0_6, %c0_7], %8 {strides = array<i32>} : memref<256x20xf32, #tpu.memory_space<vmem>>, vector<256x20xf32>,
    %c0_i32_8 = arith.constant 0 : i32
    %10 = arith.cmpi eq, %arg1, %c0_i32_8 : i32
    %11 = arith.extui %10 : i1 to i32
    %c0_i32_9 = arith.constant 0 : i32
    %12 = arith.cmpi ne, %11, %c0_i32_9 : i32
    scf.if %12 {
      %c0_10 = arith.constant 0 : index
      %c0_11 = arith.constant 0 : index
      %13 = vector.load %arg6[%c0_10, %c0_11] : memref<256x20xf32, #tpu.memory_space<vmem>>, vector<256x20xf32>
      %c0_12 = arith.constant 0 : index
      %c0_13 = arith.constant 0 : index
      %14 = vector.load %arg4[%c0_12, %c0_13] : memref<1x20xf32, #tpu.memory_space<vmem>>, vector<1x20xf32>
      %15 = vector.broadcast %14 : vector<1x20xf32> to vector<256x20xf32>
      %16 = arith.addf %13, %15 : vector<256x20xf32>
      %cst_14 = arith.constant 0.000000e+00 : f32
      %17 = vector.broadcast %cst_14 : f32 to vector<256x20xf32>
      %18 = arith.maximumf %16, %17 : vector<256x20xf32>
      %c0_15 = arith.constant 0 : index
      %c0_16 = arith.constant 0 : index
      %19 = vector.load %arg5[%c0_15, %c0_16] : memref<256x20xf32, #tpu.memory_space<vmem>>, vector<256x20xf32>
      tpu.vector_store %arg5[%c0_15, %c0_16], %18 {strides = array<i32>} : memref<256x20xf32, #tpu.memory_space<vmem>>, vector<256x20xf32>,
    } else {
    }
    return
  }
  func.func @transform_0(%arg0: i32, %arg1: i32) -> (i32, i32) {
    %c0_i32 = arith.constant 0 : i32
    return %arg0, %arg1 : i32, i32
  }
  func.func @transform_1(%arg0: i32, %arg1: i32) -> (i32, i32) {
    %c0_i32 = arith.constant 0 : i32
    %c0_i32_0 = arith.constant 0 : i32
    return %arg1, %c0_i32 : i32, i32
  }
  func.func @transform_2(%arg0: i32, %arg1: i32) -> (i32, i32) {
    %c0_i32 = arith.constant 0 : i32
    %c0_i32_0 = arith.constant 0 : i32
    %c0_i32_1 = arith.constant 0 : i32
    return %c0_i32, %c0_i32_0 : i32, i32
  }
  func.func @transform_3(%arg0: i32, %arg1: i32) -> (i32, i32) {
    %c0_i32 = arith.constant 0 : i32
    %c0_i32_0 = arith.constant 0 : i32
    return %arg0, %c0_i32 : i32, i32
  }
}

module attributes {stable_mosaic.version = 11 : i64} {
  func.func @_avgpool3_conv1x1_relu_kernel(%arg0: i32, %arg1: memref<1x18x18x4xf32, #tpu.memory_space<vmem>>, %arg2: memref<4x8xbf16, #tpu.memory_space<vmem>>, %arg3: memref<1x8xf32, #tpu.memory_space<vmem>>, %arg4: memref<1x256x8xf32, #tpu.memory_space<vmem>>) attributes {dimension_semantics = [#tpu.dimension_semantics<parallel>], iteration_bounds = array<i64: 2>, scalar_prefetch = 0 : i64, scratch_operands = 0 : i64, tpu.core_type = #tpu.core_type<tc>, window_params = [{transform_indices = @transform_0, window_bounds = array<i64: 1, 18, 18, 4>}, {pipeline_mode = #tpu.pipeline_mode<synchronous>, transform_indices = @transform_1, window_bounds = array<i64: 4, 8>}, {pipeline_mode = #tpu.pipeline_mode<synchronous>, transform_indices = @transform_2, window_bounds = array<i64: 1, 8>}, {transform_indices = @transform_3, window_bounds = array<i64: 1, 256, 8>}]} {
    %cst = arith.constant 0.000000e+00 : f32
    %0 = vector.broadcast %cst : f32 to vector<16x16x4xf32>
    %c0 = arith.constant 0 : index
    %c0_0 = arith.constant 0 : index
    %c0_1 = arith.constant 0 : index
    %c0_2 = arith.constant 0 : index
    %1 = vector.load %arg1[%c0, %c0_0, %c0_1, %c0_2] : memref<1x18x18x4xf32, #tpu.memory_space<vmem>>, vector<1x16x16x4xf32>
    %2 = vector.shape_cast %1 : vector<1x16x16x4xf32> to vector<16x16x4xf32>
    %3 = arith.addf %0, %2 : vector<16x16x4xf32>
    %c0_3 = arith.constant 0 : index
    %c0_4 = arith.constant 0 : index
    %c1 = arith.constant 1 : index
    %c0_5 = arith.constant 0 : index
    %4 = vector.load %arg1[%c0_3, %c0_4, %c1, %c0_5] : memref<1x18x18x4xf32, #tpu.memory_space<vmem>>, vector<1x16x16x4xf32>
    %5 = vector.shape_cast %4 : vector<1x16x16x4xf32> to vector<16x16x4xf32>
    %6 = arith.addf %3, %5 : vector<16x16x4xf32>
    %c0_6 = arith.constant 0 : index
    %c0_7 = arith.constant 0 : index
    %c2 = arith.constant 2 : index
    %c0_8 = arith.constant 0 : index
    %7 = vector.load %arg1[%c0_6, %c0_7, %c2, %c0_8] : memref<1x18x18x4xf32, #tpu.memory_space<vmem>>, vector<1x16x16x4xf32>
    %8 = vector.shape_cast %7 : vector<1x16x16x4xf32> to vector<16x16x4xf32>
    %9 = arith.addf %6, %8 : vector<16x16x4xf32>
    %c0_9 = arith.constant 0 : index
    %c1_10 = arith.constant 1 : index
    %c0_11 = arith.constant 0 : index
    %c0_12 = arith.constant 0 : index
    %10 = vector.load %arg1[%c0_9, %c1_10, %c0_11, %c0_12] : memref<1x18x18x4xf32, #tpu.memory_space<vmem>>, vector<1x16x16x4xf32>
    %11 = vector.shape_cast %10 : vector<1x16x16x4xf32> to vector<16x16x4xf32>
    %12 = arith.addf %9, %11 : vector<16x16x4xf32>
    %c0_13 = arith.constant 0 : index
    %c1_14 = arith.constant 1 : index
    %c1_15 = arith.constant 1 : index
    %c0_16 = arith.constant 0 : index
    %13 = vector.load %arg1[%c0_13, %c1_14, %c1_15, %c0_16] : memref<1x18x18x4xf32, #tpu.memory_space<vmem>>, vector<1x16x16x4xf32>
    %14 = vector.shape_cast %13 : vector<1x16x16x4xf32> to vector<16x16x4xf32>
    %15 = arith.addf %12, %14 : vector<16x16x4xf32>
    %c0_17 = arith.constant 0 : index
    %c1_18 = arith.constant 1 : index
    %c2_19 = arith.constant 2 : index
    %c0_20 = arith.constant 0 : index
    %16 = vector.load %arg1[%c0_17, %c1_18, %c2_19, %c0_20] : memref<1x18x18x4xf32, #tpu.memory_space<vmem>>, vector<1x16x16x4xf32>
    %17 = vector.shape_cast %16 : vector<1x16x16x4xf32> to vector<16x16x4xf32>
    %18 = arith.addf %15, %17 : vector<16x16x4xf32>
    %c0_21 = arith.constant 0 : index
    %c2_22 = arith.constant 2 : index
    %c0_23 = arith.constant 0 : index
    %c0_24 = arith.constant 0 : index
    %19 = vector.load %arg1[%c0_21, %c2_22, %c0_23, %c0_24] : memref<1x18x18x4xf32, #tpu.memory_space<vmem>>, vector<1x16x16x4xf32>
    %20 = vector.shape_cast %19 : vector<1x16x16x4xf32> to vector<16x16x4xf32>
    %21 = arith.addf %18, %20 : vector<16x16x4xf32>
    %c0_25 = arith.constant 0 : index
    %c2_26 = arith.constant 2 : index
    %c1_27 = arith.constant 1 : index
    %c0_28 = arith.constant 0 : index
    %22 = vector.load %arg1[%c0_25, %c2_26, %c1_27, %c0_28] : memref<1x18x18x4xf32, #tpu.memory_space<vmem>>, vector<1x16x16x4xf32>
    %23 = vector.shape_cast %22 : vector<1x16x16x4xf32> to vector<16x16x4xf32>
    %24 = arith.addf %21, %23 : vector<16x16x4xf32>
    %c0_29 = arith.constant 0 : index
    %c2_30 = arith.constant 2 : index
    %c2_31 = arith.constant 2 : index
    %c0_32 = arith.constant 0 : index
    %25 = vector.load %arg1[%c0_29, %c2_30, %c2_31, %c0_32] : memref<1x18x18x4xf32, #tpu.memory_space<vmem>>, vector<1x16x16x4xf32>
    %26 = vector.shape_cast %25 : vector<1x16x16x4xf32> to vector<16x16x4xf32>
    %27 = arith.addf %24, %26 : vector<16x16x4xf32>
    %cst_33 = arith.constant 0.111111112 : f32
    %28 = vector.broadcast %cst_33 : f32 to vector<16x16x4xf32>
    %29 = arith.mulf %27, %28 : vector<16x16x4xf32>
    %30 = vector.shape_cast %29 : vector<16x16x4xf32> to vector<256x4xf32>
    %31 = arith.truncf %30 : vector<256x4xf32> to vector<256x4xbf16>
    %c0_34 = arith.constant 0 : index
    %c0_35 = arith.constant 0 : index
    %32 = vector.load %arg2[%c0_34, %c0_35] : memref<4x8xbf16, #tpu.memory_space<vmem>>, vector<4x8xbf16>
    %cst_36 = arith.constant dense<0.000000e+00> : vector<256x8xf32>
    %33 = tpu.matmul %31, %32, %cst_36 {dimension_numbers = #tpu.dot_dimension_numbers<[1], [0], [0], [1], [0, 0, 1, 1], [], []>} : vector<256x4xbf16>, vector<4x8xbf16>, vector<256x8xf32> -> vector<256x8xf32>
    %c0_37 = arith.constant 0 : index
    %c0_38 = arith.constant 0 : index
    %34 = vector.load %arg3[%c0_37, %c0_38] : memref<1x8xf32, #tpu.memory_space<vmem>>, vector<1x8xf32>
    %35 = vector.broadcast %34 : vector<1x8xf32> to vector<256x8xf32>
    %36 = arith.addf %33, %35 : vector<256x8xf32>
    %cst_39 = arith.constant 0.000000e+00 : f32
    %37 = vector.broadcast %cst_39 : f32 to vector<256x8xf32>
    %38 = arith.maximumf %36, %37 : vector<256x8xf32>
    %c0_40 = arith.constant 0 : index
    %c0_41 = arith.constant 0 : index
    %c0_42 = arith.constant 0 : index
    %39 = vector.load %arg4[%c0_40, %c0_41, %c0_42] : memref<1x256x8xf32, #tpu.memory_space<vmem>>, vector<1x256x8xf32>
    %40 = vector.shape_cast %39 : vector<1x256x8xf32> to vector<256x8xf32>
    %41 = vector.shape_cast %38 : vector<256x8xf32> to vector<1x256x8xf32>
    tpu.vector_store %arg4[%c0_40, %c0_41, %c0_42], %41 {strides = array<i32>} : memref<1x256x8xf32, #tpu.memory_space<vmem>>, vector<1x256x8xf32>,
    return
  }
  func.func @transform_0(%arg0: i32) -> (i32, i32, i32, i32) {
    %c0_i32 = arith.constant 0 : i32
    %c0_i32_0 = arith.constant 0 : i32
    %c0_i32_1 = arith.constant 0 : i32
    %c0_i32_2 = arith.constant 0 : i32
    return %arg0, %c0_i32, %c0_i32_0, %c0_i32_1 : i32, i32, i32, i32
  }
  func.func @transform_1(%arg0: i32) -> (i32, i32) {
    %c0_i32 = arith.constant 0 : i32
    %c0_i32_0 = arith.constant 0 : i32
    %c0_i32_1 = arith.constant 0 : i32
    return %c0_i32, %c0_i32_0 : i32, i32
  }
  func.func @transform_2(%arg0: i32) -> (i32, i32) {
    %c0_i32 = arith.constant 0 : i32
    %c0_i32_0 = arith.constant 0 : i32
    %c0_i32_1 = arith.constant 0 : i32
    return %c0_i32, %c0_i32_0 : i32, i32
  }
  func.func @transform_3(%arg0: i32) -> (i32, i32, i32) {
    %c0_i32 = arith.constant 0 : i32
    %c0_i32_0 = arith.constant 0 : i32
    %c0_i32_1 = arith.constant 0 : i32
    return %arg0, %c0_i32, %c0_i32_0 : i32, i32, i32
  }
}

module attributes {stable_mosaic.version = 11 : i64} {
  func.func @_conv_taps_bias_relu_kernel(%arg0: i32, %arg1: memref<1x18x18x6xf32, #tpu.memory_space<vmem>>, %arg2: memref<9x6x8xbf16, #tpu.memory_space<vmem>>, %arg3: memref<1x8xf32, #tpu.memory_space<vmem>>, %arg4: memref<1x256x8xf32, #tpu.memory_space<vmem>>) attributes {dimension_semantics = [#tpu.dimension_semantics<parallel>], iteration_bounds = array<i64: 2>, scalar_prefetch = 0 : i64, scratch_operands = 0 : i64, tpu.core_type = #tpu.core_type<tc>, window_params = [{transform_indices = @transform_0, window_bounds = array<i64: 1, 18, 18, 6>}, {pipeline_mode = #tpu.pipeline_mode<synchronous>, transform_indices = @transform_1, window_bounds = array<i64: 9, 6, 8>}, {pipeline_mode = #tpu.pipeline_mode<synchronous>, transform_indices = @transform_2, window_bounds = array<i64: 1, 8>}, {transform_indices = @transform_3, window_bounds = array<i64: 1, 256, 8>}]} {
    %cst = arith.constant 0.000000e+00 : f32
    %0 = vector.broadcast %cst : f32 to vector<256x8xf32>
    %c0 = arith.constant 0 : index
    %c0_0 = arith.constant 0 : index
    %c0_1 = arith.constant 0 : index
    %c0_2 = arith.constant 0 : index
    %1 = vector.load %arg1[%c0, %c0_0, %c0_1, %c0_2] : memref<1x18x18x6xf32, #tpu.memory_space<vmem>>, vector<1x16x16x6xf32>
    %2 = vector.shape_cast %1 : vector<1x16x16x6xf32> to vector<16x16x6xf32>
    %3 = vector.shape_cast %2 : vector<16x16x6xf32> to vector<256x6xf32>
    %4 = arith.truncf %3 : vector<256x6xf32> to vector<256x6xbf16>
    %c0_3 = arith.constant 0 : index
    %c0_4 = arith.constant 0 : index
    %c0_5 = arith.constant 0 : index
    %5 = vector.load %arg2[%c0_3, %c0_4, %c0_5] : memref<9x6x8xbf16, #tpu.memory_space<vmem>>, vector<1x6x8xbf16>
    %6 = vector.shape_cast %5 : vector<1x6x8xbf16> to vector<6x8xbf16>
    %cst_6 = arith.constant dense<0.000000e+00> : vector<256x8xf32>
    %7 = tpu.matmul %4, %6, %cst_6 {dimension_numbers = #tpu.dot_dimension_numbers<[1], [0], [0], [1], [0, 0, 1, 1], [], []>} : vector<256x6xbf16>, vector<6x8xbf16>, vector<256x8xf32> -> vector<256x8xf32>
    %8 = arith.addf %0, %7 : vector<256x8xf32>
    %c0_7 = arith.constant 0 : index
    %c0_8 = arith.constant 0 : index
    %c1 = arith.constant 1 : index
    %c0_9 = arith.constant 0 : index
    %9 = vector.load %arg1[%c0_7, %c0_8, %c1, %c0_9] : memref<1x18x18x6xf32, #tpu.memory_space<vmem>>, vector<1x16x16x6xf32>
    %10 = vector.shape_cast %9 : vector<1x16x16x6xf32> to vector<16x16x6xf32>
    %11 = vector.shape_cast %10 : vector<16x16x6xf32> to vector<256x6xf32>
    %12 = arith.truncf %11 : vector<256x6xf32> to vector<256x6xbf16>
    %c1_10 = arith.constant 1 : index
    %c0_11 = arith.constant 0 : index
    %c0_12 = arith.constant 0 : index
    %13 = vector.load %arg2[%c1_10, %c0_11, %c0_12] : memref<9x6x8xbf16, #tpu.memory_space<vmem>>, vector<1x6x8xbf16>
    %14 = vector.shape_cast %13 : vector<1x6x8xbf16> to vector<6x8xbf16>
    %cst_13 = arith.constant dense<0.000000e+00> : vector<256x8xf32>
    %15 = tpu.matmul %12, %14, %cst_13 {dimension_numbers = #tpu.dot_dimension_numbers<[1], [0], [0], [1], [0, 0, 1, 1], [], []>} : vector<256x6xbf16>, vector<6x8xbf16>, vector<256x8xf32> -> vector<256x8xf32>
    %16 = arith.addf %8, %15 : vector<256x8xf32>
    %c0_14 = arith.constant 0 : index
    %c0_15 = arith.constant 0 : index
    %c2 = arith.constant 2 : index
    %c0_16 = arith.constant 0 : index
    %17 = vector.load %arg1[%c0_14, %c0_15, %c2, %c0_16] : memref<1x18x18x6xf32, #tpu.memory_space<vmem>>, vector<1x16x16x6xf32>
    %18 = vector.shape_cast %17 : vector<1x16x16x6xf32> to vector<16x16x6xf32>
    %19 = vector.shape_cast %18 : vector<16x16x6xf32> to vector<256x6xf32>
    %20 = arith.truncf %19 : vector<256x6xf32> to vector<256x6xbf16>
    %c2_17 = arith.constant 2 : index
    %c0_18 = arith.constant 0 : index
    %c0_19 = arith.constant 0 : index
    %21 = vector.load %arg2[%c2_17, %c0_18, %c0_19] : memref<9x6x8xbf16, #tpu.memory_space<vmem>>, vector<1x6x8xbf16>
    %22 = vector.shape_cast %21 : vector<1x6x8xbf16> to vector<6x8xbf16>
    %cst_20 = arith.constant dense<0.000000e+00> : vector<256x8xf32>
    %23 = tpu.matmul %20, %22, %cst_20 {dimension_numbers = #tpu.dot_dimension_numbers<[1], [0], [0], [1], [0, 0, 1, 1], [], []>} : vector<256x6xbf16>, vector<6x8xbf16>, vector<256x8xf32> -> vector<256x8xf32>
    %24 = arith.addf %16, %23 : vector<256x8xf32>
    %c0_21 = arith.constant 0 : index
    %c1_22 = arith.constant 1 : index
    %c0_23 = arith.constant 0 : index
    %c0_24 = arith.constant 0 : index
    %25 = vector.load %arg1[%c0_21, %c1_22, %c0_23, %c0_24] : memref<1x18x18x6xf32, #tpu.memory_space<vmem>>, vector<1x16x16x6xf32>
    %26 = vector.shape_cast %25 : vector<1x16x16x6xf32> to vector<16x16x6xf32>
    %27 = vector.shape_cast %26 : vector<16x16x6xf32> to vector<256x6xf32>
    %28 = arith.truncf %27 : vector<256x6xf32> to vector<256x6xbf16>
    %c3 = arith.constant 3 : index
    %c0_25 = arith.constant 0 : index
    %c0_26 = arith.constant 0 : index
    %29 = vector.load %arg2[%c3, %c0_25, %c0_26] : memref<9x6x8xbf16, #tpu.memory_space<vmem>>, vector<1x6x8xbf16>
    %30 = vector.shape_cast %29 : vector<1x6x8xbf16> to vector<6x8xbf16>
    %cst_27 = arith.constant dense<0.000000e+00> : vector<256x8xf32>
    %31 = tpu.matmul %28, %30, %cst_27 {dimension_numbers = #tpu.dot_dimension_numbers<[1], [0], [0], [1], [0, 0, 1, 1], [], []>} : vector<256x6xbf16>, vector<6x8xbf16>, vector<256x8xf32> -> vector<256x8xf32>
    %32 = arith.addf %24, %31 : vector<256x8xf32>
    %c0_28 = arith.constant 0 : index
    %c1_29 = arith.constant 1 : index
    %c1_30 = arith.constant 1 : index
    %c0_31 = arith.constant 0 : index
    %33 = vector.load %arg1[%c0_28, %c1_29, %c1_30, %c0_31] : memref<1x18x18x6xf32, #tpu.memory_space<vmem>>, vector<1x16x16x6xf32>
    %34 = vector.shape_cast %33 : vector<1x16x16x6xf32> to vector<16x16x6xf32>
    %35 = vector.shape_cast %34 : vector<16x16x6xf32> to vector<256x6xf32>
    %36 = arith.truncf %35 : vector<256x6xf32> to vector<256x6xbf16>
    %c4 = arith.constant 4 : index
    %c0_32 = arith.constant 0 : index
    %c0_33 = arith.constant 0 : index
    %37 = vector.load %arg2[%c4, %c0_32, %c0_33] : memref<9x6x8xbf16, #tpu.memory_space<vmem>>, vector<1x6x8xbf16>
    %38 = vector.shape_cast %37 : vector<1x6x8xbf16> to vector<6x8xbf16>
    %cst_34 = arith.constant dense<0.000000e+00> : vector<256x8xf32>
    %39 = tpu.matmul %36, %38, %cst_34 {dimension_numbers = #tpu.dot_dimension_numbers<[1], [0], [0], [1], [0, 0, 1, 1], [], []>} : vector<256x6xbf16>, vector<6x8xbf16>, vector<256x8xf32> -> vector<256x8xf32>
    %40 = arith.addf %32, %39 : vector<256x8xf32>
    %c0_35 = arith.constant 0 : index
    %c1_36 = arith.constant 1 : index
    %c2_37 = arith.constant 2 : index
    %c0_38 = arith.constant 0 : index
    %41 = vector.load %arg1[%c0_35, %c1_36, %c2_37, %c0_38] : memref<1x18x18x6xf32, #tpu.memory_space<vmem>>, vector<1x16x16x6xf32>
    %42 = vector.shape_cast %41 : vector<1x16x16x6xf32> to vector<16x16x6xf32>
    %43 = vector.shape_cast %42 : vector<16x16x6xf32> to vector<256x6xf32>
    %44 = arith.truncf %43 : vector<256x6xf32> to vector<256x6xbf16>
    %c5 = arith.constant 5 : index
    %c0_39 = arith.constant 0 : index
    %c0_40 = arith.constant 0 : index
    %45 = vector.load %arg2[%c5, %c0_39, %c0_40] : memref<9x6x8xbf16, #tpu.memory_space<vmem>>, vector<1x6x8xbf16>
    %46 = vector.shape_cast %45 : vector<1x6x8xbf16> to vector<6x8xbf16>
    %cst_41 = arith.constant dense<0.000000e+00> : vector<256x8xf32>
    %47 = tpu.matmul %44, %46, %cst_41 {dimension_numbers = #tpu.dot_dimension_numbers<[1], [0], [0], [1], [0, 0, 1, 1], [], []>} : vector<256x6xbf16>, vector<6x8xbf16>, vector<256x8xf32> -> vector<256x8xf32>
    %48 = arith.addf %40, %47 : vector<256x8xf32>
    %c0_42 = arith.constant 0 : index
    %c2_43 = arith.constant 2 : index
    %c0_44 = arith.constant 0 : index
    %c0_45 = arith.constant 0 : index
    %49 = vector.load %arg1[%c0_42, %c2_43, %c0_44, %c0_45] : memref<1x18x18x6xf32, #tpu.memory_space<vmem>>, vector<1x16x16x6xf32>
    %50 = vector.shape_cast %49 : vector<1x16x16x6xf32> to vector<16x16x6xf32>
    %51 = vector.shape_cast %50 : vector<16x16x6xf32> to vector<256x6xf32>
    %52 = arith.truncf %51 : vector<256x6xf32> to vector<256x6xbf16>
    %c6 = arith.constant 6 : index
    %c0_46 = arith.constant 0 : index
    %c0_47 = arith.constant 0 : index
    %53 = vector.load %arg2[%c6, %c0_46, %c0_47] : memref<9x6x8xbf16, #tpu.memory_space<vmem>>, vector<1x6x8xbf16>
    %54 = vector.shape_cast %53 : vector<1x6x8xbf16> to vector<6x8xbf16>
    %cst_48 = arith.constant dense<0.000000e+00> : vector<256x8xf32>
    %55 = tpu.matmul %52, %54, %cst_48 {dimension_numbers = #tpu.dot_dimension_numbers<[1], [0], [0], [1], [0, 0, 1, 1], [], []>} : vector<256x6xbf16>, vector<6x8xbf16>, vector<256x8xf32> -> vector<256x8xf32>
    %56 = arith.addf %48, %55 : vector<256x8xf32>
    %c0_49 = arith.constant 0 : index
    %c2_50 = arith.constant 2 : index
    %c1_51 = arith.constant 1 : index
    %c0_52 = arith.constant 0 : index
    %57 = vector.load %arg1[%c0_49, %c2_50, %c1_51, %c0_52] : memref<1x18x18x6xf32, #tpu.memory_space<vmem>>, vector<1x16x16x6xf32>
    %58 = vector.shape_cast %57 : vector<1x16x16x6xf32> to vector<16x16x6xf32>
    %59 = vector.shape_cast %58 : vector<16x16x6xf32> to vector<256x6xf32>
    %60 = arith.truncf %59 : vector<256x6xf32> to vector<256x6xbf16>
    %c7 = arith.constant 7 : index
    %c0_53 = arith.constant 0 : index
    %c0_54 = arith.constant 0 : index
    %61 = vector.load %arg2[%c7, %c0_53, %c0_54] : memref<9x6x8xbf16, #tpu.memory_space<vmem>>, vector<1x6x8xbf16>
    %62 = vector.shape_cast %61 : vector<1x6x8xbf16> to vector<6x8xbf16>
    %cst_55 = arith.constant dense<0.000000e+00> : vector<256x8xf32>
    %63 = tpu.matmul %60, %62, %cst_55 {dimension_numbers = #tpu.dot_dimension_numbers<[1], [0], [0], [1], [0, 0, 1, 1], [], []>} : vector<256x6xbf16>, vector<6x8xbf16>, vector<256x8xf32> -> vector<256x8xf32>
    %64 = arith.addf %56, %63 : vector<256x8xf32>
    %c0_56 = arith.constant 0 : index
    %c2_57 = arith.constant 2 : index
    %c2_58 = arith.constant 2 : index
    %c0_59 = arith.constant 0 : index
    %65 = vector.load %arg1[%c0_56, %c2_57, %c2_58, %c0_59] : memref<1x18x18x6xf32, #tpu.memory_space<vmem>>, vector<1x16x16x6xf32>
    %66 = vector.shape_cast %65 : vector<1x16x16x6xf32> to vector<16x16x6xf32>
    %67 = vector.shape_cast %66 : vector<16x16x6xf32> to vector<256x6xf32>
    %68 = arith.truncf %67 : vector<256x6xf32> to vector<256x6xbf16>
    %c8 = arith.constant 8 : index
    %c0_60 = arith.constant 0 : index
    %c0_61 = arith.constant 0 : index
    %69 = vector.load %arg2[%c8, %c0_60, %c0_61] : memref<9x6x8xbf16, #tpu.memory_space<vmem>>, vector<1x6x8xbf16>
    %70 = vector.shape_cast %69 : vector<1x6x8xbf16> to vector<6x8xbf16>
    %cst_62 = arith.constant dense<0.000000e+00> : vector<256x8xf32>
    %71 = tpu.matmul %68, %70, %cst_62 {dimension_numbers = #tpu.dot_dimension_numbers<[1], [0], [0], [1], [0, 0, 1, 1], [], []>} : vector<256x6xbf16>, vector<6x8xbf16>, vector<256x8xf32> -> vector<256x8xf32>
    %72 = arith.addf %64, %71 : vector<256x8xf32>
    %c0_63 = arith.constant 0 : index
    %c0_64 = arith.constant 0 : index
    %73 = vector.load %arg3[%c0_63, %c0_64] : memref<1x8xf32, #tpu.memory_space<vmem>>, vector<1x8xf32>
    %74 = vector.broadcast %73 : vector<1x8xf32> to vector<256x8xf32>
    %75 = arith.addf %72, %74 : vector<256x8xf32>
    %cst_65 = arith.constant 0.000000e+00 : f32
    %76 = vector.broadcast %cst_65 : f32 to vector<256x8xf32>
    %77 = arith.maximumf %75, %76 : vector<256x8xf32>
    %c0_66 = arith.constant 0 : index
    %c0_67 = arith.constant 0 : index
    %c0_68 = arith.constant 0 : index
    %78 = vector.load %arg4[%c0_66, %c0_67, %c0_68] : memref<1x256x8xf32, #tpu.memory_space<vmem>>, vector<1x256x8xf32>
    %79 = vector.shape_cast %78 : vector<1x256x8xf32> to vector<256x8xf32>
    %80 = vector.shape_cast %77 : vector<256x8xf32> to vector<1x256x8xf32>
    tpu.vector_store %arg4[%c0_66, %c0_67, %c0_68], %80 {strides = array<i32>} : memref<1x256x8xf32, #tpu.memory_space<vmem>>, vector<1x256x8xf32>,
    return
  }
  func.func @transform_0(%arg0: i32) -> (i32, i32, i32, i32) {
    %c0_i32 = arith.constant 0 : i32
    %c0_i32_0 = arith.constant 0 : i32
    %c0_i32_1 = arith.constant 0 : i32
    %c0_i32_2 = arith.constant 0 : i32
    return %arg0, %c0_i32, %c0_i32_0, %c0_i32_1 : i32, i32, i32, i32
  }
  func.func @transform_1(%arg0: i32) -> (i32, i32, i32) {
    %c0_i32 = arith.constant 0 : i32
    %c0_i32_0 = arith.constant 0 : i32
    %c0_i32_1 = arith.constant 0 : i32
    %c0_i32_2 = arith.constant 0 : i32
    return %c0_i32, %c0_i32_0, %c0_i32_1 : i32, i32, i32
  }
  func.func @transform_2(%arg0: i32) -> (i32, i32) {
    %c0_i32 = arith.constant 0 : i32
    %c0_i32_0 = arith.constant 0 : i32
    %c0_i32_1 = arith.constant 0 : i32
    return %c0_i32, %c0_i32_0 : i32, i32
  }
  func.func @transform_3(%arg0: i32) -> (i32, i32, i32) {
    %c0_i32 = arith.constant 0 : i32
    %c0_i32_0 = arith.constant 0 : i32
    %c0_i32_1 = arith.constant 0 : i32
    return %arg0, %c0_i32, %c0_i32_0 : i32, i32, i32
  }
}

module attributes {stable_mosaic.version = 11 : i64} {
  func.func @_conv_taps_bias_relu_kernel(%arg0: i32, %arg1: memref<1x18x18x6xf32, #tpu.memory_space<vmem>>, %arg2: memref<3x6x8xbf16, #tpu.memory_space<vmem>>, %arg3: memref<1x8xf32, #tpu.memory_space<vmem>>, %arg4: memref<1x256x8xf32, #tpu.memory_space<vmem>>) attributes {dimension_semantics = [#tpu.dimension_semantics<parallel>], iteration_bounds = array<i64: 2>, scalar_prefetch = 0 : i64, scratch_operands = 0 : i64, tpu.core_type = #tpu.core_type<tc>, window_params = [{transform_indices = @transform_0, window_bounds = array<i64: 1, 18, 18, 6>}, {pipeline_mode = #tpu.pipeline_mode<synchronous>, transform_indices = @transform_1, window_bounds = array<i64: 3, 6, 8>}, {pipeline_mode = #tpu.pipeline_mode<synchronous>, transform_indices = @transform_2, window_bounds = array<i64: 1, 8>}, {transform_indices = @transform_3, window_bounds = array<i64: 1, 256, 8>}]} {
    %cst = arith.constant 0.000000e+00 : f32
    %0 = vector.broadcast %cst : f32 to vector<256x8xf32>
    %c0 = arith.constant 0 : index
    %c0_0 = arith.constant 0 : index
    %c1 = arith.constant 1 : index
    %c0_1 = arith.constant 0 : index
    %1 = vector.load %arg1[%c0, %c0_0, %c1, %c0_1] : memref<1x18x18x6xf32, #tpu.memory_space<vmem>>, vector<1x16x16x6xf32>
    %2 = vector.shape_cast %1 : vector<1x16x16x6xf32> to vector<16x16x6xf32>
    %3 = vector.shape_cast %2 : vector<16x16x6xf32> to vector<256x6xf32>
    %4 = arith.truncf %3 : vector<256x6xf32> to vector<256x6xbf16>
    %c0_2 = arith.constant 0 : index
    %c0_3 = arith.constant 0 : index
    %c0_4 = arith.constant 0 : index
    %5 = vector.load %arg2[%c0_2, %c0_3, %c0_4] : memref<3x6x8xbf16, #tpu.memory_space<vmem>>, vector<1x6x8xbf16>
    %6 = vector.shape_cast %5 : vector<1x6x8xbf16> to vector<6x8xbf16>
    %cst_5 = arith.constant dense<0.000000e+00> : vector<256x8xf32>
    %7 = tpu.matmul %4, %6, %cst_5 {dimension_numbers = #tpu.dot_dimension_numbers<[1], [0], [0], [1], [0, 0, 1, 1], [], []>} : vector<256x6xbf16>, vector<6x8xbf16>, vector<256x8xf32> -> vector<256x8xf32>
    %8 = arith.addf %0, %7 : vector<256x8xf32>
    %c0_6 = arith.constant 0 : index
    %c1_7 = arith.constant 1 : index
    %c1_8 = arith.constant 1 : index
    %c0_9 = arith.constant 0 : index
    %9 = vector.load %arg1[%c0_6, %c1_7, %c1_8, %c0_9] : memref<1x18x18x6xf32, #tpu.memory_space<vmem>>, vector<1x16x16x6xf32>
    %10 = vector.shape_cast %9 : vector<1x16x16x6xf32> to vector<16x16x6xf32>
    %11 = vector.shape_cast %10 : vector<16x16x6xf32> to vector<256x6xf32>
    %12 = arith.truncf %11 : vector<256x6xf32> to vector<256x6xbf16>
    %c1_10 = arith.constant 1 : index
    %c0_11 = arith.constant 0 : index
    %c0_12 = arith.constant 0 : index
    %13 = vector.load %arg2[%c1_10, %c0_11, %c0_12] : memref<3x6x8xbf16, #tpu.memory_space<vmem>>, vector<1x6x8xbf16>
    %14 = vector.shape_cast %13 : vector<1x6x8xbf16> to vector<6x8xbf16>
    %cst_13 = arith.constant dense<0.000000e+00> : vector<256x8xf32>
    %15 = tpu.matmul %12, %14, %cst_13 {dimension_numbers = #tpu.dot_dimension_numbers<[1], [0], [0], [1], [0, 0, 1, 1], [], []>} : vector<256x6xbf16>, vector<6x8xbf16>, vector<256x8xf32> -> vector<256x8xf32>
    %16 = arith.addf %8, %15 : vector<256x8xf32>
    %c0_14 = arith.constant 0 : index
    %c2 = arith.constant 2 : index
    %c1_15 = arith.constant 1 : index
    %c0_16 = arith.constant 0 : index
    %17 = vector.load %arg1[%c0_14, %c2, %c1_15, %c0_16] : memref<1x18x18x6xf32, #tpu.memory_space<vmem>>, vector<1x16x16x6xf32>
    %18 = vector.shape_cast %17 : vector<1x16x16x6xf32> to vector<16x16x6xf32>
    %19 = vector.shape_cast %18 : vector<16x16x6xf32> to vector<256x6xf32>
    %20 = arith.truncf %19 : vector<256x6xf32> to vector<256x6xbf16>
    %c2_17 = arith.constant 2 : index
    %c0_18 = arith.constant 0 : index
    %c0_19 = arith.constant 0 : index
    %21 = vector.load %arg2[%c2_17, %c0_18, %c0_19] : memref<3x6x8xbf16, #tpu.memory_space<vmem>>, vector<1x6x8xbf16>
    %22 = vector.shape_cast %21 : vector<1x6x8xbf16> to vector<6x8xbf16>
    %cst_20 = arith.constant dense<0.000000e+00> : vector<256x8xf32>
    %23 = tpu.matmul %20, %22, %cst_20 {dimension_numbers = #tpu.dot_dimension_numbers<[1], [0], [0], [1], [0, 0, 1, 1], [], []>} : vector<256x6xbf16>, vector<6x8xbf16>, vector<256x8xf32> -> vector<256x8xf32>
    %24 = arith.addf %16, %23 : vector<256x8xf32>
    %c0_21 = arith.constant 0 : index
    %c0_22 = arith.constant 0 : index
    %25 = vector.load %arg3[%c0_21, %c0_22] : memref<1x8xf32, #tpu.memory_space<vmem>>, vector<1x8xf32>
    %26 = vector.broadcast %25 : vector<1x8xf32> to vector<256x8xf32>
    %27 = arith.addf %24, %26 : vector<256x8xf32>
    %cst_23 = arith.constant 0.000000e+00 : f32
    %28 = vector.broadcast %cst_23 : f32 to vector<256x8xf32>
    %29 = arith.maximumf %27, %28 : vector<256x8xf32>
    %c0_24 = arith.constant 0 : index
    %c0_25 = arith.constant 0 : index
    %c0_26 = arith.constant 0 : index
    %30 = vector.load %arg4[%c0_24, %c0_25, %c0_26] : memref<1x256x8xf32, #tpu.memory_space<vmem>>, vector<1x256x8xf32>
    %31 = vector.shape_cast %30 : vector<1x256x8xf32> to vector<256x8xf32>
    %32 = vector.shape_cast %29 : vector<256x8xf32> to vector<1x256x8xf32>
    tpu.vector_store %arg4[%c0_24, %c0_25, %c0_26], %32 {strides = array<i32>} : memref<1x256x8xf32, #tpu.memory_space<vmem>>, vector<1x256x8xf32>,
    return
  }
  func.func @transform_0(%arg0: i32) -> (i32, i32, i32, i32) {
    %c0_i32 = arith.constant 0 : i32
    %c0_i32_0 = arith.constant 0 : i32
    %c0_i32_1 = arith.constant 0 : i32
    %c0_i32_2 = arith.constant 0 : i32
    return %arg0, %c0_i32, %c0_i32_0, %c0_i32_1 : i32, i32, i32, i32
  }
  func.func @transform_1(%arg0: i32) -> (i32, i32, i32) {
    %c0_i32 = arith.constant 0 : i32
    %c0_i32_0 = arith.constant 0 : i32
    %c0_i32_1 = arith.constant 0 : i32
    %c0_i32_2 = arith.constant 0 : i32
    return %c0_i32, %c0_i32_0, %c0_i32_1 : i32, i32, i32
  }
  func.func @transform_2(%arg0: i32) -> (i32, i32) {
    %c0_i32 = arith.constant 0 : i32
    %c0_i32_0 = arith.constant 0 : i32
    %c0_i32_1 = arith.constant 0 : i32
    return %c0_i32, %c0_i32_0 : i32, i32
  }
  func.func @transform_3(%arg0: i32) -> (i32, i32, i32) {
    %c0_i32 = arith.constant 0 : i32
    %c0_i32_0 = arith.constant 0 : i32
    %c0_i32_1 = arith.constant 0 : i32
    return %arg0, %c0_i32, %c0_i32_0 : i32, i32, i32
  }
}

module attributes {stable_mosaic.version = 11 : i64} {
  func.func @_conv_taps_bias_relu_kernel(%arg0: i32, %arg1: memref<1x18x18x8xf32, #tpu.memory_space<vmem>>, %arg2: memref<3x8x8xbf16, #tpu.memory_space<vmem>>, %arg3: memref<1x8xf32, #tpu.memory_space<vmem>>, %arg4: memref<1x256x8xf32, #tpu.memory_space<vmem>>) attributes {dimension_semantics = [#tpu.dimension_semantics<parallel>], iteration_bounds = array<i64: 2>, scalar_prefetch = 0 : i64, scratch_operands = 0 : i64, tpu.core_type = #tpu.core_type<tc>, window_params = [{transform_indices = @transform_0, window_bounds = array<i64: 1, 18, 18, 8>}, {pipeline_mode = #tpu.pipeline_mode<synchronous>, transform_indices = @transform_1, window_bounds = array<i64: 3, 8, 8>}, {pipeline_mode = #tpu.pipeline_mode<synchronous>, transform_indices = @transform_2, window_bounds = array<i64: 1, 8>}, {transform_indices = @transform_3, window_bounds = array<i64: 1, 256, 8>}]} {
    %cst = arith.constant 0.000000e+00 : f32
    %0 = vector.broadcast %cst : f32 to vector<256x8xf32>
    %c0 = arith.constant 0 : index
    %c0_0 = arith.constant 0 : index
    %c1 = arith.constant 1 : index
    %c0_1 = arith.constant 0 : index
    %1 = vector.load %arg1[%c0, %c0_0, %c1, %c0_1] : memref<1x18x18x8xf32, #tpu.memory_space<vmem>>, vector<1x16x16x8xf32>
    %2 = vector.shape_cast %1 : vector<1x16x16x8xf32> to vector<16x16x8xf32>
    %3 = vector.shape_cast %2 : vector<16x16x8xf32> to vector<256x8xf32>
    %4 = arith.truncf %3 : vector<256x8xf32> to vector<256x8xbf16>
    %c0_2 = arith.constant 0 : index
    %c0_3 = arith.constant 0 : index
    %c0_4 = arith.constant 0 : index
    %5 = vector.load %arg2[%c0_2, %c0_3, %c0_4] : memref<3x8x8xbf16, #tpu.memory_space<vmem>>, vector<1x8x8xbf16>
    %6 = vector.shape_cast %5 : vector<1x8x8xbf16> to vector<8x8xbf16>
    %cst_5 = arith.constant dense<0.000000e+00> : vector<256x8xf32>
    %7 = tpu.matmul %4, %6, %cst_5 {dimension_numbers = #tpu.dot_dimension_numbers<[1], [0], [0], [1], [0, 0, 1, 1], [], []>} : vector<256x8xbf16>, vector<8x8xbf16>, vector<256x8xf32> -> vector<256x8xf32>
    %8 = arith.addf %0, %7 : vector<256x8xf32>
    %c0_6 = arith.constant 0 : index
    %c1_7 = arith.constant 1 : index
    %c1_8 = arith.constant 1 : index
    %c0_9 = arith.constant 0 : index
    %9 = vector.load %arg1[%c0_6, %c1_7, %c1_8, %c0_9] : memref<1x18x18x8xf32, #tpu.memory_space<vmem>>, vector<1x16x16x8xf32>
    %10 = vector.shape_cast %9 : vector<1x16x16x8xf32> to vector<16x16x8xf32>
    %11 = vector.shape_cast %10 : vector<16x16x8xf32> to vector<256x8xf32>
    %12 = arith.truncf %11 : vector<256x8xf32> to vector<256x8xbf16>
    %c1_10 = arith.constant 1 : index
    %c0_11 = arith.constant 0 : index
    %c0_12 = arith.constant 0 : index
    %13 = vector.load %arg2[%c1_10, %c0_11, %c0_12] : memref<3x8x8xbf16, #tpu.memory_space<vmem>>, vector<1x8x8xbf16>
    %14 = vector.shape_cast %13 : vector<1x8x8xbf16> to vector<8x8xbf16>
    %cst_13 = arith.constant dense<0.000000e+00> : vector<256x8xf32>
    %15 = tpu.matmul %12, %14, %cst_13 {dimension_numbers = #tpu.dot_dimension_numbers<[1], [0], [0], [1], [0, 0, 1, 1], [], []>} : vector<256x8xbf16>, vector<8x8xbf16>, vector<256x8xf32> -> vector<256x8xf32>
    %16 = arith.addf %8, %15 : vector<256x8xf32>
    %c0_14 = arith.constant 0 : index
    %c2 = arith.constant 2 : index
    %c1_15 = arith.constant 1 : index
    %c0_16 = arith.constant 0 : index
    %17 = vector.load %arg1[%c0_14, %c2, %c1_15, %c0_16] : memref<1x18x18x8xf32, #tpu.memory_space<vmem>>, vector<1x16x16x8xf32>
    %18 = vector.shape_cast %17 : vector<1x16x16x8xf32> to vector<16x16x8xf32>
    %19 = vector.shape_cast %18 : vector<16x16x8xf32> to vector<256x8xf32>
    %20 = arith.truncf %19 : vector<256x8xf32> to vector<256x8xbf16>
    %c2_17 = arith.constant 2 : index
    %c0_18 = arith.constant 0 : index
    %c0_19 = arith.constant 0 : index
    %21 = vector.load %arg2[%c2_17, %c0_18, %c0_19] : memref<3x8x8xbf16, #tpu.memory_space<vmem>>, vector<1x8x8xbf16>
    %22 = vector.shape_cast %21 : vector<1x8x8xbf16> to vector<8x8xbf16>
    %cst_20 = arith.constant dense<0.000000e+00> : vector<256x8xf32>
    %23 = tpu.matmul %20, %22, %cst_20 {dimension_numbers = #tpu.dot_dimension_numbers<[1], [0], [0], [1], [0, 0, 1, 1], [], []>} : vector<256x8xbf16>, vector<8x8xbf16>, vector<256x8xf32> -> vector<256x8xf32>
    %24 = arith.addf %16, %23 : vector<256x8xf32>
    %c0_21 = arith.constant 0 : index
    %c0_22 = arith.constant 0 : index
    %25 = vector.load %arg3[%c0_21, %c0_22] : memref<1x8xf32, #tpu.memory_space<vmem>>, vector<1x8xf32>
    %26 = vector.broadcast %25 : vector<1x8xf32> to vector<256x8xf32>
    %27 = arith.addf %24, %26 : vector<256x8xf32>
    %cst_23 = arith.constant 0.000000e+00 : f32
    %28 = vector.broadcast %cst_23 : f32 to vector<256x8xf32>
    %29 = arith.maximumf %27, %28 : vector<256x8xf32>
    %c0_24 = arith.constant 0 : index
    %c0_25 = arith.constant 0 : index
    %c0_26 = arith.constant 0 : index
    %30 = vector.load %arg4[%c0_24, %c0_25, %c0_26] : memref<1x256x8xf32, #tpu.memory_space<vmem>>, vector<1x256x8xf32>
    %31 = vector.shape_cast %30 : vector<1x256x8xf32> to vector<256x8xf32>
    %32 = vector.shape_cast %29 : vector<256x8xf32> to vector<1x256x8xf32>
    tpu.vector_store %arg4[%c0_24, %c0_25, %c0_26], %32 {strides = array<i32>} : memref<1x256x8xf32, #tpu.memory_space<vmem>>, vector<1x256x8xf32>,
    return
  }
  func.func @transform_0(%arg0: i32) -> (i32, i32, i32, i32) {
    %c0_i32 = arith.constant 0 : i32
    %c0_i32_0 = arith.constant 0 : i32
    %c0_i32_1 = arith.constant 0 : i32
    %c0_i32_2 = arith.constant 0 : i32
    return %arg0, %c0_i32, %c0_i32_0, %c0_i32_1 : i32, i32, i32, i32
  }
  func.func @transform_1(%arg0: i32) -> (i32, i32, i32) {
    %c0_i32 = arith.constant 0 : i32
    %c0_i32_0 = arith.constant 0 : i32
    %c0_i32_1 = arith.constant 0 : i32
    %c0_i32_2 = arith.constant 0 : i32
    return %c0_i32, %c0_i32_0, %c0_i32_1 : i32, i32, i32
  }
  func.func @transform_2(%arg0: i32) -> (i32, i32) {
    %c0_i32 = arith.constant 0 : i32
    %c0_i32_0 = arith.constant 0 : i32
    %c0_i32_1 = arith.constant 0 : i32
    return %c0_i32, %c0_i32_0 : i32, i32
  }
  func.func @transform_3(%arg0: i32) -> (i32, i32, i32) {
    %c0_i32 = arith.constant 0 : i32
    %c0_i32_0 = arith.constant 0 : i32
    %c0_i32_1 = arith.constant 0 : i32
    return %arg0, %c0_i32, %c0_i32_0 : i32, i32, i32
  }
}

module attributes {stable_mosaic.version = 11 : i64} {
  func.func @_conv_taps_bias_relu_kernel(%arg0: i32, %arg1: memref<1x18x18x6xf32, #tpu.memory_space<vmem>>, %arg2: memref<3x6x8xbf16, #tpu.memory_space<vmem>>, %arg3: memref<1x8xf32, #tpu.memory_space<vmem>>, %arg4: memref<1x256x8xf32, #tpu.memory_space<vmem>>) attributes {dimension_semantics = [#tpu.dimension_semantics<parallel>], iteration_bounds = array<i64: 2>, scalar_prefetch = 0 : i64, scratch_operands = 0 : i64, tpu.core_type = #tpu.core_type<tc>, window_params = [{transform_indices = @transform_0, window_bounds = array<i64: 1, 18, 18, 6>}, {pipeline_mode = #tpu.pipeline_mode<synchronous>, transform_indices = @transform_1, window_bounds = array<i64: 3, 6, 8>}, {pipeline_mode = #tpu.pipeline_mode<synchronous>, transform_indices = @transform_2, window_bounds = array<i64: 1, 8>}, {transform_indices = @transform_3, window_bounds = array<i64: 1, 256, 8>}]} {
    %cst = arith.constant 0.000000e+00 : f32
    %0 = vector.broadcast %cst : f32 to vector<256x8xf32>
    %c0 = arith.constant 0 : index
    %c1 = arith.constant 1 : index
    %c0_0 = arith.constant 0 : index
    %c0_1 = arith.constant 0 : index
    %1 = vector.load %arg1[%c0, %c1, %c0_0, %c0_1] : memref<1x18x18x6xf32, #tpu.memory_space<vmem>>, vector<1x16x16x6xf32>
    %2 = vector.shape_cast %1 : vector<1x16x16x6xf32> to vector<16x16x6xf32>
    %3 = vector.shape_cast %2 : vector<16x16x6xf32> to vector<256x6xf32>
    %4 = arith.truncf %3 : vector<256x6xf32> to vector<256x6xbf16>
    %c0_2 = arith.constant 0 : index
    %c0_3 = arith.constant 0 : index
    %c0_4 = arith.constant 0 : index
    %5 = vector.load %arg2[%c0_2, %c0_3, %c0_4] : memref<3x6x8xbf16, #tpu.memory_space<vmem>>, vector<1x6x8xbf16>
    %6 = vector.shape_cast %5 : vector<1x6x8xbf16> to vector<6x8xbf16>
    %cst_5 = arith.constant dense<0.000000e+00> : vector<256x8xf32>
    %7 = tpu.matmul %4, %6, %cst_5 {dimension_numbers = #tpu.dot_dimension_numbers<[1], [0], [0], [1], [0, 0, 1, 1], [], []>} : vector<256x6xbf16>, vector<6x8xbf16>, vector<256x8xf32> -> vector<256x8xf32>
    %8 = arith.addf %0, %7 : vector<256x8xf32>
    %c0_6 = arith.constant 0 : index
    %c1_7 = arith.constant 1 : index
    %c1_8 = arith.constant 1 : index
    %c0_9 = arith.constant 0 : index
    %9 = vector.load %arg1[%c0_6, %c1_7, %c1_8, %c0_9] : memref<1x18x18x6xf32, #tpu.memory_space<vmem>>, vector<1x16x16x6xf32>
    %10 = vector.shape_cast %9 : vector<1x16x16x6xf32> to vector<16x16x6xf32>
    %11 = vector.shape_cast %10 : vector<16x16x6xf32> to vector<256x6xf32>
    %12 = arith.truncf %11 : vector<256x6xf32> to vector<256x6xbf16>
    %c1_10 = arith.constant 1 : index
    %c0_11 = arith.constant 0 : index
    %c0_12 = arith.constant 0 : index
    %13 = vector.load %arg2[%c1_10, %c0_11, %c0_12] : memref<3x6x8xbf16, #tpu.memory_space<vmem>>, vector<1x6x8xbf16>
    %14 = vector.shape_cast %13 : vector<1x6x8xbf16> to vector<6x8xbf16>
    %cst_13 = arith.constant dense<0.000000e+00> : vector<256x8xf32>
    %15 = tpu.matmul %12, %14, %cst_13 {dimension_numbers = #tpu.dot_dimension_numbers<[1], [0], [0], [1], [0, 0, 1, 1], [], []>} : vector<256x6xbf16>, vector<6x8xbf16>, vector<256x8xf32> -> vector<256x8xf32>
    %16 = arith.addf %8, %15 : vector<256x8xf32>
    %c0_14 = arith.constant 0 : index
    %c1_15 = arith.constant 1 : index
    %c2 = arith.constant 2 : index
    %c0_16 = arith.constant 0 : index
    %17 = vector.load %arg1[%c0_14, %c1_15, %c2, %c0_16] : memref<1x18x18x6xf32, #tpu.memory_space<vmem>>, vector<1x16x16x6xf32>
    %18 = vector.shape_cast %17 : vector<1x16x16x6xf32> to vector<16x16x6xf32>
    %19 = vector.shape_cast %18 : vector<16x16x6xf32> to vector<256x6xf32>
    %20 = arith.truncf %19 : vector<256x6xf32> to vector<256x6xbf16>
    %c2_17 = arith.constant 2 : index
    %c0_18 = arith.constant 0 : index
    %c0_19 = arith.constant 0 : index
    %21 = vector.load %arg2[%c2_17, %c0_18, %c0_19] : memref<3x6x8xbf16, #tpu.memory_space<vmem>>, vector<1x6x8xbf16>
    %22 = vector.shape_cast %21 : vector<1x6x8xbf16> to vector<6x8xbf16>
    %cst_20 = arith.constant dense<0.000000e+00> : vector<256x8xf32>
    %23 = tpu.matmul %20, %22, %cst_20 {dimension_numbers = #tpu.dot_dimension_numbers<[1], [0], [0], [1], [0, 0, 1, 1], [], []>} : vector<256x6xbf16>, vector<6x8xbf16>, vector<256x8xf32> -> vector<256x8xf32>
    %24 = arith.addf %16, %23 : vector<256x8xf32>
    %c0_21 = arith.constant 0 : index
    %c0_22 = arith.constant 0 : index
    %25 = vector.load %arg3[%c0_21, %c0_22] : memref<1x8xf32, #tpu.memory_space<vmem>>, vector<1x8xf32>
    %26 = vector.broadcast %25 : vector<1x8xf32> to vector<256x8xf32>
    %27 = arith.addf %24, %26 : vector<256x8xf32>
    %cst_23 = arith.constant 0.000000e+00 : f32
    %28 = vector.broadcast %cst_23 : f32 to vector<256x8xf32>
    %29 = arith.maximumf %27, %28 : vector<256x8xf32>
    %c0_24 = arith.constant 0 : index
    %c0_25 = arith.constant 0 : index
    %c0_26 = arith.constant 0 : index
    %30 = vector.load %arg4[%c0_24, %c0_25, %c0_26] : memref<1x256x8xf32, #tpu.memory_space<vmem>>, vector<1x256x8xf32>
    %31 = vector.shape_cast %30 : vector<1x256x8xf32> to vector<256x8xf32>
    %32 = vector.shape_cast %29 : vector<256x8xf32> to vector<1x256x8xf32>
    tpu.vector_store %arg4[%c0_24, %c0_25, %c0_26], %32 {strides = array<i32>} : memref<1x256x8xf32, #tpu.memory_space<vmem>>, vector<1x256x8xf32>,
    return
  }
  func.func @transform_0(%arg0: i32) -> (i32, i32, i32, i32) {
    %c0_i32 = arith.constant 0 : i32
    %c0_i32_0 = arith.constant 0 : i32
    %c0_i32_1 = arith.constant 0 : i32
    %c0_i32_2 = arith.constant 0 : i32
    return %arg0, %c0_i32, %c0_i32_0, %c0_i32_1 : i32, i32, i32, i32
  }
  func.func @transform_1(%arg0: i32) -> (i32, i32, i32) {
    %c0_i32 = arith.constant 0 : i32
    %c0_i32_0 = arith.constant 0 : i32
    %c0_i32_1 = arith.constant 0 : i32
    %c0_i32_2 = arith.constant 0 : i32
    return %c0_i32, %c0_i32_0, %c0_i32_1 : i32, i32, i32
  }
  func.func @transform_2(%arg0: i32) -> (i32, i32) {
    %c0_i32 = arith.constant 0 : i32
    %c0_i32_0 = arith.constant 0 : i32
    %c0_i32_1 = arith.constant 0 : i32
    return %c0_i32, %c0_i32_0 : i32, i32
  }
  func.func @transform_3(%arg0: i32) -> (i32, i32, i32) {
    %c0_i32 = arith.constant 0 : i32
    %c0_i32_0 = arith.constant 0 : i32
    %c0_i32_1 = arith.constant 0 : i32
    return %arg0, %c0_i32, %c0_i32_0 : i32, i32, i32
  }
}

module attributes {stable_mosaic.version = 11 : i64} {
  func.func @_conv_taps_bias_relu_kernel(%arg0: i32, %arg1: memref<1x18x18x8xf32, #tpu.memory_space<vmem>>, %arg2: memref<3x8x8xbf16, #tpu.memory_space<vmem>>, %arg3: memref<1x8xf32, #tpu.memory_space<vmem>>, %arg4: memref<1x256x8xf32, #tpu.memory_space<vmem>>) attributes {dimension_semantics = [#tpu.dimension_semantics<parallel>], iteration_bounds = array<i64: 2>, scalar_prefetch = 0 : i64, scratch_operands = 0 : i64, tpu.core_type = #tpu.core_type<tc>, window_params = [{transform_indices = @transform_0, window_bounds = array<i64: 1, 18, 18, 8>}, {pipeline_mode = #tpu.pipeline_mode<synchronous>, transform_indices = @transform_1, window_bounds = array<i64: 3, 8, 8>}, {pipeline_mode = #tpu.pipeline_mode<synchronous>, transform_indices = @transform_2, window_bounds = array<i64: 1, 8>}, {transform_indices = @transform_3, window_bounds = array<i64: 1, 256, 8>}]} {
    %cst = arith.constant 0.000000e+00 : f32
    %0 = vector.broadcast %cst : f32 to vector<256x8xf32>
    %c0 = arith.constant 0 : index
    %c1 = arith.constant 1 : index
    %c0_0 = arith.constant 0 : index
    %c0_1 = arith.constant 0 : index
    %1 = vector.load %arg1[%c0, %c1, %c0_0, %c0_1] : memref<1x18x18x8xf32, #tpu.memory_space<vmem>>, vector<1x16x16x8xf32>
    %2 = vector.shape_cast %1 : vector<1x16x16x8xf32> to vector<16x16x8xf32>
    %3 = vector.shape_cast %2 : vector<16x16x8xf32> to vector<256x8xf32>
    %4 = arith.truncf %3 : vector<256x8xf32> to vector<256x8xbf16>
    %c0_2 = arith.constant 0 : index
    %c0_3 = arith.constant 0 : index
    %c0_4 = arith.constant 0 : index
    %5 = vector.load %arg2[%c0_2, %c0_3, %c0_4] : memref<3x8x8xbf16, #tpu.memory_space<vmem>>, vector<1x8x8xbf16>
    %6 = vector.shape_cast %5 : vector<1x8x8xbf16> to vector<8x8xbf16>
    %cst_5 = arith.constant dense<0.000000e+00> : vector<256x8xf32>
    %7 = tpu.matmul %4, %6, %cst_5 {dimension_numbers = #tpu.dot_dimension_numbers<[1], [0], [0], [1], [0, 0, 1, 1], [], []>} : vector<256x8xbf16>, vector<8x8xbf16>, vector<256x8xf32> -> vector<256x8xf32>
    %8 = arith.addf %0, %7 : vector<256x8xf32>
    %c0_6 = arith.constant 0 : index
    %c1_7 = arith.constant 1 : index
    %c1_8 = arith.constant 1 : index
    %c0_9 = arith.constant 0 : index
    %9 = vector.load %arg1[%c0_6, %c1_7, %c1_8, %c0_9] : memref<1x18x18x8xf32, #tpu.memory_space<vmem>>, vector<1x16x16x8xf32>
    %10 = vector.shape_cast %9 : vector<1x16x16x8xf32> to vector<16x16x8xf32>
    %11 = vector.shape_cast %10 : vector<16x16x8xf32> to vector<256x8xf32>
    %12 = arith.truncf %11 : vector<256x8xf32> to vector<256x8xbf16>
    %c1_10 = arith.constant 1 : index
    %c0_11 = arith.constant 0 : index
    %c0_12 = arith.constant 0 : index
    %13 = vector.load %arg2[%c1_10, %c0_11, %c0_12] : memref<3x8x8xbf16, #tpu.memory_space<vmem>>, vector<1x8x8xbf16>
    %14 = vector.shape_cast %13 : vector<1x8x8xbf16> to vector<8x8xbf16>
    %cst_13 = arith.constant dense<0.000000e+00> : vector<256x8xf32>
    %15 = tpu.matmul %12, %14, %cst_13 {dimension_numbers = #tpu.dot_dimension_numbers<[1], [0], [0], [1], [0, 0, 1, 1], [], []>} : vector<256x8xbf16>, vector<8x8xbf16>, vector<256x8xf32> -> vector<256x8xf32>
    %16 = arith.addf %8, %15 : vector<256x8xf32>
    %c0_14 = arith.constant 0 : index
    %c1_15 = arith.constant 1 : index
    %c2 = arith.constant 2 : index
    %c0_16 = arith.constant 0 : index
    %17 = vector.load %arg1[%c0_14, %c1_15, %c2, %c0_16] : memref<1x18x18x8xf32, #tpu.memory_space<vmem>>, vector<1x16x16x8xf32>
    %18 = vector.shape_cast %17 : vector<1x16x16x8xf32> to vector<16x16x8xf32>
    %19 = vector.shape_cast %18 : vector<16x16x8xf32> to vector<256x8xf32>
    %20 = arith.truncf %19 : vector<256x8xf32> to vector<256x8xbf16>
    %c2_17 = arith.constant 2 : index
    %c0_18 = arith.constant 0 : index
    %c0_19 = arith.constant 0 : index
    %21 = vector.load %arg2[%c2_17, %c0_18, %c0_19] : memref<3x8x8xbf16, #tpu.memory_space<vmem>>, vector<1x8x8xbf16>
    %22 = vector.shape_cast %21 : vector<1x8x8xbf16> to vector<8x8xbf16>
    %cst_20 = arith.constant dense<0.000000e+00> : vector<256x8xf32>
    %23 = tpu.matmul %20, %22, %cst_20 {dimension_numbers = #tpu.dot_dimension_numbers<[1], [0], [0], [1], [0, 0, 1, 1], [], []>} : vector<256x8xbf16>, vector<8x8xbf16>, vector<256x8xf32> -> vector<256x8xf32>
    %24 = arith.addf %16, %23 : vector<256x8xf32>
    %c0_21 = arith.constant 0 : index
    %c0_22 = arith.constant 0 : index
    %25 = vector.load %arg3[%c0_21, %c0_22] : memref<1x8xf32, #tpu.memory_space<vmem>>, vector<1x8xf32>
    %26 = vector.broadcast %25 : vector<1x8xf32> to vector<256x8xf32>
    %27 = arith.addf %24, %26 : vector<256x8xf32>
    %cst_23 = arith.constant 0.000000e+00 : f32
    %28 = vector.broadcast %cst_23 : f32 to vector<256x8xf32>
    %29 = arith.maximumf %27, %28 : vector<256x8xf32>
    %c0_24 = arith.constant 0 : index
    %c0_25 = arith.constant 0 : index
    %c0_26 = arith.constant 0 : index
    %30 = vector.load %arg4[%c0_24, %c0_25, %c0_26] : memref<1x256x8xf32, #tpu.memory_space<vmem>>, vector<1x256x8xf32>
    %31 = vector.shape_cast %30 : vector<1x256x8xf32> to vector<256x8xf32>
    %32 = vector.shape_cast %29 : vector<256x8xf32> to vector<1x256x8xf32>
    tpu.vector_store %arg4[%c0_24, %c0_25, %c0_26], %32 {strides = array<i32>} : memref<1x256x8xf32, #tpu.memory_space<vmem>>, vector<1x256x8xf32>,
    return
  }
  func.func @transform_0(%arg0: i32) -> (i32, i32, i32, i32) {
    %c0_i32 = arith.constant 0 : i32
    %c0_i32_0 = arith.constant 0 : i32
    %c0_i32_1 = arith.constant 0 : i32
    %c0_i32_2 = arith.constant 0 : i32
    return %arg0, %c0_i32, %c0_i32_0, %c0_i32_1 : i32, i32, i32, i32
  }
  func.func @transform_1(%arg0: i32) -> (i32, i32, i32) {
    %c0_i32 = arith.constant 0 : i32
    %c0_i32_0 = arith.constant 0 : i32
    %c0_i32_1 = arith.constant 0 : i32
    %c0_i32_2 = arith.constant 0 : i32
    return %c0_i32, %c0_i32_0, %c0_i32_1 : i32, i32, i32
  }
  func.func @transform_2(%arg0: i32) -> (i32, i32) {
    %c0_i32 = arith.constant 0 : i32
    %c0_i32_0 = arith.constant 0 : i32
    %c0_i32_1 = arith.constant 0 : i32
    return %c0_i32, %c0_i32_0 : i32, i32
  }
  func.func @transform_3(%arg0: i32) -> (i32, i32, i32) {
    %c0_i32 = arith.constant 0 : i32
    %c0_i32_0 = arith.constant 0 : i32
    %c0_i32_1 = arith.constant 0 : i32
    return %arg0, %c0_i32, %c0_i32_0 : i32, i32, i32
  }
}

</mosaic_0001>

<bundles_post_ra>
// kernel: module_e_forward.7
= control target key start
LH: loop header
LB: loop body
LE: loop exit
PB: predicated region body
PF: predicated region fallthrough
CT: control target
= control target key end

     0   :  { %s987_s12 = smov 0   ;;  %s989_s13 = smov 0   ;;  %s1260_s0 = inlined_call_operand.vmem [shape: f32[512,4], index: 0, kind: input, shape index: {}]   ;;  %s1261_s1 = inlined_call_operand.vmem [shape: bf16[4,20], index: 1, kind: input, shape index: {}]   ;;  %s1262_s2 = inlined_call_operand.vmem [shape: f32[1,20], index: 2, kind: input, shape index: {}]   ;;  %s1263_s3 = inlined_call_operand.vmem [shape: f32[512,20], index: 3, kind: output, shape index: {}]  }
   0x1   :  { %s991_s14 = smov 0  }
   0x2 LB: > { %s25_s15 = sadd.s32 1, %s960_s13  ;;  %p838_p0 = scmp.ge.s32.totalorder %s964_s14, 1  ;;  %s964_s14 = sphi %s991_s14, %s13_s14   ;;  %s960_s13 = sphi %s989_s13, %s1266_s13   ;;  %s956_s12 = sphi %s987_s12, %s1265_s12  }
   0x3   : > { %p27_p1 = scmp.ge.s32.totalorder %s25_s15, 2  ;;  %p164_p2 = scmp.lt.s32.totalorder %s964_s14, 3 }
   0x5   : > { %s1268_s15 = smov (%p27_p1, %s25_s15), 0  ;;  %p165_p3 = pnand %p838_p0, %p164_p2 }
   0x6   : > { %v332_v0 = vld [vmem:[%s1261_s1] sm:$0x3] (!%p165_p3)  ;;  %vm382_vm0 = vcmask (!%p165_p3), 1041408   ;;  %s839_s18 = sshll.u32 (!%p165_p3), %s956_s12, 5  ;;  %vm219_vm1 = vcmask (!%p165_p3), 162816   ;;  %v966_v2 = vmov (!%p165_p3), 0.0  }
   0x7   : > { %168 = sbr.rel (%p165_p3) target bundleno = 278 (0x116), region = 32  ;;  %915 = vmatprep.subr.msk.bf16.mxu0 (!%p165_p3), %vm382_vm0, %v332_v0  ;;  %916 = vmatprep.subr.msk.bf16.mxu1 (!%p165_p3), %vm382_vm0, %v332_v0  ;;  %v384_v1 = vsel (!%p165_p3), %vm382_vm0, %v332_v0, 0  ;;  %p1013_p4 = scmp.lt.s32.totalorder (!%p165_p3), %s839_s18, 63  ;;  %222 = vst.msk [vmem:[#allocation2 + $0x10] sm:$0xff] (!%p165_p3), %vm219_vm1, %v966_v2  ;;  %220 = vst.msk [vmem:[#allocation2] sm:$0xff] (!%p165_p3), %vm219_vm1, %v966_v2  ;;  %vm333_vm2 = vcmask (!%p165_p3), 31744  }
   0x8   : > { %880 = vmatpush3.bf16.msra.mxu0 (!%p165_p3), %v384_v1  ;;  %914 = vmatpush3.bf16.msra.mxu1 (!%p165_p3), %v384_v1  ;;  %221 = vst.msk [vmem:[#allocation2 + $0x8] sm:$0xff] (!%p165_p3), %vm219_vm1, %v966_v2  ;;  %223 = vst.msk [vmem:[#allocation2 + $0x18] sm:$0xff] (!%p165_p3), %vm219_vm1, %v966_v2 }
   0x9   : > { %224 = vst.msk [vmem:[#allocation2 + $0x20] sm:$0xff] (!%p165_p3), %vm219_vm1, %v966_v2  ;;  %225 = vst.msk [vmem:[#allocation2 + $0x28] sm:$0xff] (!%p165_p3), %vm219_vm1, %v966_v2 }
   0xa   : > { %226 = vst.msk [vmem:[#allocation2 + $0x30] sm:$0xff] (!%p165_p3), %vm219_vm1, %v966_v2  ;;  %227 = vst.msk [vmem:[#allocation2 + $0x38] sm:$0xff] (!%p165_p3), %vm219_vm1, %v966_v2 }
   0xb   : > { %228 = vst.msk [vmem:[#allocation2 + $0x40] sm:$0xff] (!%p165_p3), %vm219_vm1, %v966_v2  ;;  %229 = vst.msk [vmem:[#allocation2 + $0x48] sm:$0xff] (!%p165_p3), %vm219_vm1, %v966_v2 }
   0xc   : > { %230 = vst.msk [vmem:[#allocation2 + $0x50] sm:$0xff] (!%p165_p3), %vm219_vm1, %v966_v2  ;;  %231 = vst.msk [vmem:[#allocation2 + $0x58] sm:$0xff] (!%p165_p3), %vm219_vm1, %v966_v2 }
   0xd   : > { %232 = vst.msk [vmem:[#allocation2 + $0x60] sm:$0xff] (!%p165_p3), %vm219_vm1, %v966_v2  ;;  %233 = vst.msk [vmem:[#allocation2 + $0x68] sm:$0xff] (!%p165_p3), %vm219_vm1, %v966_v2 }
   0xe   : > { %234 = vst.msk [vmem:[#allocation2 + $0x70] sm:$0xff] %vm219_vm1, %v966_v2  ;;  %235 = vst.msk [vmem:[#allocation2 + $0x78] sm:$0xff] %vm219_vm1, %v966_v2  ;;  %s1270_s18 = smov (!%p1013_p4, %s839_s18), 63  ;;  %v254_v51 = vld [vmem:[#allocation2 + $0x10] sm:$0xff]  ;;  %v252_v53 = vld [vmem:[#allocation2] sm:$0xff] }
   0xf   : > { %236 = vst.msk [vmem:[#allocation2 + $0x80] sm:$0xff] %vm219_vm1, %v966_v2  ;;  %237 = vst.msk [vmem:[#allocation2 + $0x88] sm:$0xff] %vm219_vm1, %v966_v2  ;;  %s840_s20 = sshll.u32 %s1270_s18, 3  ;;  %v255_v56 = vld [vmem:[#allocation2 + $0x18] sm:$0xff]  ;;  %v253_v61 = vld [vmem:[#allocation2 + $0x8] sm:$0xff] }
  0x10   : > { %238 = vst.msk [vmem:[#allocation2 + $0x90] sm:$0xff] %vm219_vm1, %v966_v2  ;;  %239 = vst.msk [vmem:[#allocation2 + $0x98] sm:$0xff] %vm219_vm1, %v966_v2  ;;  %s1061_s23 = scalar_lea.vmem %s1260_s0, %s840_s20  ;;  %s1131_s28 = scalar_lea.vmem %s1263_s3, %s840_s20 }
  0x11   : > { %240 = vst.msk [vmem:[#allocation2 + $0xa0] sm:$0xff] %vm219_vm1, %v966_v2  ;;  %241 = vst.msk [vmem:[#allocation2 + $0xa8] sm:$0xff] %vm219_vm1, %v966_v2  ;;  %v284_v3 = vld [vmem:[%s1061_s23] sm:$0xff]  ;;  %v285_v4 = vld [vmem:[%s1061_s23 + $0x8] sm:$0xff] }
  0x12   : > { %242 = vst.msk [vmem:[#allocation2 + $0xb0] sm:$0xff] %vm219_vm1, %v966_v2  ;;  %243 = vst.msk [vmem:[#allocation2 + $0xb8] sm:$0xff] %vm219_vm1, %v966_v2  ;;  %v300_v5 = vld [vmem:[%s1061_s23 + $0x80] sm:$0xff]  ;;  %v316_v6 = vpack.c.bf16 %v285_v4, %v284_v3  ;;  %v301_v7 = vld [vmem:[%s1061_s23 + $0x88] sm:$0xff] }
  0x13   : > { %244 = vst.msk [vmem:[#allocation2 + $0xc0] sm:$0xff] %vm219_vm1, %v966_v2  ;;  %245 = vst.msk [vmem:[#allocation2 + $0xc8] sm:$0xff] %vm219_vm1, %v966_v2  ;;  %v286_v8 = vld [vmem:[%s1061_s23 + $0x10] sm:$0xff]  ;;  %v287_v9 = vld [vmem:[%s1061_s23 + $0x18] sm:$0xff]  ;;  %v324_v10 = vpack.c.bf16 %v301_v7, %v300_v5 }
  0x14   : > { %246 = vst.msk [vmem:[#allocation2 + $0xd0] sm:$0xff] %vm219_vm1, %v966_v2  ;;  %247 = vst.msk [vmem:[#allocation2 + $0xd8] sm:$0xff] %vm219_vm1, %v966_v2  ;;  %v317_v11 = vpack.c.bf16 %v287_v9, %v286_v8  ;;  %v302_v12 = vld [vmem:[%s1061_s23 + $0x90] sm:$0xff]  ;;  %v303_v13 = vld [vmem:[%s1061_s23 + $0x98] sm:$0xff]  ;;  %881 = vmatprep.mubr.msk.bf16.mxu0 %vm333_vm2, %v316_v6 }
  0x15   : > { %248 = vst.msk [vmem:[#allocation2 + $0xe0] sm:$0xff] %vm219_vm1, %v966_v2  ;;  %249 = vst.msk [vmem:[#allocation2 + $0xe8] sm:$0xff] %vm219_vm1, %v966_v2  ;;  %v288_v14 = vld [vmem:[%s1061_s23 + $0x20] sm:$0xff]  ;;  %v325_v15 = vpack.c.bf16 %v303_v13, %v302_v12  ;;  %v289_v16 = vld [vmem:[%s1061_s23 + $0x28] sm:$0xff]  ;;  %897 = vmatprep.mubr.msk.bf16.mxu1 %vm333_vm2, %v324_v10 }
  0x16   : > { %250 = vst.msk [vmem:[#allocation2 + $0xf0] sm:$0xff] %vm219_vm1, %v966_v2  ;;  %251 = vst.msk [vmem:[#allocation2 + $0xf8] sm:$0xff] %vm219_vm1, %v966_v2  ;;  %v304_v17 = vld [vmem:[%s1061_s23 + $0xa0] sm:$0xff]  ;;  %v305_v18 = vld [vmem:[%s1061_s23 + $0xa8] sm:$0xff]  ;;  %882 = vmatmul.mubr.msk.bf16.vlgmr.msra.gmra.mrb[0].mxu0 %vm333_vm2, %v317_v11  ;;  %v318_v19 = vpack.c.bf16 %v289_v16, %v288_v14 }
  0x17   : > { %v326_v20 = vpack.c.bf16 %v305_v18, %v304_v17  ;;  %898 = vmatmul.mubr.msk.bf16.vlgmr.msra.gmra.mrb[0].mxu1 %vm333_vm2, %v325_v15  ;;  %v290_v21 = vld [vmem:[%s1061_s23 + $0x30] sm:$0xff]  ;;  %v291_v22 = vld [vmem:[%s1061_s23 + $0x38] sm:$0xff]  ;;  %v292_v25 = vld [vmem:[%s1061_s23 + $0x40] sm:$0xff] }
  0x18   : > { %v306_v23 = vld [vmem:[%s1061_s23 + $0xb0] sm:$0xff]  ;;  %885 = vmatprep.mubr.msk.bf16.mxu0 %vm333_vm2, %v318_v19  ;;  %v307_v24 = vld [vmem:[%s1061_s23 + $0xb8] sm:$0xff]  ;;  %v293_v26 = vld [vmem:[%s1061_s23 + $0x48] sm:$0xff]  ;;  %v319_v29 = vpack.c.bf16 %v291_v22, %v290_v21 }
  0x19   : > { %901 = vmatprep.mubr.msk.bf16.mxu1 %vm333_vm2, %v326_v20  ;;  %v308_v27 = vld [vmem:[%s1061_s23 + $0xc0] sm:$0xff]  ;;  %v309_v28 = vld [vmem:[%s1061_s23 + $0xc8] sm:$0xff]  ;;  %v327_v30 = vpack.c.bf16 %v307_v24, %v306_v23  ;;  %v320_v31 = vpack.c.bf16 %v293_v26, %v292_v25  ;;  %v294_v33 = vld [vmem:[%s1061_s23 + $0x50] sm:$0xff] }
  0x1a   : > { %v328_v32 = vpack.c.bf16 %v309_v28, %v308_v27  ;;  %v295_v34 = vld [vmem:[%s1061_s23 + $0x58] sm:$0xff]  ;;  %v310_v35 = vld [vmem:[%s1061_s23 + $0xd0] sm:$0xff]  ;;  %v296_v37 = vld [vmem:[%s1061_s23 + $0x60] sm:$0xff] }
  0x1b   : > { %v311_v36 = vld [vmem:[%s1061_s23 + $0xd8] sm:$0xff]  ;;  %v297_v38 = vld [vmem:[%s1061_s23 + $0x68] sm:$0xff]  ;;  %v312_v39 = vld [vmem:[%s1061_s23 + $0xe0] sm:$0xff]  ;;  %v321_v41 = vpack.c.bf16 %v295_v34, %v294_v33 }
  0x1c   : > { %v313_v40 = vld [vmem:[%s1061_s23 + $0xe8] sm:$0xff]  ;;  %v329_v42 = vpack.c.bf16 %v311_v36, %v310_v35  ;;  %v322_v43 = vpack.c.bf16 %v297_v38, %v296_v37  ;;  %v298_v45 = vld [vmem:[%s1061_s23 + $0x70] sm:$0xff]  ;;  %v299_v46 = vld [vmem:[%s1061_s23 + $0x78] sm:$0xff] }
  0x1d   : > { %v330_v44 = vpack.c.bf16 %v313_v40, %v312_v39  ;;  %v314_v47 = vld [vmem:[%s1061_s23 + $0xf0] sm:$0xff]  ;;  %v315_v48 = vld [vmem:[%s1061_s23 + $0xf8] sm:$0xff]  ;;  %v323_v49 = vpack.c.bf16 %v299_v46, %v298_v45  ;;  %v268_v55 = vld [vmem:[#allocation2 + $0x80] sm:$0xff] }
  0x1e   : > { %886 = vmatmul.mubr.msk.bf16.gmra.mrb[4].mxu0 %vm333_vm2, %v319_v29  ;;  %v331_v50 = vpack.c.bf16 %v315_v48, %v314_v47  ;;  %v270_v52 = vld [vmem:[#allocation2 + $0x90] sm:$0xff]  ;;  %v271_v60 = vld [vmem:[#allocation2 + $0x98] sm:$0xff]  ;;  %v269_v2 = vld [vmem:[#allocation2 + $0x88] sm:$0xff] }
  0x1f   : > { %902 = vmatmul.mubr.msk.bf16.gmra.mrb[4].mxu1 %vm333_vm2, %v327_v30  ;;  %889 = vmatprep.mubr.msk.bf16.mxu0 %vm333_vm2, %v320_v31  ;;  %v258_v11 = vld [vmem:[#allocation2 + $0x30] sm:$0xff]  ;;  %v256_v13 = vld [vmem:[#allocation2 + $0x20] sm:$0xff]  ;;  %v259_v17 = vld [vmem:[#allocation2 + $0x38] sm:$0xff] }
  0x20   : > { %905 = vmatprep.mubr.msk.bf16.mxu1 %vm333_vm2, %v328_v32  ;;  %v274_v12 = vld [vmem:[#allocation2 + $0xb0] sm:$0xff]  ;;  %v1122_v14 = vld [vmem:[%s1262_s2] ss:$0 sm:$0xff]  ;;  %v275_v21 = vld [vmem:[#allocation2 + $0xb8] sm:$0xff] }
  0x21   : > { %v272_v16 = vld [vmem:[#allocation2 + $0xa0] sm:$0xff]  ;;  %v257_v22 = vld [vmem:[#allocation2 + $0x28] sm:$0xff] }
  0x22   : > { %v273_v28 = vld [vmem:[#allocation2 + $0xa8] sm:$0xff] }
  0x26   : > { %890 = vmatmul.mubr.msk.bf16.gmra.mrb[8].mxu0 %vm333_vm2, %v321_v41 }
  0x27   : > { %906 = vmatmul.mubr.msk.bf16.gmra.mrb[8].mxu1 %vm333_vm2, %v329_v42  ;;  %893 = vmatprep.mubr.msk.bf16.mxu0 %vm333_vm2, %v322_v43 }
  0x28   : > { %909 = vmatprep.mubr.msk.bf16.mxu1 %vm333_vm2, %v330_v44 }
  0x2e   : > { %894 = vmatmul.mubr.msk.bf16.gmra.mrb[12].mxu0 %vm333_vm2, %v323_v49 }
  0x2f   : > { %910 = vmatmul.mubr.msk.bf16.gmra.mrb[12].mxu1 %vm333_vm2, %v331_v50 }
  0xe9   : > { %v883_v54 = vpop.f32.mrb[0].mxu0 }
  0xea   : > { %v549_v57 = vadd.f32 %v883_v54, %v254_v51  ;;  %v899_v58 = vpop.f32.mrb[0].mxu1  ;;  %v420_v59 = vpop.f32.mrb[1].mxu0  ;;  %v262_v54 = vld [vmem:[#allocation2 + $0x50] sm:$0xff] }
  0xeb   : > { %v565_v62 = vadd.f32 %v899_v58, %v270_v52  ;;  %v547_v63 = vadd.f32 %v420_v59, %v252_v53  ;;  %v484_v0 = vpop.f32.mrb[1].mxu1  ;;  %v884_v1 = vpop.f32.mrb[2].mxu0  ;;  %v278_v58 = vld [vmem:[#allocation2 + $0xd0] sm:$0xff]  ;;  %v260_v59 = vld [vmem:[#allocation2 + $0x40] sm:$0xff] }
  0xec   : > { %582 = vst.msk [vmem:[#allocation2 + $0x10] sm:$0xff] %vm219_vm1, %v549_v57  ;;  %v563_v3 = vadd.f32 %v484_v0, %v268_v55  ;;  %v550_v4 = vadd.f32 %v884_v1, %v255_v56  ;;  %v900_v5 = vpop.f32.mrb[2].mxu1  ;;  %v423_v6 = vpop.f32.mrb[3].mxu0  ;;  %v263_v0 = vld [vmem:[#allocation2 + $0x58] sm:$0xff] }
  0xed   : > { %598 = vst.msk [vmem:[#allocation2 + $0x90] sm:$0xff] %vm219_vm1, %v565_v62  ;;  %580 = vst.msk [vmem:[#allocation2] sm:$0xff] %vm219_vm1, %v547_v63  ;;  %v566_v7 = vadd.f32 %v900_v5, %v271_v60  ;;  %v548_v8 = vadd.f32 %v423_v6, %v253_v61  ;;  %v487_v9 = vpop.f32.mrb[3].mxu1  ;;  %v276_v63 = vld [vmem:[#allocation2 + $0xc0] sm:$0xff]  ;;  %v279_v5 = vld [vmem:[#allocation2 + $0xd8] sm:$0xff] }
  0xee   : > { %596 = vst.msk [vmem:[#allocation2 + $0x80] sm:$0xff] %vm219_vm1, %v563_v3  ;;  %583 = vst.msk [vmem:[#allocation2 + $0x18] sm:$0xff] %vm219_vm1, %v550_v4  ;;  %v564_v10 = vadd.f32 %v487_v9, %v269_v2  ;;  %v261_v6 = vld [vmem:[#allocation2 + $0x48] sm:$0xff] }
  0xef   : > { %599 = vst.msk [vmem:[#allocation2 + $0x98] sm:$0xff] %vm219_vm1, %v566_v7  ;;  %581 = vst.msk [vmem:[#allocation2 + $0x8] sm:$0xff] %vm219_vm1, %v548_v8 }
  0xf0   : > { %597 = vst.msk [vmem:[#allocation2 + $0x88] sm:$0xff] %vm219_vm1, %v564_v10 }
  0xf1   : > { %v887_v15 = vpop.f32.mrb[4].mxu0 }
  0xf2   : > { %v553_v18 = vadd.f32 %v887_v15, %v258_v11  ;;  %v903_v19 = vpop.f32.mrb[4].mxu1  ;;  %v436_v20 = vpop.f32.mrb[5].mxu0 }
  0xf3   : > { %v617_v23 = vld [vmem:[#allocation2 + $0x10] sm:$0xff]  ;;  %v569_v24 = vadd.f32 %v903_v19, %v274_v12  ;;  %v551_v25 = vadd.f32 %v436_v20, %v256_v13  ;;  %v500_v26 = vpop.f32.mrb[5].mxu1  ;;  %v888_v27 = vpop.f32.mrb[6].mxu0  ;;  %v277_v12 = vld [vmem:[#allocation2 + $0xc8] sm:$0xff] }
  0xf4   : > { %v656_v29 = vadd.f32 %v1122_v14, %v617_v23  ;;  %v633_v30 = vld [vmem:[#allocation2 + $0x90] sm:$0xff]  ;;  %v615_v31 = vld [vmem:[#allocation2] sm:$0xff]  ;;  %586 = vst.msk [vmem:[#allocation2 + $0x30] sm:$0xff] %vm219_vm1, %v553_v18  ;;  %v567_v32 = vadd.f32 %v500_v26, %v272_v16  ;;  %v554_v33 = vadd.f32 %v888_v27, %v259_v17  ;;  %v904_v34 = vpop.f32.mrb[6].mxu1  ;;  %v439_v35 = vpop.f32.mrb[7].mxu0 }
  0xf5   : > { %v672_v36 = vadd.f32 %v1122_v14, %v633_v30  ;;  %v654_v37 = vadd.f32 %v1122_v14, %v615_v31  ;;  %v631_v38 = vld [vmem:[#allocation2 + $0x80] sm:$0xff]  ;;  %v618_v39 = vld [vmem:[#allocation2 + $0x18] sm:$0xff]  ;;  %602 = vst.msk [vmem:[#allocation2 + $0xb0] sm:$0xff] %vm219_vm1, %v569_v24  ;;  %584 = vst.msk [vmem:[#allocation2 + $0x20] sm:$0xff] %vm219_vm1, %v551_v25  ;;  %v570_v40 = vadd.f32 %v904_v34, %v275_v21  ;;  %v503_v42 = vpop.f32.mrb[7].mxu1 }
  0xf6   : > { %v552_v41 = vadd.f32 %v439_v35, %v257_v22  ;;  %v688_v43 = vmax.f32 %v656_v29, 0.0  ;;  %v670_v44 = vadd.f32 %v1122_v14, %v631_v38  ;;  %v657_v45 = vadd.f32 %v1122_v14, %v618_v39  ;;  %v634_v46 = vld [vmem:[#allocation2 + $0x98] sm:$0xff]  ;;  %v616_v47 = vld [vmem:[#allocation2 + $0x8] sm:$0xff]  ;;  %600 = vst.msk [vmem:[#allocation2 + $0xa0] sm:$0xff] %vm219_vm1, %v567_v32  ;;  %587 = vst.msk [vmem:[#allocation2 + $0x38] sm:$0xff] %vm219_vm1, %v554_v33 }
  0xf7   : > { %v568_v48 = vadd.f32 %v503_v42, %v273_v28  ;;  %v704_v49 = vmax.f32 %v672_v36, 0.0  ;;  %v686_v50 = vmax.f32 %v654_v37, 0.0  ;;  %v673_v51 = vadd.f32 %v1122_v14, %v634_v46  ;;  %v632_v53 = vld [vmem:[#allocation2 + $0x88] sm:$0xff]  ;;  %603 = vst.msk [vmem:[#allocation2 + $0xb8] sm:$0xff] %vm219_vm1, %v570_v40  ;;  %v266_v39 = vld [vmem:[#allocation2 + $0x70] sm:$0xff] }
  0xf8   : > { %v655_v52 = vadd.f32 %v1122_v14, %v616_v47  ;;  %585 = vst.msk [vmem:[#allocation2 + $0x28] sm:$0xff] %vm219_vm1, %v552_v41  ;;  %720 = vst.msk [vmem:[%s1131_s28 + $0x10] sm:$0xff] %vm219_vm1, %v688_v43  ;;  %v702_v55 = vmax.f32 %v670_v44, 0.0  ;;  %v689_v56 = vmax.f32 %v657_v45, 0.0  ;;  %v671_v57 = vadd.f32 %v1122_v14, %v632_v53  ;;  %v282_v43 = vld [vmem:[#allocation2 + $0xf0] sm:$0xff]  ;;  %v264_v44 = vld [vmem:[#allocation2 + $0x60] sm:$0xff] }
  0xf9   : > { %601 = vst.msk [vmem:[#allocation2 + $0xa8] sm:$0xff] %vm219_vm1, %v568_v48  ;;  %736 = vst.msk [vmem:[%s1131_s28 + $0x90] sm:$0xff] %vm219_vm1, %v704_v49  ;;  %v705_v60 = vmax.f32 %v673_v51, 0.0  ;;  %v891_v62 = vpop.f32.mrb[8].mxu0  ;;  %v280_v48 = vld [vmem:[#allocation2 + $0xe0] sm:$0xff]  ;;  %v267_v49 = vld [vmem:[#allocation2 + $0x78] sm:$0xff] }
  0xfa   : > { %718 = vst.msk [vmem:[%s1131_s28] sm:$0xff] %vm219_vm1, %v686_v50  ;;  %v687_v61 = vmax.f32 %v655_v52, 0.0  ;;  %734 = vst.msk [vmem:[%s1131_s28 + $0x80] sm:$0xff] %vm219_vm1, %v702_v55  ;;  %v703_v1 = vmax.f32 %v671_v57, 0.0  ;;  %v557_v2 = vadd.f32 %v891_v62, %v262_v54  ;;  %v907_v3 = vpop.f32.mrb[8].mxu1  ;;  %v452_v4 = vpop.f32.mrb[9].mxu0 }
  0xfb   : > { %721 = vst.msk [vmem:[%s1131_s28 + $0x18] sm:$0xff] %vm219_vm1, %v689_v56  ;;  %737 = vst.msk [vmem:[%s1131_s28 + $0x98] sm:$0xff] %vm219_vm1, %v705_v60  ;;  %v621_v7 = vld [vmem:[#allocation2 + $0x30] sm:$0xff]  ;;  %v573_v8 = vadd.f32 %v907_v3, %v278_v58  ;;  %v555_v9 = vadd.f32 %v452_v4, %v260_v59  ;;  %v516_v10 = vpop.f32.mrb[9].mxu1  ;;  %v892_v11 = vpop.f32.mrb[10].mxu0  ;;  %v283_v54 = vld [vmem:[#allocation2 + $0xf8] sm:$0xff] }
  0xfc   : > { %719 = vst.msk [vmem:[%s1131_s28 + $0x8] sm:$0xff] %vm219_vm1, %v687_v61  ;;  %735 = vst.msk [vmem:[%s1131_s28 + $0x88] sm:$0xff] %vm219_vm1, %v703_v1  ;;  %v660_v13 = vadd.f32 %v1122_v14, %v621_v7  ;;  %v637_v15 = vld [vmem:[#allocation2 + $0xb0] sm:$0xff]  ;;  %v619_v16 = vld [vmem:[#allocation2 + $0x20] sm:$0xff]  ;;  %v571_v17 = vadd.f32 %v516_v10, %v276_v63  ;;  %v558_v18 = vadd.f32 %v892_v11, %v263_v0  ;;  %v908_v19 = vpop.f32.mrb[10].mxu1  ;;  %v455_v20 = vpop.f32.mrb[11].mxu0 }
  0xfd   : > { %590 = vst.msk [vmem:[#allocation2 + $0x50] sm:$0xff] %vm219_vm1, %v557_v2  ;;  %v676_v21 = vadd.f32 %v1122_v14, %v637_v15  ;;  %v658_v22 = vadd.f32 %v1122_v14, %v619_v16  ;;  %v635_v23 = vld [vmem:[#allocation2 + $0xa0] sm:$0xff]  ;;  %v622_v24 = vld [vmem:[#allocation2 + $0x38] sm:$0xff]  ;;  %606 = vst.msk [vmem:[#allocation2 + $0xd0] sm:$0xff] %vm219_vm1, %v573_v8  ;;  %v574_v25 = vadd.f32 %v908_v19, %v279_v5  ;;  %v519_v27 = vpop.f32.mrb[11].mxu1 }
  0xfe   : > { %588 = vst.msk [vmem:[#allocation2 + $0x40] sm:$0xff] %vm219_vm1, %v555_v9  ;;  %v556_v26 = vadd.f32 %v455_v20, %v261_v6  ;;  %v692_v28 = vmax.f32 %v660_v13, 0.0  ;;  %v674_v29 = vadd.f32 %v1122_v14, %v635_v23  ;;  %v661_v30 = vadd.f32 %v1122_v14, %v622_v24  ;;  %v638_v31 = vld [vmem:[#allocation2 + $0xb8] sm:$0xff]  ;;  %604 = vst.msk [vmem:[#allocation2 + $0xc0] sm:$0xff] %vm219_vm1, %v571_v17  ;;  %v265_v55 = vld [vmem:[#allocation2 + $0x68] sm:$0xff] }
  0xff   : > { %v620_v32 = vld [vmem:[#allocation2 + $0x28] sm:$0xff]  ;;  %591 = vst.msk [vmem:[#allocation2 + $0x58] sm:$0xff] %vm219_vm1, %v558_v18  ;;  %v572_v33 = vadd.f32 %v519_v27, %v277_v12  ;;  %v708_v34 = vmax.f32 %v676_v21, 0.0  ;;  %v690_v35 = vmax.f32 %v658_v22, 0.0  ;;  %v677_v36 = vadd.f32 %v1122_v14, %v638_v31  ;;  %607 = vst.msk [vmem:[#allocation2 + $0xd8] sm:$0xff] %vm219_vm1, %v574_v25 }
 0x100   : > { %v659_v37 = vadd.f32 %v1122_v14, %v620_v32  ;;  %v636_v38 = vld [vmem:[#allocation2 + $0xa8] sm:$0xff]  ;;  %589 = vst.msk [vmem:[#allocation2 + $0x48] sm:$0xff] %vm219_vm1, %v556_v26  ;;  %724 = vst.msk [vmem:[%s1131_s28 + $0x30] sm:$0xff] %vm219_vm1, %v692_v28  ;;  %v706_v40 = vmax.f32 %v674_v29, 0.0  ;;  %v693_v41 = vmax.f32 %v661_v30, 0.0 }
 0x101   : > { %v675_v42 = vadd.f32 %v1122_v14, %v636_v38  ;;  %605 = vst.msk [vmem:[#allocation2 + $0xc8] sm:$0xff] %vm219_vm1, %v572_v33  ;;  %740 = vst.msk [vmem:[%s1131_s28 + $0xb0] sm:$0xff] %vm219_vm1, %v708_v34  ;;  %v709_v45 = vmax.f32 %v677_v36, 0.0  ;;  %v895_v47 = vpop.f32.mrb[12].mxu0  ;;  %v281_v61 = vld [vmem:[#allocation2 + $0xe8] sm:$0xff] }
 0x102   : > { %722 = vst.msk [vmem:[%s1131_s28 + $0x20] sm:$0xff] %vm219_vm1, %v690_v35  ;;  %v691_v46 = vmax.f32 %v659_v37, 0.0  ;;  %738 = vst.msk [vmem:[%s1131_s28 + $0xa0] sm:$0xff] %vm219_vm1, %v706_v40  ;;  %v561_v51 = vadd.f32 %v895_v47, %v266_v39  ;;  %v911_v52 = vpop.f32.mrb[12].mxu1  ;;  %v468_v53 = vpop.f32.mrb[13].mxu0 }
 0x103   : > { %725 = vst.msk [vmem:[%s1131_s28 + $0x38] sm:$0xff] %vm219_vm1, %v693_v41  ;;  %v707_v50 = vmax.f32 %v675_v42, 0.0  ;;  %741 = vst.msk [vmem:[%s1131_s28 + $0xb8] sm:$0xff] %vm219_vm1, %v709_v45  ;;  %v577_v57 = vadd.f32 %v911_v52, %v282_v43  ;;  %v559_v58 = vadd.f32 %v468_v53, %v264_v44  ;;  %v532_v59 = vpop.f32.mrb[13].mxu1  ;;  %v896_v60 = vpop.f32.mrb[14].mxu0 }
 0x104   : > { %723 = vst.msk [vmem:[%s1131_s28 + $0x28] sm:$0xff] %vm219_vm1, %v691_v46  ;;  %v625_v56 = vld [vmem:[#allocation2 + $0x50] sm:$0xff]  ;;  %594 = vst.msk [vmem:[#allocation2 + $0x70] sm:$0xff] %vm219_vm1, %v561_v51  ;;  %v575_v1 = vadd.f32 %v532_v59, %v280_v48  ;;  %v562_v2 = vadd.f32 %v896_v60, %v267_v49  ;;  %v912_v3 = vpop.f32.mrb[14].mxu1  ;;  %v471_v4 = vpop.f32.mrb[15].mxu0 }
 0x105   : > { %739 = vst.msk [vmem:[%s1131_s28 + $0xa8] sm:$0xff] %vm219_vm1, %v707_v50  ;;  %v664_v62 = vadd.f32 %v1122_v14, %v625_v56  ;;  %v641_v63 = vld [vmem:[#allocation2 + $0xd0] sm:$0xff]  ;;  %v623_v0 = vld [vmem:[#allocation2 + $0x40] sm:$0xff]  ;;  %610 = vst.msk [vmem:[#allocation2 + $0xf0] sm:$0xff] %vm219_vm1, %v577_v57  ;;  %v578_v9 = vadd.f32 %v912_v3, %v283_v54  ;;  %v560_v10 = vadd.f32 %v471_v4, %v265_v55  ;;  %v535_v11 = vpop.f32.mrb[15].mxu1 }
 0x106   : > { %v680_v5 = vadd.f32 %v1122_v14, %v641_v63  ;;  %v662_v6 = vadd.f32 %v1122_v14, %v623_v0  ;;  %v639_v7 = vld [vmem:[#allocation2 + $0xc0] sm:$0xff]  ;;  %v626_v8 = vld [vmem:[#allocation2 + $0x58] sm:$0xff]  ;;  %592 = vst.msk [vmem:[#allocation2 + $0x60] sm:$0xff] %vm219_vm1, %v559_v58  ;;  %608 = vst.msk [vmem:[#allocation2 + $0xe0] sm:$0xff] %vm219_vm1, %v575_v1  ;;  %v576_v18 = vadd.f32 %v535_v11, %v281_v61 }
 0x107   : > { %v696_v12 = vmax.f32 %v664_v62, 0.0  ;;  %v678_v13 = vadd.f32 %v1122_v14, %v639_v7  ;;  %v665_v15 = vadd.f32 %v1122_v14, %v626_v8  ;;  %v642_v16 = vld [vmem:[#allocation2 + $0xd8] sm:$0xff]  ;;  %v624_v17 = vld [vmem:[#allocation2 + $0x48] sm:$0xff]  ;;  %595 = vst.msk [vmem:[#allocation2 + $0x78] sm:$0xff] %vm219_vm1, %v562_v2  ;;  %611 = vst.msk [vmem:[#allocation2 + $0xf8] sm:$0xff] %vm219_vm1, %v578_v9 }
 0x108   : > { %v712_v19 = vmax.f32 %v680_v5, 0.0  ;;  %v694_v20 = vmax.f32 %v662_v6, 0.0  ;;  %v681_v21 = vadd.f32 %v1122_v14, %v642_v16  ;;  %v663_v22 = vadd.f32 %v1122_v14, %v624_v17  ;;  %v640_v23 = vld [vmem:[#allocation2 + $0xc8] sm:$0xff]  ;;  %593 = vst.msk [vmem:[#allocation2 + $0x68] sm:$0xff] %vm219_vm1, %v560_v10  ;;  %609 = vst.msk [vmem:[#allocation2 + $0xe8] sm:$0xff] %vm219_vm1, %v576_v18 }
 0x109   : > { %728 = vst.msk [vmem:[%s1131_s28 + $0x50] sm:$0xff] %vm219_vm1, %v696_v12  ;;  %v710_v24 = vmax.f32 %v678_v13, 0.0  ;;  %v697_v25 = vmax.f32 %v665_v15, 0.0  ;;  %v679_v26 = vadd.f32 %v1122_v14, %v640_v23 }
 0x10a   : > { %744 = vst.msk [vmem:[%s1131_s28 + $0xd0] sm:$0xff] %vm219_vm1, %v712_v19  ;;  %726 = vst.msk [vmem:[%s1131_s28 + $0x40] sm:$0xff] %vm219_vm1, %v694_v20  ;;  %v713_v27 = vmax.f32 %v681_v21, 0.0  ;;  %v695_v28 = vmax.f32 %v663_v22, 0.0 }
 0x10b   : > { %742 = vst.msk [vmem:[%s1131_s28 + $0xc0] sm:$0xff] %vm219_vm1, %v710_v24  ;;  %729 = vst.msk [vmem:[%s1131_s28 + $0x58] sm:$0xff] %vm219_vm1, %v697_v25  ;;  %v711_v29 = vmax.f32 %v679_v26, 0.0  ;;  %v629_v30 = vld [vmem:[#allocation2 + $0x70] sm:$0xff] }
 0x10c   : > { %745 = vst.msk [vmem:[%s1131_s28 + $0xd8] sm:$0xff] %vm219_vm1, %v713_v27  ;;  %727 = vst.msk [vmem:[%s1131_s28 + $0x48] sm:$0xff] %vm219_vm1, %v695_v28  ;;  %v668_v31 = vadd.f32 %v1122_v14, %v629_v30  ;;  %v645_v32 = vld [vmem:[#allocation2 + $0xf0] sm:$0xff] }
 0x10d   : > { %743 = vst.msk [vmem:[%s1131_s28 + $0xc8] sm:$0xff] %vm219_vm1, %v711_v29  ;;  %v627_v33 = vld [vmem:[#allocation2 + $0x60] sm:$0xff]  ;;  %v684_v34 = vadd.f32 %v1122_v14, %v645_v32 }
 0x10e   : > { %v666_v35 = vadd.f32 %v1122_v14, %v627_v33  ;;  %v643_v36 = vld [vmem:[#allocation2 + $0xe0] sm:$0xff]  ;;  %v630_v37 = vld [vmem:[#allocation2 + $0x78] sm:$0xff]  ;;  %v700_v38 = vmax.f32 %v668_v31, 0.0 }
 0x10f   : > { %v682_v39 = vadd.f32 %v1122_v14, %v643_v36  ;;  %v669_v40 = vadd.f32 %v1122_v14, %v630_v37  ;;  %v646_v41 = vld [vmem:[#allocation2 + $0xf8] sm:$0xff]  ;;  %v628_v42 = vld [vmem:[#allocation2 + $0x68] sm:$0xff]  ;;  %v716_v43 = vmax.f32 %v684_v34, 0.0 }
 0x110   : > { %v698_v44 = vmax.f32 %v666_v35, 0.0  ;;  %v685_v45 = vadd.f32 %v1122_v14, %v646_v41  ;;  %v667_v46 = vadd.f32 %v1122_v14, %v628_v42  ;;  %v644_v47 = vld [vmem:[#allocation2 + $0xe8] sm:$0xff]  ;;  %732 = vst.msk [vmem:[%s1131_s28 + $0x70] sm:$0xff] %vm219_vm1, %v700_v38 }
 0x111   : > { %v714_v48 = vmax.f32 %v682_v39, 0.0  ;;  %v701_v49 = vmax.f32 %v669_v40, 0.0  ;;  %v683_v50 = vadd.f32 %v1122_v14, %v644_v47  ;;  %748 = vst.msk [vmem:[%s1131_s28 + $0xf0] sm:$0xff] %vm219_vm1, %v716_v43 }
 0x112   : > { %730 = vst.msk [vmem:[%s1131_s28 + $0x60] sm:$0xff] %vm219_vm1, %v698_v44  ;;  %v717_v51 = vmax.f32 %v685_v45, 0.0  ;;  %v699_v52 = vmax.f32 %v667_v46, 0.0 }
 0x113   : > { %746 = vst.msk [vmem:[%s1131_s28 + $0xe0] sm:$0xff] %vm219_vm1, %v714_v48  ;;  %733 = vst.msk [vmem:[%s1131_s28 + $0x78] sm:$0xff] %vm219_vm1, %v701_v49  ;;  %v715_v53 = vmax.f32 %v683_v50, 0.0 }
 0x114   : > { %749 = vst.msk [vmem:[%s1131_s28 + $0xf8] sm:$0xff] %vm219_vm1, %v717_v51  ;;  %731 = vst.msk [vmem:[%s1131_s28 + $0x68] sm:$0xff] %vm219_vm1, %v699_v52 }
 0x115   : > { %747 = vst.msk [vmem:[%s1131_s28 + $0xe8] sm:$0xff] %vm219_vm1, %v715_v53 }
 0x116 PF: > { %s13_s14 = sadd.s32 1, %s964_s14   ;;  %s1265_s12 = smov %s960_s13 }
 0x117   : > { %p10_p5 = scmp.ge.s32.totalorder %s13_s14, 4   ;;  %s1266_s13 = smov %s1268_s15 }
 0x119   :  { %12 = sbr.rel (!%p10_p5) target bundleno = 2 (0x2), region = 73 }

// kernel: module_e_forward.13
= control target key start
LH: loop header
LB: loop body
LE: loop exit
PB: predicated region body
PF: predicated region fallthrough
CT: control target
= control target key end

     0   :  { %s1452_s12 = smov 0   ;;  %s1811_s0 = inlined_call_operand.vmem [shape: f32[2,18,18,4], index: 0, kind: input, shape index: {}]   ;;  %s1812_s1 = inlined_call_operand.vmem [shape: bf16[4,8], index: 1, kind: input, shape index: {}]   ;;  %s1813_s2 = inlined_call_operand.vmem [shape: f32[1,8], index: 2, kind: input, shape index: {}]   ;;  %s1814_s3 = inlined_call_operand.vmem [shape: f32[2,256,8], index: 3, kind: output, shape index: {}]  }
   0x1 LB: > { %s1140_s13 = sadd.s32 4294967295, %s1430_s12   ;;  %p1144_p0 = scmp.ge.s32.totalorder %s1430_s12, 1  ;;  %s1430_s12 = sphi %s1452_s12, %s13_s12  }
   0x2   : > { %p137_p1 = scmp.lt.s32.totalorder %s1430_s12, 3 }
   0x4   : > { %p138_p2 = pnand %p1144_p0, %p137_p1 }
   0x5   : > { %v798_v0 = vld [vmem:[%s1812_s1] sm:$0x3] (!%p138_p2)  ;;  %vm855_vm0 = vcmask (!%p138_p2), 1041408   ;;  %p161_p3 = scmp.lt.s32.totalorder (!%p138_p2), %s1140_s13, 1  ;;  %vm806_vm1 = vcmask (!%p138_p2), 31744   ;;  %vm1052_vm2 = vcmask (!%p138_p2), 64512  }
   0x6   : > { %141 = sbr.rel (%p138_p2) target bundleno = 325 (0x145), region = 32  ;;  %1413 = vmatprep.subr.msk.bf16.mxu0 (!%p138_p2), %vm855_vm0, %v798_v0  ;;  %1414 = vmatprep.subr.msk.bf16.mxu1 (!%p138_p2), %vm855_vm0, %v798_v0  ;;  %v857_v1 = vsel (!%p138_p2), %vm855_vm0, %v798_v0, 0 }
   0x7   : > { %1378 = vmatpush3.bf16.msra.mxu0 (!%p138_p2), %v857_v1  ;;  %1412 = vmatpush3.bf16.msra.mxu1 (!%p138_p2), %v857_v1 }
   0xd   : > { %s1816_s13 = smov (!%p161_p3, %s1140_s13), 1 }
   0xe   : > { %s1415_s16 = smul.u32 432, %s1816_s13  ;;  %s1359_s22 = sshll.u32 %s1816_s13, 8 }
   0xf   : > { %s1711_s25 = scalar_lea.vmem %s1814_s3, %s1359_s22 }
  0x10   : > { %s1469_s19 = scalar_lea.vmem %s1811_s0, %s1415_s16 }
  0x11   : > { %v172_v2 = vld [vmem:[%s1469_s19] sm:$0xff]  ;;  %v173_v3 = vld [vmem:[%s1469_s19 + $0x8] sm:$0xff]  ;;  %v1148_v10 = vld [vmem:[%s1469_s19 + $0x18] sm:$0xff] }
  0x12   : > { %v236_v4 = vld [vmem:[%s1469_s19 + $0x1] sm:$0xff]  ;;  %v237_v5 = vld [vmem:[%s1469_s19 + $0x9] sm:$0xff]  ;;  %v1180_v12 = vld [vmem:[%s1469_s19 + $0x19] sm:$0xff] }
  0x13   : > { %v268_v6 = vadd.f32 %v236_v4, %v172_v2  ;;  %v300_v7 = vld [vmem:[%s1469_s19 + $0x2] sm:$0xff]  ;;  %v301_v8 = vld [vmem:[%s1469_s19 + $0xa] sm:$0xff]  ;;  %v269_v9 = vadd.f32 %v237_v5, %v173_v3  ;;  %v1212_v15 = vld [vmem:[%s1469_s19 + $0x1a] sm:$0xff]  ;;  %v270_v17 = vadd.f32 %v1180_v12, %v1148_v10 }
  0x14   : > { %v1149_v11 = vld [vmem:[%s1469_s19 + $0x20] sm:$0xff]  ;;  %v1244_v19 = vld [vmem:[%s1469_s19 + $0x30] sm:$0xff]  ;;  %v1245_v20 = vld [vmem:[%s1469_s19 + $0x38] sm:$0xff] }
  0x15   : > { %v332_v13 = vadd.f32 %v300_v7, %v268_v6  ;;  %v1181_v14 = vld [vmem:[%s1469_s19 + $0x21] sm:$0xff]  ;;  %v333_v18 = vadd.f32 %v301_v8, %v269_v9  ;;  %v1276_v21 = vld [vmem:[%s1469_s19 + $0x31] sm:$0xff]  ;;  %v1277_v24 = vld [vmem:[%s1469_s19 + $0x39] sm:$0xff]  ;;  %v334_v27 = vadd.f32 %v1212_v15, %v270_v17 }
  0x16   : > { %v1213_v16 = vld [vmem:[%s1469_s19 + $0x22] sm:$0xff]  ;;  %v271_v22 = vadd.f32 %v1181_v14, %v1149_v11  ;;  %v1308_v25 = vld [vmem:[%s1469_s19 + $0x32] sm:$0xff]  ;;  %v1489_v26 = vld [vmem:[%s1469_s19 + $0x3a] sm:$0xff]  ;;  %v272_v28 = vadd.f32 %v1276_v21, %v1244_v19  ;;  %v273_v34 = vadd.f32 %v1277_v24, %v1245_v20 }
  0x17   : > { %v397_v23 = vadd.f32 %v1148_v10, %v332_v13  ;;  %v398_v29 = vadd.f32 %v1149_v11, %v333_v18  ;;  %v1492_v30 = vld [vmem:[%s1469_s19 + $0xc0] sm:$0xff]  ;;  %v1495_v31 = vld [vmem:[%s1469_s19 + $0xc8] sm:$0xff]  ;;  %v399_v40 = vadd.f32 %v1244_v19, %v334_v27  ;;  %v1516_v44 = vld [vmem:[%s1469_s19 + $0xd8] sm:$0xff] }
  0x18   : > { %v1498_v32 = vld [vmem:[%s1469_s19 + $0xc1] sm:$0xff]  ;;  %v335_v33 = vadd.f32 %v1213_v16, %v271_v22  ;;  %v1501_v36 = vld [vmem:[%s1469_s19 + $0xc9] sm:$0xff]  ;;  %v1511_v41 = vadd.f32 %v1308_v25, %v272_v28  ;;  %v1522_v46 = vld [vmem:[%s1469_s19 + $0xd9] sm:$0xff]  ;;  %v1525_v48 = vadd.f32 %v1489_v26, %v273_v34 }
  0x19   : > { %v461_v35 = vadd.f32 %v1180_v12, %v397_v23  ;;  %v284_v37 = vadd.f32 %v1498_v32, %v1492_v30  ;;  %v1506_v38 = vld [vmem:[%s1469_s19 + $0xc2] sm:$0xff]  ;;  %v1509_v39 = vld [vmem:[%s1469_s19 + $0xca] sm:$0xff]  ;;  %v462_v42 = vadd.f32 %v1181_v14, %v398_v29  ;;  %v285_v43 = vadd.f32 %v1501_v36, %v1495_v31  ;;  %v1532_v52 = vld [vmem:[%s1469_s19 + $0xda] sm:$0xff] }
  0x1a   : > { %v1519_v45 = vld [vmem:[%s1469_s19 + $0xe0] sm:$0xff]  ;;  %v400_v47 = vadd.f32 %v1245_v20, %v335_v33  ;;  %v463_v54 = vadd.f32 %v1276_v21, %v399_v40  ;;  %v286_v55 = vadd.f32 %v1522_v46, %v1516_v44  ;;  %v1541_v58 = vld [vmem:[%s1469_s19 + $0xf0] sm:$0xff]  ;;  %v1547_v63 = vld [vmem:[%s1469_s19 + $0xf8] sm:$0xff] }
  0x1b   : > { %v525_v49 = vadd.f32 %v1212_v15, %v461_v35  ;;  %v348_v50 = vadd.f32 %v1506_v38, %v284_v37  ;;  %v1529_v51 = vld [vmem:[%s1469_s19 + $0xe1] sm:$0xff]  ;;  %v526_v56 = vadd.f32 %v1213_v16, %v462_v42  ;;  %v349_v57 = vadd.f32 %v1509_v39, %v285_v43  ;;  %v1292_v4 = vld [vmem:[%s1469_s19 + $0xf1] sm:$0xff]  ;;  %v1293_v10 = vld [vmem:[%s1469_s19 + $0xf9] sm:$0xff] }
  0x1c   : > { %v1535_v53 = vld [vmem:[%s1469_s19 + $0xe2] sm:$0xff]  ;;  %v464_v59 = vadd.f32 %v1277_v24, %v400_v47  ;;  %v287_v60 = vadd.f32 %v1529_v51, %v1519_v45  ;;  %v527_v0 = vadd.f32 %v1308_v25, %v463_v54  ;;  %v350_v1 = vadd.f32 %v1532_v52, %v286_v55  ;;  %v1560_v11 = vld [vmem:[%s1469_s19 + $0x50] sm:$0xff]  ;;  %v1325_v22 = vld [vmem:[%s1469_s19 + $0xfa] sm:$0xff] }
  0x1d   : > { %v590_v61 = vadd.f32 %v1244_v19, %v525_v49  ;;  %v413_v62 = vadd.f32 %v1516_v44, %v348_v50  ;;  %v591_v2 = vadd.f32 %v1245_v20, %v526_v56  ;;  %v414_v3 = vadd.f32 %v1519_v45, %v349_v57  ;;  %v1554_v6 = vld [vmem:[%s1469_s19 + $0x48] sm:$0xff]  ;;  %v1324_v16 = vld [vmem:[%s1469_s19 + $0xf2] sm:$0xff] }
  0x1e   : > { %v528_v5 = vadd.f32 %v1489_v26, %v464_v59  ;;  %v351_v7 = vadd.f32 %v1535_v53, %v287_v60  ;;  %v592_v12 = vadd.f32 %v1554_v6, %v527_v0  ;;  %v415_v13 = vadd.f32 %v1541_v58, %v350_v1  ;;  %v1278_v18 = vld [vmem:[%s1469_s19 + $0x49] sm:$0xff]  ;;  %v1279_v23 = vld [vmem:[%s1469_s19 + $0x51] sm:$0xff] }
  0x1f   : > { %v654_v8 = vadd.f32 %v1276_v21, %v590_v61  ;;  %v477_v9 = vadd.f32 %v1522_v46, %v413_v62  ;;  %v655_v14 = vadd.f32 %v1277_v24, %v591_v2  ;;  %v478_v15 = vadd.f32 %v1529_v51, %v414_v3  ;;  %v1310_v34 = vld [vmem:[%s1469_s19 + $0x4a] sm:$0xff]  ;;  %v1577_v42 = vld [vmem:[%s1469_s19 + $0x52] sm:$0xff] }
  0x20   : > { %v593_v17 = vadd.f32 %v1560_v11, %v528_v5  ;;  %v416_v19 = vadd.f32 %v1547_v63, %v351_v7  ;;  %v656_v27 = vadd.f32 %v1278_v18, %v592_v12  ;;  %v479_v28 = vadd.f32 %v1292_v4, %v415_v13  ;;  %v1262_v54 = vld [vmem:[%s1469_s19 + $0x108] sm:$0xff]  ;;  %v1263_v57 = vld [vmem:[%s1469_s19 + $0x110] sm:$0xff] }
  0x21   : > { %v718_v20 = vadd.f32 %v1308_v25, %v654_v8  ;;  %v541_v21 = vadd.f32 %v1532_v52, %v477_v9  ;;  %v719_v29 = vadd.f32 %v1489_v26, %v655_v14  ;;  %v542_v24 = vadd.f32 %v1535_v53, %v478_v15  ;;  %v1294_v2 = vld [vmem:[%s1469_s19 + $0x109] sm:$0xff]  ;;  %v1295_v5 = vld [vmem:[%s1469_s19 + $0x111] sm:$0xff] }
  0x22   : > { %v657_v33 = vadd.f32 %v1279_v23, %v593_v17  ;;  %v480_v35 = vadd.f32 %v1293_v10, %v416_v19  ;;  %v720_v25 = vadd.f32 %v1310_v34, %v656_v27  ;;  %v543_v43 = vadd.f32 %v1324_v16, %v479_v28  ;;  %v1327_v19 = vld [vmem:[%s1469_s19 + $0x112] sm:$0xff] }
  0x23   : > { %v750_v37 = vmul.f32 0.11111111, %v718_v20  ;;  %v606_v40 = vadd.f32 %v1541_v58, %v541_v21  ;;  %v751_v47 = vmul.f32 0.11111111, %v719_v29  ;;  %v607_v49 = vadd.f32 %v1547_v63, %v542_v24  ;;  %v1248_v29 = vld [vmem:[%s1469_s19 + $0x60] sm:$0xff] }
  0x24   : > { %v721_v26 = vadd.f32 %v1577_v42, %v657_v33  ;;  %v544_v50 = vadd.f32 %v1325_v22, %v480_v35  ;;  %v752_v56 = vmul.f32 0.11111111, %v720_v25  ;;  %v608_v59 = vadd.f32 %v1262_v54, %v543_v43  ;;  %v1249_v43 = vld [vmem:[%s1469_s19 + $0x68] sm:$0xff] }
  0x25   : > { %v670_v55 = vadd.f32 %v1292_v4, %v606_v40  ;;  %v401_v60 = vadd.f32 %v1554_v6, %v1511_v41  ;;  %v782_v61 = vpack.c.bf16 %v751_v47, %v750_v37  ;;  %v671_v62 = vadd.f32 %v1293_v10, %v607_v49  ;;  %v1326_v41 = vld [vmem:[%s1469_s19 + $0x10a] sm:$0xff]  ;;  %v1280_v47 = vld [vmem:[%s1469_s19 + $0x61] sm:$0xff] }
  0x26   : > { %v753_v0 = vmul.f32 0.11111111, %v721_v26  ;;  %v609_v1 = vadd.f32 %v1263_v57, %v544_v50  ;;  %v672_v7 = vadd.f32 %v1294_v2, %v608_v59  ;;  %v402_v8 = vadd.f32 %v1560_v11, %v1525_v48  ;;  %v1312_v59 = vld [vmem:[%s1469_s19 + $0x62] sm:$0xff] }
  0x27   : > { %v734_v3 = vadd.f32 %v1324_v16, %v670_v55  ;;  %v465_v9 = vadd.f32 %v1278_v18, %v401_v60  ;;  %1379 = vmatprep.mubr.msk.bf16.mxu0 %vm806_vm1, %v782_v61  ;;  %v735_v12 = vadd.f32 %v1325_v22, %v671_v62  ;;  %v288_v15 = vadd.f32 %v1292_v4, %v1541_v58 }
  0x28   : > { %v783_v13 = vpack.c.bf16 %v753_v0, %v752_v56  ;;  %v673_v14 = vadd.f32 %v1295_v5, %v609_v1  ;;  %v736_v20 = vadd.f32 %v1326_v41, %v672_v7  ;;  %v466_v21 = vadd.f32 %v1279_v23, %v402_v8  ;;  %v1281_v56 = vld [vmem:[%s1469_s19 + $0x69] sm:$0xff] }
  0x29   : > { %v766_v17 = vmul.f32 0.11111111, %v734_v3  ;;  %v529_v27 = vadd.f32 %v1310_v34, %v465_v9  ;;  %v767_v28 = vmul.f32 0.11111111, %v735_v12  ;;  %v289_v24 = vadd.f32 %v1293_v10, %v1547_v63  ;;  %v1265_v12 = vld [vmem:[%s1469_s19 + $0x128] sm:$0xff] }
  0x2a   : > { %1380 = vmatmul.mubr.msk.bf16.vlgmr.msra.gmra.mrb[0].mxu0 %vm806_vm1, %v783_v13  ;;  %v737_v48 = vadd.f32 %v1327_v19, %v673_v14  ;;  %v352_v33 = vadd.f32 %v1324_v16, %v288_v15  ;;  %v768_v35 = vmul.f32 0.11111111, %v736_v20  ;;  %v530_v37 = vadd.f32 %v1577_v42, %v466_v21  ;;  %v1297_v21 = vld [vmem:[%s1469_s19 + $0x129] sm:$0xff] }
  0x2b   : > { %v594_v58 = vadd.f32 %v1248_v29, %v529_v27  ;;  %v274_v4 = vadd.f32 %v1278_v18, %v1554_v6  ;;  %v790_v40 = vpack.c.bf16 %v767_v28, %v766_v17  ;;  %v353_v49 = vadd.f32 %v1325_v22, %v289_v24  ;;  %v1605_v22 = vld [vmem:[%s1469_s19 + $0x120] sm:$0xff]  ;;  %v1250_v24 = vld [vmem:[%s1469_s19 + $0x78] sm:$0xff] }
  0x2c   : > { %v769_v25 = vmul.f32 0.11111111, %v737_v48  ;;  %v417_v26 = vadd.f32 %v1262_v54, %v352_v33  ;;  %v595_v50 = vadd.f32 %v1249_v43, %v530_v37  ;;  %v275_v63 = vadd.f32 %v1279_v23, %v1560_v11  ;;  %v1313_v11 = vld [vmem:[%s1469_s19 + $0x6a] sm:$0xff]  ;;  %v1328_v27 = vld [vmem:[%s1469_s19 + $0x122] sm:$0xff] }
  0x2d   : > { %v658_v55 = vadd.f32 %v1280_v47, %v594_v58  ;;  %v338_v10 = vadd.f32 %v1310_v34, %v274_v4  ;;  %1395 = vmatprep.mubr.msk.bf16.mxu1 %vm806_vm1, %v790_v40  ;;  %v418_v60 = vadd.f32 %v1263_v57, %v353_v49  ;;  %v290_v18 = vadd.f32 %v1294_v2, %v1262_v54  ;;  %v1296_v54 = vld [vmem:[%s1469_s19 + $0x121] sm:$0xff]  ;;  %v1329_v58 = vld [vmem:[%s1469_s19 + $0x12a] sm:$0xff] }
  0x2e   : > { %v791_v16 = vpack.c.bf16 %v769_v25, %v768_v35  ;;  %v481_v6 = vadd.f32 %v1294_v2, %v417_v26  ;;  %v659_v61 = vadd.f32 %v1281_v56, %v595_v50  ;;  %v339_v0 = vadd.f32 %v1577_v42, %v275_v63  ;;  %v1251_v26 = vld [vmem:[%s1469_s19 + $0x80] sm:$0xff] }
  0x2f   : > { %v722_v62 = vadd.f32 %v1312_v59, %v658_v55  ;;  %v403_v1 = vadd.f32 %v1248_v29, %v338_v10  ;;  %v482_v23 = vadd.f32 %v1295_v5, %v418_v60  ;;  %v291_v3 = vadd.f32 %v1295_v5, %v1263_v57  ;;  %v1282_v50 = vld [vmem:[%s1469_s19 + $0x79] sm:$0xff] }
  0x30   : > { %1396 = vmatmul.mubr.msk.bf16.vlgmr.msra.gmra.mrb[0].mxu1 %vm806_vm1, %v791_v16  ;;  %v545_v34 = vadd.f32 %v1326_v41, %v481_v6  ;;  %v354_v7 = vadd.f32 %v1326_v41, %v290_v18  ;;  %v723_v8 = vadd.f32 %v1313_v11, %v659_v61  ;;  %v404_v2 = vadd.f32 %v1249_v43, %v339_v0  ;;  %v1266_v10 = vld [vmem:[%s1469_s19 + $0x138] sm:$0xff] }
  0x31   : > { %v754_v9 = vmul.f32 0.11111111, %v722_v62  ;;  %v467_v13 = vadd.f32 %v1280_v47, %v403_v1  ;;  %v546_v14 = vadd.f32 %v1327_v19, %v482_v23  ;;  %v355_v15 = vadd.f32 %v1327_v19, %v291_v3  ;;  %v1267_v23 = vld [vmem:[%s1469_s19 + $0x140] sm:$0xff] }
  0x32   : > { %v610_v42 = vadd.f32 %v1605_v22, %v545_v34  ;;  %v419_v17 = vadd.f32 %v1605_v22, %v354_v7  ;;  %v755_v20 = vmul.f32 0.11111111, %v723_v8  ;;  %v468_v57 = vadd.f32 %v1281_v56, %v404_v2  ;;  %v1298_v34 = vld [vmem:[%s1469_s19 + $0x139] sm:$0xff] }
  0x33   : > { %v531_v5 = vadd.f32 %v1312_v59, %v467_v13  ;;  %v276_v41 = vadd.f32 %v1280_v47, %v1248_v29  ;;  %v611_v28 = vadd.f32 %v1265_v12, %v546_v14  ;;  %v420_v33 = vadd.f32 %v1265_v12, %v355_v15  ;;  %v1330_v15 = vld [vmem:[%s1469_s19 + $0x13a] sm:$0xff] }
  0x34   : > { %v674_v48 = vadd.f32 %v1296_v54, %v610_v42  ;;  %v483_v35 = vadd.f32 %v1296_v54, %v419_v17  ;;  %v784_v37 = vpack.c.bf16 %v755_v20, %v754_v9  ;;  %v532_v4 = vadd.f32 %v1313_v11, %v468_v57  ;;  %v1315_v9 = vld [vmem:[%s1469_s19 + $0x82] sm:$0xff] }
  0x35   : > { %v596_v19 = vadd.f32 %v1250_v24, %v531_v5  ;;  %v277_v40 = vadd.f32 %v1281_v56, %v1249_v43  ;;  %v675_v25 = vadd.f32 %v1297_v21, %v611_v28  ;;  %v484_v55 = vadd.f32 %v1297_v21, %v420_v33  ;;  %v1283_v43 = vld [vmem:[%s1469_s19 + $0x81] sm:$0xff] }
  0x36   : > { %v738_v49 = vadd.f32 %v1328_v27, %v674_v48  ;;  %v547_v29 = vadd.f32 %v1328_v27, %v483_v35  ;;  %1383 = vmatprep.mubr.msk.bf16.mxu0 %vm806_vm1, %v784_v37  ;;  %v597_v47 = vadd.f32 %v1251_v26, %v532_v4  ;;  %v340_v16 = vadd.f32 %v1312_v59, %v276_v41  ;;  %v1314_v56 = vld [vmem:[%s1469_s19 + $0x7a] sm:$0xff]  ;;  %v1331_v33 = vld [vmem:[%s1469_s19 + $0x142] sm:$0xff] }
  0x37   : > { %v660_v63 = vadd.f32 %v1282_v50, %v596_v19  ;;  %v341_v60 = vadd.f32 %v1313_v11, %v277_v40  ;;  %v739_v6 = vadd.f32 %v1329_v58, %v675_v25  ;;  %v548_v61 = vadd.f32 %v1329_v58, %v484_v55  ;;  %v1299_v42 = vld [vmem:[%s1469_s19 + $0x141] sm:$0xff]  ;;  %v1252_v19 = vld [vmem:[%s1469_s19 + $0x90] sm:$0xff]  ;;  %v1253_v40 = vld [vmem:[%s1469_s19 + $0x98] sm:$0xff] }
  0x38   : > { %v770_v18 = vmul.f32 0.11111111, %v738_v49  ;;  %v612_v62 = vadd.f32 %v1266_v10, %v547_v29  ;;  %v661_v0 = vadd.f32 %v1283_v43, %v597_v47  ;;  %v405_v3 = vadd.f32 %v1250_v24, %v340_v16  ;;  %v1285_v16 = vld [vmem:[%s1469_s19 + $0x99] sm:$0xff] }
  0x39   : > { %v724_v1 = vadd.f32 %v1314_v56, %v660_v63  ;;  %v406_v7 = vadd.f32 %v1251_v26, %v341_v60  ;;  %v771_v8 = vmul.f32 0.11111111, %v739_v6  ;;  %v613_v2 = vadd.f32 %v1267_v23, %v548_v61  ;;  %v1284_v63 = vld [vmem:[%s1469_s19 + $0x91] sm:$0xff] }
  0x3a   : > { %v676_v59 = vadd.f32 %v1298_v34, %v612_v62  ;;  %v292_v11 = vadd.f32 %v1296_v54, %v1605_v22  ;;  %v725_v13 = vadd.f32 %v1315_v9, %v661_v0  ;;  %v469_v17 = vadd.f32 %v1282_v50, %v405_v3  ;;  %v1316_v62 = vld [vmem:[%s1469_s19 + $0x92] sm:$0xff]  ;;  %v1317_v0 = vld [vmem:[%s1469_s19 + $0x9a] sm:$0xff] }
  0x3b   : > { %v756_v14 = vmul.f32 0.11111111, %v724_v1  ;;  %v470_v20 = vadd.f32 %v1283_v43, %v406_v7  ;;  %v792_v57 = vpack.c.bf16 %v771_v8, %v770_v18  ;;  %v677_v5 = vadd.f32 %v1299_v42, %v613_v2 }
  0x3c   : > { %v740_v41 = vadd.f32 %v1330_v15, %v676_v59  ;;  %v293_v28 = vadd.f32 %v1297_v21, %v1265_v12  ;;  %v757_v48 = vmul.f32 0.11111111, %v725_v13  ;;  %v533_v35 = vadd.f32 %v1314_v56, %v469_v17 }
  0x3d   : > { %v534_v37 = vadd.f32 %v1315_v9, %v470_v20  ;;  %v356_v4 = vadd.f32 %v1328_v27, %v292_v11  ;;  %1399 = vmatprep.mubr.msk.bf16.mxu1 %vm806_vm1, %v792_v57  ;;  %v741_v22 = vadd.f32 %v1331_v33, %v677_v5  ;;  %v278_v49 = vadd.f32 %v1282_v50, %v1250_v24  ;;  %v1642_v11 = vld [vmem:[%s1469_s19 + $0x158] sm:$0xff] }
  0x3e   : > { %v772_v54 = vmul.f32 0.11111111, %v740_v41  ;;  %v357_v25 = vadd.f32 %v1329_v58, %v293_v28  ;;  %v785_v55 = vpack.c.bf16 %v757_v48, %v756_v14  ;;  %v598_v29 = vadd.f32 %v1252_v19, %v533_v35  ;;  %v1300_v20 = vld [vmem:[%s1469_s19 + $0x151] sm:$0xff]  ;;  %v1301_v41 = vld [vmem:[%s1469_s19 + $0x159] sm:$0xff] }
  0x3f   : > { %v599_v12 = vadd.f32 %v1253_v40, %v534_v37  ;;  %v421_v21 = vadd.f32 %v1266_v10, %v356_v4  ;;  %v773_v47 = vmul.f32 0.11111111, %v741_v22  ;;  %v279_v6 = vadd.f32 %v1283_v43, %v1251_v26  ;;  %v1268_v43 = vld [vmem:[%s1469_s19 + $0x150] sm:$0xff]  ;;  %v1254_v4 = vld [vmem:[%s1469_s19 + $0xa8] sm:$0xff] }
  0x40   : > { %v422_v60 = vadd.f32 %v1267_v23, %v357_v25  ;;  %v342_v27 = vadd.f32 %v1314_v56, %v278_v49  ;;  %1384 = vmatmul.mubr.msk.bf16.gmra.mrb[4].mxu0 %vm806_vm1, %v785_v55  ;;  %v662_v18 = vadd.f32 %v1284_v63, %v598_v29  ;;  %v294_v24 = vadd.f32 %v1298_v34, %v1266_v10  ;;  %v1332_v37 = vld [vmem:[%s1469_s19 + $0x152] sm:$0xff]  ;;  %v1333_v25 = vld [vmem:[%s1469_s19 + $0x15a] sm:$0xff] }
  0x41   : > { %v663_v61 = vadd.f32 %v1285_v16, %v599_v12  ;;  %v485_v58 = vadd.f32 %v1298_v34, %v421_v21  ;;  %v793_v50 = vpack.c.bf16 %v773_v47, %v772_v54  ;;  %v343_v3 = vadd.f32 %v1315_v9, %v279_v6  ;;  %v1255_v12 = vld [vmem:[%s1469_s19 + $0xb0] sm:$0xff] }
  0x42   : > { %v486_v1 = vadd.f32 %v1299_v42, %v422_v60  ;;  %v407_v7 = vadd.f32 %v1252_v19, %v342_v27  ;;  %v726_v8 = vadd.f32 %v1316_v62, %v662_v18  ;;  %v295_v56 = vadd.f32 %v1299_v42, %v1267_v23  ;;  %v1286_v21 = vld [vmem:[%s1469_s19 + $0xa9] sm:$0xff] }
  0x43   : > { %v727_v2 = vadd.f32 %v1317_v0, %v663_v61  ;;  %v549_v26 = vadd.f32 %v1330_v15, %v485_v58  ;;  %1400 = vmatmul.mubr.msk.bf16.gmra.mrb[4].mxu1 %vm806_vm1, %v793_v50  ;;  %v408_v10 = vadd.f32 %v1253_v40, %v343_v3  ;;  %v358_v13 = vadd.f32 %v1330_v15, %v294_v24  ;;  %v1287_v58 = vld [vmem:[%s1469_s19 + $0xb1] sm:$0xff] }
  0x44   : > { %v550_v59 = vadd.f32 %v1331_v33, %v486_v1  ;;  %v471_v34 = vadd.f32 %v1284_v63, %v407_v7  ;;  %v758_v14 = vmul.f32 0.11111111, %v726_v8  ;;  %v359_v57 = vadd.f32 %v1331_v33, %v295_v56  ;;  %v1318_v24 = vld [vmem:[%s1469_s19 + $0xaa] sm:$0xff] }
  0x45   : > { %v759_v9 = vmul.f32 0.11111111, %v727_v2  ;;  %v614_v17 = vadd.f32 %v1268_v43, %v549_v26  ;;  %v472_v23 = vadd.f32 %v1285_v16, %v408_v10  ;;  %v423_v28 = vadd.f32 %v1268_v43, %v358_v13  ;;  %v1270_v1 = vld [vmem:[%s1469_s19 + $0x168] sm:$0xff]  ;;  %v1319_v26 = vld [vmem:[%s1469_s19 + $0xb2] sm:$0xff] }
  0x46   : > { %v615_v5 = vadd.f32 %v1642_v11, %v550_v59  ;;  %v535_v42 = vadd.f32 %v1316_v62, %v471_v34  ;;  %v424_v15 = vadd.f32 %v1642_v11, %v359_v57  ;;  %v280_v22 = vadd.f32 %v1284_v63, %v1252_v19  ;;  %v1302_v59 = vld [vmem:[%s1469_s19 + $0x169] sm:$0xff]  ;;  %v1303_v57 = vld [vmem:[%s1469_s19 + $0x171] sm:$0xff] }
  0x47   : > { %v786_v48 = vpack.c.bf16 %v759_v9, %v758_v14  ;;  %v678_v35 = vadd.f32 %v1300_v20, %v614_v17  ;;  %v536_v49 = vadd.f32 %v1317_v0, %v472_v23  ;;  %v487_v55 = vadd.f32 %v1300_v20, %v423_v28  ;;  %v1334_v23 = vld [vmem:[%s1469_s19 + $0x16a] sm:$0xff] }
  0x48   : > { %v679_v54 = vadd.f32 %v1301_v41, %v615_v5  ;;  %v600_v33 = vadd.f32 %v1254_v4, %v535_v42  ;;  %v488_v47 = vadd.f32 %v1301_v41, %v424_v15  ;;  %v281_v60 = vadd.f32 %v1285_v16, %v1253_v40  ;;  %v1271_v16 = vld [vmem:[%s1469_s19 + $0x170] sm:$0xff] }
  0x49   : > { %1387 = vmatprep.mubr.msk.bf16.mxu0 %vm806_vm1, %v786_v48  ;;  %v742_v29 = vadd.f32 %v1332_v37, %v678_v35  ;;  %v344_v6 = vadd.f32 %v1316_v62, %v280_v22  ;;  %v601_v19 = vadd.f32 %v1255_v12, %v536_v49  ;;  %v551_v18 = vadd.f32 %v1332_v37, %v487_v55  ;;  %v1335_v15 = vld [vmem:[%s1469_s19 + $0x172] sm:$0xff] }
  0x4a   : > { %v743_v27 = vadd.f32 %v1333_v25, %v679_v54  ;;  %v664_v63 = vadd.f32 %v1286_v21, %v600_v33  ;;  %v552_v50 = vadd.f32 %v1333_v25, %v488_v47  ;;  %v345_v3 = vadd.f32 %v1317_v0, %v281_v60 }
  0x4b   : > { %v774_v61 = vmul.f32 0.11111111, %v742_v29  ;;  %v409_v7 = vadd.f32 %v1254_v4, %v344_v6  ;;  %v665_v2 = vadd.f32 %v1287_v58, %v601_v19  ;;  %v616_v62 = vadd.f32 %v1270_v1, %v551_v18 }
  0x4c   : > { %v775_v8 = vmul.f32 0.11111111, %v743_v27  ;;  %v728_v40 = vadd.f32 %v1318_v24, %v664_v63  ;;  %v617_v56 = vadd.f32 %v1271_v16, %v552_v50  ;;  %v410_v10 = vadd.f32 %v1255_v12, %v345_v3  ;;  %v1272_v50 = vld [vmem:[%s1469_s19 + $0x180] sm:$0xff] }
  0x4d   : > { %v473_v34 = vadd.f32 %v1286_v21, %v409_v7  ;;  %v296_v13 = vadd.f32 %v1300_v20, %v1268_v43  ;;  %v729_v9 = vadd.f32 %v1319_v26, %v665_v2  ;;  %v680_v0 = vadd.f32 %v1302_v59, %v616_v62 }
  0x4e   : > { %v794_v14 = vpack.c.bf16 %v775_v8, %v774_v61  ;;  %v760_v17 = vmul.f32 0.11111111, %v728_v40  ;;  %v681_v5 = vadd.f32 %v1303_v57, %v617_v56  ;;  %v474_v42 = vadd.f32 %v1287_v58, %v410_v10  ;;  %v1273_v40 = vld [vmem:[%s1469_s19 + $0x188] sm:$0xff] }
  0x4f   : > { %v537_v28 = vadd.f32 %v1318_v24, %v473_v34  ;;  %v297_v48 = vadd.f32 %v1301_v41, %v1642_v11  ;;  %v761_v35 = vmul.f32 0.11111111, %v729_v9  ;;  %v744_v22 = vadd.f32 %v1334_v23, %v680_v0  ;;  %v1304_v56 = vld [vmem:[%s1469_s19 + $0x181] sm:$0xff] }
  0x50   : > { %1403 = vmatprep.mubr.msk.bf16.mxu1 %vm806_vm1, %v794_v14  ;;  %v360_v54 = vadd.f32 %v1332_v37, %v296_v13  ;;  %v282_v49 = vadd.f32 %v1286_v21, %v1254_v4  ;;  %v745_v33 = vadd.f32 %v1335_v15, %v681_v5  ;;  %v538_v43 = vadd.f32 %v1319_v26, %v474_v42  ;;  %v1336_v9 = vld [vmem:[%s1469_s19 + $0x182] sm:$0xff] }
  0x51   : > { %v602_v20 = vadd.f32 %v537_v28, %v1492_v30  ;;  %v361_v55 = vadd.f32 %v1333_v25, %v297_v48  ;;  %v787_v29 = vpack.c.bf16 %v761_v35, %v760_v17  ;;  %v776_v47 = vmul.f32 0.11111111, %v744_v22 }
  0x52   : > { %v425_v60 = vadd.f32 %v1270_v1, %v360_v54  ;;  %v283_v6 = vadd.f32 %v1287_v58, %v1255_v12  ;;  %v777_v27 = vmul.f32 0.11111111, %v745_v33  ;;  %v603_v11 = vadd.f32 %v538_v43, %v1495_v31 }
  0x53   : > { %v666_v41 = vadd.f32 %v602_v20, %v1498_v32  ;;  %v426_v19 = vadd.f32 %v1271_v16, %v361_v55  ;;  %1388 = vmatmul.mubr.msk.bf16.gmra.mrb[8].mxu0 %vm806_vm1, %v787_v29  ;;  %v346_v4 = vadd.f32 %v1318_v24, %v282_v49  ;;  %v298_v63 = vadd.f32 %v1302_v59, %v1270_v1  ;;  %v1306_v20 = vld [vmem:[%s1469_s19 + $0x199] sm:$0xff]  ;;  %v1307_v29 = vld [vmem:[%s1469_s19 + $0x1a1] sm:$0xff] }
  0x54   : > { %v489_v37 = vadd.f32 %v1302_v59, %v425_v60  ;;  %v347_v21 = vadd.f32 %v1319_v26, %v283_v6  ;;  %v795_v18 = vpack.c.bf16 %v777_v27, %v776_v47  ;;  %v667_v25 = vadd.f32 %v603_v11, %v1501_v36  ;;  %v1338_v6 = vld [vmem:[%s1469_s19 + $0x19a] sm:$0xff] }
  0x55   : > { %v730_v61 = vadd.f32 %v666_v41, %v1506_v38  ;;  %v490_v12 = vadd.f32 %v1303_v57, %v426_v19  ;;  %v411_v3 = vadd.f32 %v346_v4, %v1492_v30  ;;  %v299_v8 = vadd.f32 %v1303_v57, %v1271_v16  ;;  %v1305_v16 = vld [vmem:[%s1469_s19 + $0x189] sm:$0xff] }
  0x56   : > { %v553_v58 = vadd.f32 %v1334_v23, %v489_v37  ;;  %v412_v7 = vadd.f32 %v347_v21, %v1495_v31  ;;  %1404 = vmatmul.mubr.msk.bf16.gmra.mrb[8].mxu1 %vm806_vm1, %v795_v18  ;;  %v731_v24 = vadd.f32 %v667_v25, %v1509_v39  ;;  %v362_v62 = vadd.f32 %v1334_v23, %v298_v63  ;;  %v1339_v41 = vld [vmem:[%s1469_s19 + $0x1a2] sm:$0xff] }
  0x57   : > { %v762_v1 = vmul.f32 0.11111111, %v730_v61  ;;  %v554_v2 = vadd.f32 %v1335_v15, %v490_v12  ;;  %v475_v59 = vadd.f32 %v411_v3, %v1498_v32  ;;  %v363_v10 = vadd.f32 %v1335_v15, %v299_v8  ;;  %v1337_v32 = vld [vmem:[%s1469_s19 + $0x18a] sm:$0xff]  ;;  %v1274_v15 = vld [vmem:[%s1469_s19 + $0x198] sm:$0xff] }
  0x58   : > { %v618_v26 = vadd.f32 %v1272_v50, %v553_v58  ;;  %v476_v30 = vadd.f32 %v412_v7, %v1501_v36  ;;  %v763_v34 = vmul.f32 0.11111111, %v731_v24  ;;  %v427_v13 = vadd.f32 %v1272_v50, %v362_v62 }
  0x59   : > { %v619_v31 = vadd.f32 %v1273_v40, %v554_v2  ;;  %v539_v17 = vadd.f32 %v475_v59, %v1506_v38  ;;  %v428_v0 = vadd.f32 %v1273_v40, %v363_v10 }
  0x5a   : > { %v682_v14 = vadd.f32 %v1304_v56, %v618_v26  ;;  %v540_v57 = vadd.f32 %v476_v30, %v1509_v39  ;;  %v788_v5 = vpack.c.bf16 %v763_v34, %v762_v1  ;;  %v491_v42 = vadd.f32 %v1304_v56, %v427_v13  ;;  %v1275_v39 = vld [vmem:[%s1469_s19 + $0x1a0] sm:$0xff] }
  0x5b   : > { %v683_v23 = vadd.f32 %v1305_v16, %v619_v31  ;;  %v604_v28 = vadd.f32 %v1516_v44, %v539_v17  ;;  %v492_v35 = vadd.f32 %v1305_v16, %v428_v0 }
  0x5c   : > { %v746_v36 = vadd.f32 %v1336_v9, %v682_v14  ;;  %v605_v48 = vadd.f32 %v1519_v45, %v540_v57  ;;  %1391 = vmatprep.mubr.msk.bf16.mxu0 %vm806_vm1, %v788_v5  ;;  %v555_v22 = vadd.f32 %v1336_v9, %v491_v42 }
  0x5d   : > { %v747_v38 = vadd.f32 %v1337_v32, %v683_v23  ;;  %v668_v49 = vadd.f32 %v1522_v46, %v604_v28  ;;  %v556_v43 = vadd.f32 %v1337_v32, %v492_v35 }
  0x5e   : > { %v778_v54 = vmul.f32 0.11111111, %v746_v36  ;;  %v669_v33 = vadd.f32 %v1529_v51, %v605_v48  ;;  %v620_v44 = vadd.f32 %v1274_v15, %v555_v22 }
  0x5f   : > { %v779_v55 = vmul.f32 0.11111111, %v747_v38  ;;  %v732_v45 = vadd.f32 %v1532_v52, %v668_v49  ;;  %v621_v60 = vadd.f32 %v1275_v39, %v556_v43 }
  0x60   : > { %v733_v47 = vadd.f32 %v1535_v53, %v669_v33  ;;  %v684_v11 = vadd.f32 %v1306_v20, %v620_v44  ;;  %v1704_v53 = vld [vmem:[%s1813_s2] ss:$0 sm:$0xff] }
  0x61   : > { %v796_v27 = vpack.c.bf16 %v779_v55, %v778_v54  ;;  %v764_v19 = vmul.f32 0.11111111, %v732_v45  ;;  %v685_v46 = vadd.f32 %v1307_v29, %v621_v60 }
  0x62   : > { %v765_v37 = vmul.f32 0.11111111, %v733_v47  ;;  %v748_v51 = vadd.f32 %v1338_v6, %v684_v11 }
  0x63   : > { %1407 = vmatprep.mubr.msk.bf16.mxu1 %vm806_vm1, %v796_v27  ;;  %v749_v21 = vadd.f32 %v1339_v41, %v685_v46 }
  0x64   : > { %v789_v4 = vpack.c.bf16 %v765_v37, %v764_v19  ;;  %v780_v63 = vmul.f32 0.11111111, %v748_v51 }
  0x65   : > { %v781_v52 = vmul.f32 0.11111111, %v749_v21 }
  0x66   : > { %1392 = vmatmul.mubr.msk.bf16.gmra.mrb[12].mxu0 %vm806_vm1, %v789_v4 }
  0x67   : > { %v797_v18 = vpack.c.bf16 %v781_v52, %v780_v63 }
  0x69   : > { %1408 = vmatmul.mubr.msk.bf16.gmra.mrb[12].mxu1 %vm806_vm1, %v797_v18 }
  0xfd   : > { %v1381_v25 = vpop.f32.mrb[0].mxu0 }
  0xfe   : > { %v902_v61 = vadd.f32 %v1381_v25, %v1704_v53  ;;  %v893_v12 = vpop.f32.mrb[1].mxu0 }
  0xff   : > { %v894_v58 = vadd.f32 %v1704_v53, %v893_v12  ;;  %v1382_v50 = vpop.f32.mrb[2].mxu0 }
 0x100   : > { %v1022_v3 = vmax.f32 %v902_v61, 0.0  ;;  %v905_v7 = vadd.f32 %v1382_v50, %v1704_v53  ;;  %v896_v8 = vpop.f32.mrb[3].mxu0 }
 0x101   : > { %v1020_v24 = vmax.f32 %v894_v58, 0.0  ;;  %v897_v1 = vadd.f32 %v1704_v53, %v896_v8 }
 0x102   : > { %1055 = vst.msk [vmem:[%s1711_s25 + $0x10] sm:$0xff] %vm1052_vm2, %v1022_v3  ;;  %v1023_v2 = vmax.f32 %v905_v7, 0.0 }
 0x103   : > { %v1397_v40 = vpop.f32.mrb[0].mxu1  ;;  %1053 = vst.msk [vmem:[%s1711_s25] sm:$0xff] %vm1052_vm2, %v1020_v24  ;;  %v1021_v62 = vmax.f32 %v897_v1, 0.0 }
 0x104   : > { %v966_v26 = vadd.f32 %v1397_v40, %v1704_v53  ;;  %v957_v56 = vpop.f32.mrb[1].mxu1  ;;  %1056 = vst.msk [vmem:[%s1711_s25 + $0x18] sm:$0xff] %vm1052_vm2, %v1023_v2 }
 0x105   : > { %v958_v59 = vadd.f32 %v1704_v53, %v957_v56  ;;  %v1398_v30 = vpop.f32.mrb[2].mxu1  ;;  %1054 = vst.msk [vmem:[%s1711_s25 + $0x8] sm:$0xff] %vm1052_vm2, %v1021_v62 }
 0x106   : > { %v1038_v10 = vmax.f32 %v966_v26, 0.0  ;;  %v969_v34 = vadd.f32 %v1398_v30, %v1704_v53  ;;  %v960_v31 = vpop.f32.mrb[3].mxu1 }
 0x107   : > { %v1036_v16 = vmax.f32 %v958_v59, 0.0  ;;  %v961_v13 = vadd.f32 %v1704_v53, %v960_v31 }
 0x108   : > { %1071 = vst.msk [vmem:[%s1711_s25 + $0x90] sm:$0xff] %vm1052_vm2, %v1038_v10  ;;  %v1039_v14 = vmax.f32 %v969_v34, 0.0 }
 0x109   : > { %1069 = vst.msk [vmem:[%s1711_s25 + $0x80] sm:$0xff] %vm1052_vm2, %v1036_v16  ;;  %v1037_v9 = vmax.f32 %v961_v13, 0.0 }
 0x10a   : > { %1072 = vst.msk [vmem:[%s1711_s25 + $0x98] sm:$0xff] %vm1052_vm2, %v1039_v14 }
 0x10b   : > { %1070 = vst.msk [vmem:[%s1711_s25 + $0x88] sm:$0xff] %vm1052_vm2, %v1037_v9 }
 0x113   : > { %v1385_v17 = vpop.f32.mrb[4].mxu0 }
 0x114   : > { %v918_v57 = vadd.f32 %v1385_v17, %v1704_v53  ;;  %v909_v0 = vpop.f32.mrb[5].mxu0 }
 0x115   : > { %v910_v5 = vadd.f32 %v1704_v53, %v909_v0  ;;  %v1386_v23 = vpop.f32.mrb[6].mxu0 }
 0x116   : > { %v1026_v32 = vmax.f32 %v918_v57, 0.0  ;;  %v1401_v42 = vpop.f32.mrb[4].mxu1  ;;  %v921_v36 = vadd.f32 %v1386_v23, %v1704_v53  ;;  %v912_v28 = vpop.f32.mrb[7].mxu0 }
 0x117   : > { %v982_v48 = vadd.f32 %v1401_v42, %v1704_v53  ;;  %v1024_v35 = vmax.f32 %v910_v5, 0.0  ;;  %v973_v15 = vpop.f32.mrb[5].mxu1  ;;  %v913_v38 = vadd.f32 %v1704_v53, %v912_v28 }
 0x118   : > { %1059 = vst.msk [vmem:[%s1711_s25 + $0x30] sm:$0xff] %vm1052_vm2, %v1026_v32  ;;  %v974_v22 = vadd.f32 %v1704_v53, %v973_v15  ;;  %v1027_v39 = vmax.f32 %v921_v36, 0.0  ;;  %v1402_v54 = vpop.f32.mrb[6].mxu1 }
 0x119   : > { %v1042_v49 = vmax.f32 %v982_v48, 0.0  ;;  %1057 = vst.msk [vmem:[%s1711_s25 + $0x20] sm:$0xff] %vm1052_vm2, %v1024_v35  ;;  %v985_v33 = vadd.f32 %v1402_v54, %v1704_v53  ;;  %v1025_v43 = vmax.f32 %v913_v38, 0.0  ;;  %v976_v20 = vpop.f32.mrb[7].mxu1 }
 0x11a   : > { %v1040_v55 = vmax.f32 %v974_v22, 0.0  ;;  %1060 = vst.msk [vmem:[%s1711_s25 + $0x38] sm:$0xff] %vm1052_vm2, %v1027_v39  ;;  %v977_v44 = vadd.f32 %v1704_v53, %v976_v20 }
 0x11b   : > { %1075 = vst.msk [vmem:[%s1711_s25 + $0xb0] sm:$0xff] %vm1052_vm2, %v1042_v49  ;;  %v1043_v29 = vmax.f32 %v985_v33, 0.0  ;;  %1058 = vst.msk [vmem:[%s1711_s25 + $0x28] sm:$0xff] %vm1052_vm2, %v1025_v43 }
 0x11c   : > { %1073 = vst.msk [vmem:[%s1711_s25 + $0xa0] sm:$0xff] %vm1052_vm2, %v1040_v55  ;;  %v1041_v45 = vmax.f32 %v977_v44, 0.0 }
 0x11d   : > { %1076 = vst.msk [vmem:[%s1711_s25 + $0xb8] sm:$0xff] %vm1052_vm2, %v1043_v29 }
 0x11e   : > { %1074 = vst.msk [vmem:[%s1711_s25 + $0xa8] sm:$0xff] %vm1052_vm2, %v1041_v45 }
 0x126   : > { %v1389_v47 = vpop.f32.mrb[8].mxu0 }
 0x127   : > { %v934_v60 = vadd.f32 %v1389_v47, %v1704_v53  ;;  %v925_v6 = vpop.f32.mrb[9].mxu0 }
 0x128   : > { %v926_v27 = vadd.f32 %v1704_v53, %v925_v6  ;;  %v1390_v11 = vpop.f32.mrb[10].mxu0 }
 0x129   : > { %v1030_v41 = vmax.f32 %v934_v60, 0.0  ;;  %v1405_v19 = vpop.f32.mrb[8].mxu1  ;;  %v937_v37 = vadd.f32 %v1390_v11, %v1704_v53  ;;  %v928_v46 = vpop.f32.mrb[11].mxu0 }
 0x12a   : > { %v998_v51 = vadd.f32 %v1405_v19, %v1704_v53  ;;  %v1028_v4 = vmax.f32 %v926_v27, 0.0  ;;  %v989_v21 = vpop.f32.mrb[9].mxu1  ;;  %v929_v63 = vadd.f32 %v1704_v53, %v928_v46 }
 0x12b   : > { %1063 = vst.msk [vmem:[%s1711_s25 + $0x50] sm:$0xff] %vm1052_vm2, %v1030_v41  ;;  %v990_v52 = vadd.f32 %v1704_v53, %v989_v21  ;;  %v1031_v18 = vmax.f32 %v937_v37, 0.0  ;;  %v1406_v25 = vpop.f32.mrb[10].mxu1 }
 0x12c   : > { %v1046_v61 = vmax.f32 %v998_v51, 0.0  ;;  %1061 = vst.msk [vmem:[%s1711_s25 + $0x40] sm:$0xff] %vm1052_vm2, %v1028_v4  ;;  %v1001_v12 = vadd.f32 %v1406_v25, %v1704_v53  ;;  %v1029_v58 = vmax.f32 %v929_v63, 0.0  ;;  %v992_v50 = vpop.f32.mrb[11].mxu1 }
 0x12d   : > { %v1044_v3 = vmax.f32 %v990_v52, 0.0  ;;  %1064 = vst.msk [vmem:[%s1711_s25 + $0x58] sm:$0xff] %vm1052_vm2, %v1031_v18  ;;  %v993_v7 = vadd.f32 %v1704_v53, %v992_v50 }
 0x12e   : > { %1079 = vst.msk [vmem:[%s1711_s25 + $0xd0] sm:$0xff] %vm1052_vm2, %v1046_v61  ;;  %v1047_v8 = vmax.f32 %v1001_v12, 0.0  ;;  %1062 = vst.msk [vmem:[%s1711_s25 + $0x48] sm:$0xff] %vm1052_vm2, %v1029_v58 }
 0x12f   : > { %1077 = vst.msk [vmem:[%s1711_s25 + $0xc0] sm:$0xff] %vm1052_vm2, %v1044_v3  ;;  %v1045_v24 = vmax.f32 %v993_v7, 0.0 }
 0x130   : > { %1080 = vst.msk [vmem:[%s1711_s25 + $0xd8] sm:$0xff] %vm1052_vm2, %v1047_v8 }
 0x131   : > { %1078 = vst.msk [vmem:[%s1711_s25 + $0xc8] sm:$0xff] %vm1052_vm2, %v1045_v24 }
 0x139   : > { %v1393_v1 = vpop.f32.mrb[12].mxu0 }
 0x13a   : > { %v950_v2 = vadd.f32 %v1393_v1, %v1704_v53  ;;  %v941_v40 = vpop.f32.mrb[13].mxu0 }
 0x13b   : > { %v942_v62 = vadd.f32 %v1704_v53, %v941_v40  ;;  %v1394_v26 = vpop.f32.mrb[14].mxu0 }
 0x13c   : > { %v1034_v56 = vmax.f32 %v950_v2, 0.0  ;;  %v953_v59 = vadd.f32 %v1394_v26, %v1704_v53  ;;  %v944_v30 = vpop.f32.mrb[15].mxu0  ;;  %v1409_v10 = vpop.f32.mrb[12].mxu1 }
 0x13d   : > { %v1032_v34 = vmax.f32 %v942_v62, 0.0  ;;  %v945_v31 = vadd.f32 %v1704_v53, %v944_v30  ;;  %v1014_v16 = vadd.f32 %v1409_v10, %v1704_v53  ;;  %v1005_v13 = vpop.f32.mrb[13].mxu1 }
 0x13e   : > { %1067 = vst.msk [vmem:[%s1711_s25 + $0x70] sm:$0xff] %vm1052_vm2, %v1034_v56  ;;  %v1035_v14 = vmax.f32 %v953_v59, 0.0  ;;  %v1006_v9 = vadd.f32 %v1704_v53, %v1005_v13  ;;  %v1410_v17 = vpop.f32.mrb[14].mxu1 }
 0x13f   : > { %1065 = vst.msk [vmem:[%s1711_s25 + $0x60] sm:$0xff] %vm1052_vm2, %v1032_v34  ;;  %v1033_v57 = vmax.f32 %v945_v31, 0.0  ;;  %v1050_v0 = vmax.f32 %v1014_v16, 0.0  ;;  %v1017_v5 = vadd.f32 %v1410_v17, %v1704_v53  ;;  %v1008_v23 = vpop.f32.mrb[15].mxu1 }
 0x140   : > { %1068 = vst.msk [vmem:[%s1711_s25 + $0x78] sm:$0xff] %vm1052_vm2, %v1035_v14  ;;  %v1048_v32 = vmax.f32 %v1006_v9, 0.0  ;;  %v1009_v42 = vadd.f32 %v1704_v53, %v1008_v23 }
 0x141   : > { %1066 = vst.msk [vmem:[%s1711_s25 + $0x68] sm:$0xff] %vm1052_vm2, %v1033_v57  ;;  %1083 = vst.msk [vmem:[%s1711_s25 + $0xf0] sm:$0xff] %vm1052_vm2, %v1050_v0  ;;  %v1051_v36 = vmax.f32 %v1017_v5, 0.0 }
 0x142   : > { %1081 = vst.msk [vmem:[%s1711_s25 + $0xe0] sm:$0xff] %vm1052_vm2, %v1048_v32  ;;  %v1049_v28 = vmax.f32 %v1009_v42, 0.0 }
 0x143   : > { %1084 = vst.msk [vmem:[%s1711_s25 + $0xf8] sm:$0xff] %vm1052_vm2, %v1051_v36 }
 0x144   : > { %1082 = vst.msk [vmem:[%s1711_s25 + $0xe8] sm:$0xff] %vm1052_vm2, %v1049_v28 }
 0x145 PF: > { %s13_s12 = sadd.s32 1, %s1430_s12  }
 0x146   : > { %p10_p4 = scmp.ge.s32.totalorder %s13_s12, 4  }
 0x148   :  { %12 = sbr.rel (!%p10_p4) target bundleno = 1 (0x1), region = 64 }

// kernel: module_e_forward.9
= control target key start
LH: loop header
LB: loop body
LE: loop exit
PB: predicated region body
PF: predicated region fallthrough
CT: control target
= control target key end

     0   :  { %s1538_s12 = smov 0   ;;  %s1776_s0 = inlined_call_operand.vmem [shape: f32[2,18,18,6], index: 0, kind: input, shape index: {}]   ;;  %s1777_s1 = inlined_call_operand.vmem [shape: bf16[3,6,8], index: 1, kind: input, shape index: {}]   ;;  %s1778_s2 = inlined_call_operand.vmem [shape: f32[1,8], index: 2, kind: input, shape index: {}]   ;;  %s1779_s3 = inlined_call_operand.vmem [shape: f32[2,256,8], index: 3, kind: output, shape index: {}]  }
   0x1 LB: > { %s1152_s13 = sadd.s32 4294967295, %s1516_s12   ;;  %p1156_p0 = scmp.ge.s32.totalorder %s1516_s12, 1  ;;  %s1516_s12 = sphi %s1538_s12, %s13_s12  }
   0x2   : > { %p137_p1 = scmp.lt.s32.totalorder %s1516_s12, 3 }
   0x4   : > { %p138_p2 = pnand %p1156_p0, %p137_p1 }
   0x5   : > { %v1192_v0 = vld [vmem:[%s1777_s1 + $0x4] sm:$0x7] (!%p138_p2)  ;;  %vm321_vm0 = vcmask (!%p138_p2), 1042432   ;;  %v220_v1 = vld [vmem:[%s1777_s1] sm:$0x7] (!%p138_p2)  ;;  %p161_p3 = scmp.lt.s32.totalorder (!%p138_p2), %s1152_s13, 1 }
   0x6   : > { %141 = sbr.rel (%p138_p2) target bundleno = 332 (0x14c), region = 32  ;;  %1497 = vmatprep.subr.msk.bf16.mxu1 (!%p138_p2), %vm321_vm0, %v1192_v0  ;;  %1498 = vmatprep.subr.msk.bf16.mxu0 (!%p138_p2), %vm321_vm0, %v220_v1  ;;  %v323_v2 = vsel (!%p138_p2), %vm321_vm0, %v1192_v0, 0  ;;  %v535_v3 = vsel (!%p138_p2), %vm321_vm0, %v220_v1, 0  ;;  %v1257_v4 = vld [vmem:[%s1777_s1 + $0x8] sm:$0x7] (!%p138_p2)  ;;  %vm272_vm1 = vcmask (!%p138_p2), 48128  }
   0x7   : > { %1330 = vmatpush3.bf16.msra.mxu1 (!%p138_p2), %v323_v2  ;;  %1364 = vmatpush3.bf16.msra.mxu0 (!%p138_p2), %v535_v3  ;;  %v798_v16 = vsel (!%p138_p2), %vm321_vm0, %v1257_v4, 0  ;;  %vm1064_vm2 = vcmask (!%p138_p2), 64512  }
   0x8   : > { %1499 = vmatprep.subr.msk.bf16.mxu1 (!%p138_p2), %vm321_vm0, %v220_v1  ;;  %1500 = vmatprep.subr.msk.bf16.mxu0 (!%p138_p2), %vm321_vm0, %v1257_v4 }
   0xd   : > { %s1781_s13 = smov (!%p161_p3, %s1152_s13), 1 }
   0xe   : > { %s1501_s20 = smul.u32 432, %s1781_s13  ;;  %s1277_s26 = sshll.u32 %s1781_s13, 8 }
   0xf   : > { %s1672_s29 = scalar_lea.vmem %s1779_s3, %s1277_s26 }
  0x10   : > { %s1567_s23 = scalar_lea.vmem %s1776_s0, %s1501_s20 }
  0x11   : > { %v1160_v5 = vld [vmem:[%s1567_s23 + $0x19] sm:$0xff]  ;;  %v1161_v6 = vld [vmem:[%s1567_s23 + $0x21] sm:$0xff]  ;;  %v173_v9 = vld [vmem:[%s1567_s23 + $0x9] sm:$0xff] }
  0x12   : > { %v172_v7 = vld [vmem:[%s1567_s23 + $0x1] sm:$0xff]  ;;  %v254_v8 = vpack.c.bf16 %v1161_v6, %v1160_v5  ;;  %v1162_v10 = vld [vmem:[%s1567_s23 + $0x31] sm:$0xff]  ;;  %v1163_v11 = vld [vmem:[%s1567_s23 + $0x39] sm:$0xff] }
  0x13   : > { %v204_v12 = vpack.c.bf16 %v173_v9, %v172_v7  ;;  %v255_v13 = vpack.c.bf16 %v1163_v11, %v1162_v10  ;;  %v1164_v14 = vld [vmem:[%s1567_s23 + $0x49] sm:$0xff]  ;;  %v1165_v15 = vld [vmem:[%s1567_s23 + $0x51] sm:$0xff]  ;;  %v1166_v18 = vld [vmem:[%s1567_s23 + $0x61] sm:$0xff] }
  0x14   : > { %1331 = vmatprep.mubr.msk.bf16.mxu1 %vm272_vm1, %v254_v8  ;;  %v256_v17 = vpack.c.bf16 %v1165_v15, %v1164_v14  ;;  %v1167_v19 = vld [vmem:[%s1567_s23 + $0x69] sm:$0xff]  ;;  %v1168_v20 = vld [vmem:[%s1567_s23 + $0x79] sm:$0xff]  ;;  %v1169_v21 = vld [vmem:[%s1567_s23 + $0x81] sm:$0xff] }
  0x15   : > { %1365 = vmatprep.mubr.msk.bf16.mxu0 %vm272_vm1, %v204_v12  ;;  %1332 = vmatmul.mubr.msk.bf16.vlgmr.msra.gmra.mrb[0].mxu1 %vm272_vm1, %v255_v13  ;;  %v257_v22 = vpack.c.bf16 %v1167_v19, %v1166_v18  ;;  %v258_v23 = vpack.c.bf16 %v1169_v21, %v1168_v20  ;;  %v1170_v24 = vld [vmem:[%s1567_s23 + $0x91] sm:$0xff]  ;;  %v1171_v25 = vld [vmem:[%s1567_s23 + $0x99] sm:$0xff]  ;;  %v1172_v26 = vld [vmem:[%s1567_s23 + $0xa9] sm:$0xff] }
  0x16   : > { %1432 = vmatpush3.bf16.msra.mxu1 %v535_v3  ;;  %1366 = vmatmul.mubr.msk.bf16.vlgmr.msra.gmra.mrb[0].mxu0 %vm272_vm1, %v254_v8  ;;  %v1173_v27 = vld [vmem:[%s1567_s23 + $0xb1] sm:$0xff]  ;;  %v259_v28 = vpack.c.bf16 %v1171_v25, %v1170_v24  ;;  %v1174_v30 = vld [vmem:[%s1567_s23 + $0xc1] sm:$0xff]  ;;  %v1175_v31 = vld [vmem:[%s1567_s23 + $0xc9] sm:$0xff] }
  0x17   : > { %1398 = vmatpush3.bf16.msra.mxu0 %v798_v16  ;;  %1335 = vmatprep.mubr.msk.bf16.mxu1 %vm272_vm1, %v256_v17  ;;  %v260_v29 = vpack.c.bf16 %v1173_v27, %v1172_v26  ;;  %v1176_v32 = vld [vmem:[%s1567_s23 + $0xd9] sm:$0xff]  ;;  %v1177_v33 = vld [vmem:[%s1567_s23 + $0xe1] sm:$0xff]  ;;  %v261_v34 = vpack.c.bf16 %v1175_v31, %v1174_v30  ;;  %v1178_v36 = vld [vmem:[%s1567_s23 + $0xf1] sm:$0xff] }
  0x18   : > { %1369 = vmatprep.mubr.msk.bf16.mxu0 %vm272_vm1, %v255_v13  ;;  %v262_v35 = vpack.c.bf16 %v1177_v33, %v1176_v32  ;;  %v1179_v37 = vld [vmem:[%s1567_s23 + $0xf9] sm:$0xff]  ;;  %v1180_v38 = vld [vmem:[%s1567_s23 + $0x109] sm:$0xff]  ;;  %v1181_v39 = vld [vmem:[%s1567_s23 + $0x111] sm:$0xff] }
  0x19   : > { %v263_v40 = vpack.c.bf16 %v1179_v37, %v1178_v36  ;;  %v264_v41 = vpack.c.bf16 %v1181_v39, %v1180_v38  ;;  %v1182_v42 = vld [vmem:[%s1567_s23 + $0x121] sm:$0xff]  ;;  %v1183_v43 = vld [vmem:[%s1567_s23 + $0x129] sm:$0xff]  ;;  %v1184_v44 = vld [vmem:[%s1567_s23 + $0x139] sm:$0xff] }
  0x1a   : > { %v1185_v45 = vld [vmem:[%s1567_s23 + $0x141] sm:$0xff]  ;;  %v265_v46 = vpack.c.bf16 %v1183_v43, %v1182_v42  ;;  %v1186_v48 = vld [vmem:[%s1567_s23 + $0x151] sm:$0xff]  ;;  %v1187_v49 = vld [vmem:[%s1567_s23 + $0x159] sm:$0xff] }
  0x1b   : > { %v266_v47 = vpack.c.bf16 %v1185_v45, %v1184_v44  ;;  %v1188_v50 = vld [vmem:[%s1567_s23 + $0x169] sm:$0xff]  ;;  %v1189_v51 = vld [vmem:[%s1567_s23 + $0x171] sm:$0xff]  ;;  %v267_v52 = vpack.c.bf16 %v1187_v49, %v1186_v48  ;;  %v1190_v54 = vld [vmem:[%s1567_s23 + $0x181] sm:$0xff] }
  0x1c   : > { %v268_v53 = vpack.c.bf16 %v1189_v51, %v1188_v50  ;;  %v1191_v55 = vld [vmem:[%s1567_s23 + $0x189] sm:$0xff]  ;;  %v1255_v57 = vld [vmem:[%s1567_s23 + $0x199] sm:$0xff]  ;;  %v1256_v58 = vld [vmem:[%s1567_s23 + $0x1a1] sm:$0xff] }
  0x1d   : > { %1336 = vmatmul.mubr.msk.bf16.gmra.mrb[4].mxu1 %vm272_vm1, %v257_v22  ;;  %v269_v56 = vpack.c.bf16 %v1191_v55, %v1190_v54  ;;  %v746_v59 = vpack.c.bf16 %v1256_v58, %v1255_v57 }
  0x1e   : > { %1370 = vmatmul.mubr.msk.bf16.gmra.mrb[4].mxu0 %vm272_vm1, %v256_v17  ;;  %1339 = vmatprep.mubr.msk.bf16.mxu1 %vm272_vm1, %v258_v23 }
  0x1f   : > { %1373 = vmatprep.mubr.msk.bf16.mxu0 %vm272_vm1, %v257_v22 }
  0x25   : > { %1340 = vmatmul.mubr.msk.bf16.gmra.mrb[8].mxu1 %vm272_vm1, %v259_v28 }
  0x26   : > { %1374 = vmatmul.mubr.msk.bf16.gmra.mrb[8].mxu0 %vm272_vm1, %v258_v23  ;;  %1343 = vmatprep.mubr.msk.bf16.mxu1 %vm272_vm1, %v260_v29 }
  0x27   : > { %1377 = vmatprep.mubr.msk.bf16.mxu0 %vm272_vm1, %v259_v28 }
  0x2d   : > { %1344 = vmatmul.mubr.msk.bf16.gmra.mrb[12].mxu1 %vm272_vm1, %v261_v34 }
  0x2e   : > { %1378 = vmatmul.mubr.msk.bf16.gmra.mrb[12].mxu0 %vm272_vm1, %v260_v29  ;;  %1347 = vmatprep.mubr.msk.bf16.mxu1 %vm272_vm1, %v262_v35 }
  0x2f   : > { %1399 = vmatprep.mubr.msk.bf16.mxu0 %vm272_vm1, %v255_v13  ;;  %v1665_v13 = vld [vmem:[%s1778_s2] ss:$0 sm:$0xff] }
  0x35   : > { %1348 = vmatmul.mubr.msk.bf16.gmra.mrb[16].mxu1 %vm272_vm1, %v263_v40 }
  0x36   : > { %1400 = vmatmul.mubr.msk.bf16.vlgmr.msra.gmra.mrb[0].mxu0 %vm272_vm1, %v256_v17  ;;  %1351 = vmatprep.mubr.msk.bf16.mxu1 %vm272_vm1, %v264_v41 }
  0x37   : > { %1403 = vmatprep.mubr.msk.bf16.mxu0 %vm272_vm1, %v257_v22 }
  0x3d   : > { %1352 = vmatmul.mubr.msk.bf16.gmra.mrb[20].mxu1 %vm272_vm1, %v265_v46 }
  0x3e   : > { %1404 = vmatmul.mubr.msk.bf16.gmra.mrb[4].mxu0 %vm272_vm1, %v258_v23  ;;  %1355 = vmatprep.mubr.msk.bf16.mxu1 %vm272_vm1, %v266_v47 }
  0x3f   : > { %1407 = vmatprep.mubr.msk.bf16.mxu0 %vm272_vm1, %v259_v28 }
  0x45   : > { %1356 = vmatmul.mubr.msk.bf16.gmra.mrb[24].mxu1 %vm272_vm1, %v267_v52 }
  0x46   : > { %1408 = vmatmul.mubr.msk.bf16.gmra.mrb[8].mxu0 %vm272_vm1, %v260_v29  ;;  %1359 = vmatprep.mubr.msk.bf16.mxu1 %vm272_vm1, %v268_v53 }
  0x47   : > { %1411 = vmatprep.mubr.msk.bf16.mxu0 %vm272_vm1, %v261_v34 }
  0x4d   : > { %1360 = vmatmul.mubr.msk.bf16.gmra.mrb[28].mxu1 %vm272_vm1, %v269_v56 }
  0x4e   : > { %1412 = vmatmul.mubr.msk.bf16.gmra.mrb[12].mxu0 %vm272_vm1, %v262_v35  ;;  %1381 = vmatprep.mubr.msk.bf16.mxu1 %vm272_vm1, %v261_v34 }
  0x4f   : > { %1415 = vmatprep.mubr.msk.bf16.mxu0 %vm272_vm1, %v263_v40 }
  0x55   : > { %1382 = vmatmul.mubr.msk.bf16.vlgmr.msra.gmra.mrb[16].mxu1 %vm272_vm1, %v262_v35 }
  0x56   : > { %1416 = vmatmul.mubr.msk.bf16.gmra.mrb[16].mxu0 %vm272_vm1, %v264_v41  ;;  %1385 = vmatprep.mubr.msk.bf16.mxu1 %vm272_vm1, %v263_v40 }
  0x57   : > { %1419 = vmatprep.mubr.msk.bf16.mxu0 %vm272_vm1, %v265_v46 }
  0x5d   : > { %1386 = vmatmul.mubr.msk.bf16.gmra.mrb[20].mxu1 %vm272_vm1, %v264_v41 }
  0x5e   : > { %1420 = vmatmul.mubr.msk.bf16.gmra.mrb[20].mxu0 %vm272_vm1, %v266_v47  ;;  %1389 = vmatprep.mubr.msk.bf16.mxu1 %vm272_vm1, %v265_v46 }
  0x5f   : > { %1423 = vmatprep.mubr.msk.bf16.mxu0 %vm272_vm1, %v267_v52 }
  0x65   : > { %1390 = vmatmul.mubr.msk.bf16.gmra.mrb[24].mxu1 %vm272_vm1, %v266_v47 }
  0x66   : > { %1424 = vmatmul.mubr.msk.bf16.gmra.mrb[24].mxu0 %vm272_vm1, %v268_v53  ;;  %1393 = vmatprep.mubr.msk.bf16.mxu1 %vm272_vm1, %v267_v52 }
  0x67   : > { %1427 = vmatprep.mubr.msk.bf16.mxu0 %vm272_vm1, %v269_v56 }
  0x6d   : > { %1394 = vmatmul.mubr.msk.bf16.gmra.mrb[28].mxu1 %vm272_vm1, %v268_v53 }
  0x6e   : > { %1428 = vmatmul.mubr.msk.bf16.gmra.mrb[28].mxu0 %vm272_vm1, %v746_v59 }
  0xe8   : > { %v1333_v60 = vpop.f32.mrb[0].mxu1 }
  0xe9   : > { %v359_v61 = vpop.f32.mrb[1].mxu1 }
  0xea   : > { %v1334_v62 = vpop.f32.mrb[2].mxu1 }
  0xeb   : > { %v362_v63 = vpop.f32.mrb[3].mxu1 }
  0xf0   : > { %v1337_v0 = vpop.f32.mrb[4].mxu1 }
  0xf1   : > { %v375_v1 = vpop.f32.mrb[5].mxu1 }
  0xf2   : > { %v1338_v2 = vpop.f32.mrb[6].mxu1 }
  0xf3   : > { %v378_v3 = vpop.f32.mrb[7].mxu1 }
  0xf8   : > { %v1341_v4 = vpop.f32.mrb[8].mxu1 }
  0xf9   : > { %v391_v5 = vpop.f32.mrb[9].mxu1 }
  0xfa   : > { %v1342_v6 = vpop.f32.mrb[10].mxu1 }
  0xfb   : > { %v394_v7 = vpop.f32.mrb[11].mxu1 }
 0x100   : > { %v1654_v8 = vpop.f32.mrb[12].mxu1 }
 0x101   : > { %v1656_v9 = vpop.f32.mrb[13].mxu1 }
 0x102   : > { %v1658_v10 = vpop.f32.mrb[14].mxu1 }
 0x103   : > { %v1660_v11 = vpop.f32.mrb[15].mxu1 }
 0x109   : > { %v1401_v12 = vpop.f32.mrb[0].mxu0 }
 0x10a   : > { %v1433_v14 = vadd.f32 %v1401_v12, %v1333_v60  ;;  %v834_v15 = vpop.f32.mrb[1].mxu0 }
 0x10b   : > { %v1434_v16 = vadd.f32 %v834_v15, %v359_v61  ;;  %v1402_v17 = vpop.f32.mrb[2].mxu0 }
 0x10c   : > { %v1002_v18 = vadd.f32 %v1433_v14, %v1665_v13  ;;  %v1435_v19 = vadd.f32 %v1402_v17, %v1334_v62  ;;  %v837_v20 = vpop.f32.mrb[3].mxu0 }
 0x10d   : > { %v1000_v21 = vadd.f32 %v1434_v16, %v1665_v13  ;;  %v1436_v22 = vadd.f32 %v837_v20, %v362_v63 }
 0x10e   : > { %v1034_v23 = vmax.f32 %v1002_v18, 0.0  ;;  %v1003_v24 = vadd.f32 %v1435_v19, %v1665_v13 }
 0x10f   : > { %v1032_v25 = vmax.f32 %v1000_v21, 0.0  ;;  %v1001_v26 = vadd.f32 %v1436_v22, %v1665_v13 }
 0x110   : > { %1067 = vst.msk [vmem:[%s1672_s29 + $0x10] sm:$0xff] %vm1064_vm2, %v1034_v23  ;;  %v1035_v27 = vmax.f32 %v1003_v24, 0.0 }
 0x111   : > { %1065 = vst.msk [vmem:[%s1672_s29] sm:$0xff] %vm1064_vm2, %v1032_v25  ;;  %v1033_v28 = vmax.f32 %v1001_v26, 0.0  ;;  %v1405_v29 = vpop.f32.mrb[4].mxu0 }
 0x112   : > { %1068 = vst.msk [vmem:[%s1672_s29 + $0x18] sm:$0xff] %vm1064_vm2, %v1035_v27  ;;  %v1437_v30 = vadd.f32 %v1405_v29, %v1337_v0  ;;  %v850_v31 = vpop.f32.mrb[5].mxu0 }
 0x113   : > { %1066 = vst.msk [vmem:[%s1672_s29 + $0x8] sm:$0xff] %vm1064_vm2, %v1033_v28  ;;  %v1438_v32 = vadd.f32 %v850_v31, %v375_v1  ;;  %v1406_v33 = vpop.f32.mrb[6].mxu0 }
 0x114   : > { %v1006_v34 = vadd.f32 %v1437_v30, %v1665_v13  ;;  %v1439_v35 = vadd.f32 %v1406_v33, %v1338_v2  ;;  %v853_v36 = vpop.f32.mrb[7].mxu0 }
 0x115   : > { %v1004_v37 = vadd.f32 %v1438_v32, %v1665_v13  ;;  %v1440_v38 = vadd.f32 %v853_v36, %v378_v3 }
 0x116   : > { %v1038_v39 = vmax.f32 %v1006_v34, 0.0  ;;  %v1007_v40 = vadd.f32 %v1439_v35, %v1665_v13 }
 0x117   : > { %v1036_v41 = vmax.f32 %v1004_v37, 0.0  ;;  %v1005_v42 = vadd.f32 %v1440_v38, %v1665_v13 }
 0x118   : > { %1071 = vst.msk [vmem:[%s1672_s29 + $0x30] sm:$0xff] %vm1064_vm2, %v1038_v39  ;;  %v1039_v43 = vmax.f32 %v1007_v40, 0.0 }
 0x119   : > { %1069 = vst.msk [vmem:[%s1672_s29 + $0x20] sm:$0xff] %vm1064_vm2, %v1036_v41  ;;  %v1037_v44 = vmax.f32 %v1005_v42, 0.0  ;;  %v1409_v45 = vpop.f32.mrb[8].mxu0 }
 0x11a   : > { %1072 = vst.msk [vmem:[%s1672_s29 + $0x38] sm:$0xff] %vm1064_vm2, %v1039_v43  ;;  %v1441_v46 = vadd.f32 %v1409_v45, %v1341_v4  ;;  %v866_v47 = vpop.f32.mrb[9].mxu0 }
 0x11b   : > { %1070 = vst.msk [vmem:[%s1672_s29 + $0x28] sm:$0xff] %vm1064_vm2, %v1037_v44  ;;  %v1442_v48 = vadd.f32 %v866_v47, %v391_v5  ;;  %v1410_v49 = vpop.f32.mrb[10].mxu0 }
 0x11c   : > { %v1010_v50 = vadd.f32 %v1441_v46, %v1665_v13  ;;  %v1443_v51 = vadd.f32 %v1410_v49, %v1342_v6  ;;  %v869_v52 = vpop.f32.mrb[11].mxu0 }
 0x11d   : > { %v1008_v53 = vadd.f32 %v1442_v48, %v1665_v13  ;;  %v1444_v54 = vadd.f32 %v869_v52, %v394_v7 }
 0x11e   : > { %v1042_v55 = vmax.f32 %v1010_v50, 0.0  ;;  %v1011_v56 = vadd.f32 %v1443_v51, %v1665_v13 }
 0x11f   : > { %v1040_v57 = vmax.f32 %v1008_v53, 0.0  ;;  %v1009_v58 = vadd.f32 %v1444_v54, %v1665_v13 }
 0x120   : > { %1075 = vst.msk [vmem:[%s1672_s29 + $0x50] sm:$0xff] %vm1064_vm2, %v1042_v55  ;;  %v1043_v59 = vmax.f32 %v1011_v56, 0.0 }
 0x121   : > { %1073 = vst.msk [vmem:[%s1672_s29 + $0x40] sm:$0xff] %vm1064_vm2, %v1040_v57  ;;  %v1041_v60 = vmax.f32 %v1009_v58, 0.0  ;;  %v1413_v61 = vpop.f32.mrb[12].mxu0 }
 0x122   : > { %1076 = vst.msk [vmem:[%s1672_s29 + $0x58] sm:$0xff] %vm1064_vm2, %v1043_v59  ;;  %v1445_v62 = vadd.f32 %v1413_v61, %v1654_v8  ;;  %v882_v63 = vpop.f32.mrb[13].mxu0 }
 0x123   : > { %1074 = vst.msk [vmem:[%s1672_s29 + $0x48] sm:$0xff] %vm1064_vm2, %v1041_v60  ;;  %v1446_v0 = vadd.f32 %v882_v63, %v1656_v9  ;;  %v1414_v1 = vpop.f32.mrb[14].mxu0 }
 0x124   : > { %v1014_v2 = vadd.f32 %v1445_v62, %v1665_v13  ;;  %v1447_v3 = vadd.f32 %v1414_v1, %v1658_v10  ;;  %v885_v4 = vpop.f32.mrb[15].mxu0 }
 0x125   : > { %v1012_v5 = vadd.f32 %v1446_v0, %v1665_v13  ;;  %v1448_v6 = vadd.f32 %v885_v4, %v1660_v11 }
 0x126   : > { %v1046_v7 = vmax.f32 %v1014_v2, 0.0  ;;  %v1015_v8 = vadd.f32 %v1447_v3, %v1665_v13 }
 0x127   : > { %v1044_v12 = vmax.f32 %v1012_v5, 0.0  ;;  %v1013_v14 = vadd.f32 %v1448_v6, %v1665_v13 }
 0x128   : > { %1079 = vst.msk [vmem:[%s1672_s29 + $0x70] sm:$0xff] %vm1064_vm2, %v1046_v7  ;;  %v1047_v9 = vmax.f32 %v1015_v8, 0.0  ;;  %v1383_v15 = vpop.f32.mrb[16].mxu1 }
 0x129   : > { %1077 = vst.msk [vmem:[%s1672_s29 + $0x60] sm:$0xff] %vm1064_vm2, %v1044_v12  ;;  %v1045_v16 = vmax.f32 %v1013_v14, 0.0  ;;  %v1417_v10 = vpop.f32.mrb[16].mxu0  ;;  %v635_v17 = vpop.f32.mrb[17].mxu1 }
 0x12a   : > { %1080 = vst.msk [vmem:[%s1672_s29 + $0x78] sm:$0xff] %vm1064_vm2, %v1047_v9  ;;  %v1449_v18 = vadd.f32 %v1417_v10, %v1383_v15  ;;  %v898_v11 = vpop.f32.mrb[17].mxu0  ;;  %v1384_v19 = vpop.f32.mrb[18].mxu1 }
 0x12b   : > { %1078 = vst.msk [vmem:[%s1672_s29 + $0x68] sm:$0xff] %vm1064_vm2, %v1045_v16  ;;  %v1450_v20 = vadd.f32 %v898_v11, %v635_v17  ;;  %v1418_v21 = vpop.f32.mrb[18].mxu0  ;;  %v638_v22 = vpop.f32.mrb[19].mxu1 }
 0x12c   : > { %v1018_v23 = vadd.f32 %v1449_v18, %v1665_v13  ;;  %v1451_v24 = vadd.f32 %v1418_v21, %v1384_v19  ;;  %v901_v25 = vpop.f32.mrb[19].mxu0 }
 0x12d   : > { %v1016_v26 = vadd.f32 %v1450_v20, %v1665_v13  ;;  %v1452_v27 = vadd.f32 %v901_v25, %v638_v22 }
 0x12e   : > { %v1050_v28 = vmax.f32 %v1018_v23, 0.0  ;;  %v1019_v29 = vadd.f32 %v1451_v24, %v1665_v13 }
 0x12f   : > { %v1048_v30 = vmax.f32 %v1016_v26, 0.0  ;;  %v1017_v31 = vadd.f32 %v1452_v27, %v1665_v13 }
 0x130   : > { %1083 = vst.msk [vmem:[%s1672_s29 + $0x90] sm:$0xff] %vm1064_vm2, %v1050_v28  ;;  %v1051_v32 = vmax.f32 %v1019_v29, 0.0  ;;  %v1387_v33 = vpop.f32.mrb[20].mxu1 }
 0x131   : > { %1081 = vst.msk [vmem:[%s1672_s29 + $0x80] sm:$0xff] %vm1064_vm2, %v1048_v30  ;;  %v1049_v34 = vmax.f32 %v1017_v31, 0.0  ;;  %v1421_v35 = vpop.f32.mrb[20].mxu0  ;;  %v651_v36 = vpop.f32.mrb[21].mxu1 }
 0x132   : > { %1084 = vst.msk [vmem:[%s1672_s29 + $0x98] sm:$0xff] %vm1064_vm2, %v1051_v32  ;;  %v1453_v37 = vadd.f32 %v1421_v35, %v1387_v33  ;;  %v914_v38 = vpop.f32.mrb[21].mxu0  ;;  %v1388_v39 = vpop.f32.mrb[22].mxu1 }
 0x133   : > { %1082 = vst.msk [vmem:[%s1672_s29 + $0x88] sm:$0xff] %vm1064_vm2, %v1049_v34  ;;  %v1454_v40 = vadd.f32 %v914_v38, %v651_v36  ;;  %v1422_v41 = vpop.f32.mrb[22].mxu0  ;;  %v654_v42 = vpop.f32.mrb[23].mxu1 }
 0x134   : > { %v1022_v43 = vadd.f32 %v1453_v37, %v1665_v13  ;;  %v1455_v44 = vadd.f32 %v1422_v41, %v1388_v39  ;;  %v917_v45 = vpop.f32.mrb[23].mxu0 }
 0x135   : > { %v1020_v46 = vadd.f32 %v1454_v40, %v1665_v13  ;;  %v1456_v47 = vadd.f32 %v917_v45, %v654_v42 }
 0x136   : > { %v1054_v48 = vmax.f32 %v1022_v43, 0.0  ;;  %v1023_v49 = vadd.f32 %v1455_v44, %v1665_v13 }
 0x137   : > { %v1052_v50 = vmax.f32 %v1020_v46, 0.0  ;;  %v1021_v51 = vadd.f32 %v1456_v47, %v1665_v13 }
 0x138   : > { %1087 = vst.msk [vmem:[%s1672_s29 + $0xb0] sm:$0xff] %vm1064_vm2, %v1054_v48  ;;  %v1055_v52 = vmax.f32 %v1023_v49, 0.0  ;;  %v1391_v53 = vpop.f32.mrb[24].mxu1 }
 0x139   : > { %1085 = vst.msk [vmem:[%s1672_s29 + $0xa0] sm:$0xff] %vm1064_vm2, %v1052_v50  ;;  %v1053_v54 = vmax.f32 %v1021_v51, 0.0  ;;  %v1425_v55 = vpop.f32.mrb[24].mxu0  ;;  %v667_v56 = vpop.f32.mrb[25].mxu1 }
 0x13a   : > { %1088 = vst.msk [vmem:[%s1672_s29 + $0xb8] sm:$0xff] %vm1064_vm2, %v1055_v52  ;;  %v1457_v57 = vadd.f32 %v1425_v55, %v1391_v53  ;;  %v930_v58 = vpop.f32.mrb[25].mxu0  ;;  %v1392_v59 = vpop.f32.mrb[26].mxu1 }
 0x13b   : > { %1086 = vst.msk [vmem:[%s1672_s29 + $0xa8] sm:$0xff] %vm1064_vm2, %v1053_v54  ;;  %v1458_v60 = vadd.f32 %v930_v58, %v667_v56  ;;  %v1426_v61 = vpop.f32.mrb[26].mxu0  ;;  %v670_v62 = vpop.f32.mrb[27].mxu1 }
 0x13c   : > { %v1026_v63 = vadd.f32 %v1457_v57, %v1665_v13  ;;  %v1459_v0 = vadd.f32 %v1426_v61, %v1392_v59  ;;  %v933_v1 = vpop.f32.mrb[27].mxu0 }
 0x13d   : > { %v1024_v2 = vadd.f32 %v1458_v60, %v1665_v13  ;;  %v1460_v3 = vadd.f32 %v933_v1, %v670_v62 }
 0x13e   : > { %v1058_v4 = vmax.f32 %v1026_v63, 0.0  ;;  %v1027_v5 = vadd.f32 %v1459_v0, %v1665_v13 }
 0x13f   : > { %v1056_v6 = vmax.f32 %v1024_v2, 0.0  ;;  %v1025_v7 = vadd.f32 %v1460_v3, %v1665_v13 }
 0x140   : > { %1091 = vst.msk [vmem:[%s1672_s29 + $0xd0] sm:$0xff] %vm1064_vm2, %v1058_v4  ;;  %v1059_v8 = vmax.f32 %v1027_v5, 0.0  ;;  %v1395_v12 = vpop.f32.mrb[28].mxu1 }
 0x141   : > { %1089 = vst.msk [vmem:[%s1672_s29 + $0xc0] sm:$0xff] %vm1064_vm2, %v1056_v6  ;;  %v1057_v14 = vmax.f32 %v1025_v7, 0.0  ;;  %v1429_v9 = vpop.f32.mrb[28].mxu0  ;;  %v683_v15 = vpop.f32.mrb[29].mxu1 }
 0x142   : > { %1092 = vst.msk [vmem:[%s1672_s29 + $0xd8] sm:$0xff] %vm1064_vm2, %v1059_v8  ;;  %v1461_v16 = vadd.f32 %v1429_v9, %v1395_v12  ;;  %v946_v10 = vpop.f32.mrb[29].mxu0  ;;  %v1396_v17 = vpop.f32.mrb[30].mxu1 }
 0x143   : > { %1090 = vst.msk [vmem:[%s1672_s29 + $0xc8] sm:$0xff] %vm1064_vm2, %v1057_v14  ;;  %v1462_v18 = vadd.f32 %v946_v10, %v683_v15  ;;  %v1430_v11 = vpop.f32.mrb[30].mxu0  ;;  %v686_v19 = vpop.f32.mrb[31].mxu1 }
 0x144   : > { %v1030_v20 = vadd.f32 %v1461_v16, %v1665_v13  ;;  %v1463_v21 = vadd.f32 %v1430_v11, %v1396_v17  ;;  %v949_v22 = vpop.f32.mrb[31].mxu0 }
 0x145   : > { %v1028_v23 = vadd.f32 %v1462_v18, %v1665_v13  ;;  %v1464_v24 = vadd.f32 %v949_v22, %v686_v19 }
 0x146   : > { %v1062_v25 = vmax.f32 %v1030_v20, 0.0  ;;  %v1031_v26 = vadd.f32 %v1463_v21, %v1665_v13 }
 0x147   : > { %v1060_v27 = vmax.f32 %v1028_v23, 0.0  ;;  %v1029_v28 = vadd.f32 %v1464_v24, %v1665_v13 }
 0x148   : > { %1095 = vst.msk [vmem:[%s1672_s29 + $0xf0] sm:$0xff] %vm1064_vm2, %v1062_v25  ;;  %v1063_v29 = vmax.f32 %v1031_v26, 0.0 }
 0x149   : > { %1093 = vst.msk [vmem:[%s1672_s29 + $0xe0] sm:$0xff] %vm1064_vm2, %v1060_v27  ;;  %v1061_v30 = vmax.f32 %v1029_v28, 0.0 }
 0x14a   : > { %1096 = vst.msk [vmem:[%s1672_s29 + $0xf8] sm:$0xff] %vm1064_vm2, %v1063_v29 }
 0x14b   : > { %1094 = vst.msk [vmem:[%s1672_s29 + $0xe8] sm:$0xff] %vm1064_vm2, %v1061_v30 }
 0x14c PF: > { %s13_s12 = sadd.s32 1, %s1516_s12  }
 0x14d   : > { %p10_p4 = scmp.ge.s32.totalorder %s13_s12, 4  }
 0x14f   :  { %12 = sbr.rel (!%p10_p4) target bundleno = 1 (0x1), region = 66 }

// kernel: module_e_forward.12
= control target key start
LH: loop header
LB: loop body
LE: loop exit
PB: predicated region body
PF: predicated region fallthrough
CT: control target
= control target key end

     0   :  { %s1537_s12 = smov 0   ;;  %s1775_s0 = inlined_call_operand.vmem [shape: f32[2,18,18,8], index: 0, kind: input, shape index: {}]   ;;  %s1776_s1 = inlined_call_operand.vmem [shape: bf16[3,8,8], index: 1, kind: input, shape index: {}]   ;;  %s1777_s2 = inlined_call_operand.vmem [shape: f32[1,8], index: 2, kind: input, shape index: {}]   ;;  %s1778_s3 = inlined_call_operand.vmem [shape: f32[2,256,8], index: 3, kind: output, shape index: {}]  }
   0x1 LB: > { %s1151_s13 = sadd.s32 4294967295, %s1515_s12   ;;  %p1155_p0 = scmp.ge.s32.totalorder %s1515_s12, 1  ;;  %s1515_s12 = sphi %s1537_s12, %s13_s12  }
   0x2   : > { %p137_p1 = scmp.lt.s32.totalorder %s1515_s12, 3 }
   0x4   : > { %p138_p2 = pnand %p1155_p0, %p137_p1 }
   0x5   : > { %v1191_v0 = vld [vmem:[%s1776_s1 + $0x4] sm:$0xf] (!%p138_p2)  ;;  %vm321_vm0 = vcmask (!%p138_p2), 1043456   ;;  %v220_v1 = vld [vmem:[%s1776_s1] sm:$0xf] (!%p138_p2)  ;;  %p161_p3 = scmp.lt.s32.totalorder (!%p138_p2), %s1151_s13, 1 }
   0x6   : > { %141 = sbr.rel (%p138_p2) target bundleno = 332 (0x14c), region = 32  ;;  %1496 = vmatprep.subr.msk.bf16.mxu1 (!%p138_p2), %vm321_vm0, %v1191_v0  ;;  %1497 = vmatprep.subr.msk.bf16.mxu0 (!%p138_p2), %vm321_vm0, %v220_v1  ;;  %v323_v2 = vsel (!%p138_p2), %vm321_vm0, %v1191_v0, 0  ;;  %v535_v3 = vsel (!%p138_p2), %vm321_vm0, %v220_v1, 0  ;;  %v1256_v4 = vld [vmem:[%s1776_s1 + $0x8] sm:$0xf] (!%p138_p2)  ;;  %vm272_vm1 = vcmask (!%p138_p2), 64512  }
   0x7   : > { %1329 = vmatpush3.bf16.msra.mxu1 (!%p138_p2), %v323_v2  ;;  %1363 = vmatpush3.bf16.msra.mxu0 (!%p138_p2), %v535_v3  ;;  %v798_v16 = vsel (!%p138_p2), %vm321_vm0, %v1256_v4, 0 }
   0x8   : > { %1498 = vmatprep.subr.msk.bf16.mxu1 (!%p138_p2), %vm321_vm0, %v220_v1  ;;  %1499 = vmatprep.subr.msk.bf16.mxu0 (!%p138_p2), %vm321_vm0, %v1256_v4 }
   0xd   : > { %s1780_s13 = smov (!%p161_p3, %s1151_s13), 1 }
   0xe   : > { %s1500_s20 = smul.u32 432, %s1780_s13  ;;  %s1276_s26 = sshll.u32 %s1780_s13, 8 }
   0xf   : > { %s1671_s29 = scalar_lea.vmem %s1778_s3, %s1276_s26 }
  0x10   : > { %s1566_s23 = scalar_lea.vmem %s1775_s0, %s1500_s20 }
  0x11   : > { %v1159_v5 = vld [vmem:[%s1566_s23 + $0x19] sm:$0xff]  ;;  %v1160_v6 = vld [vmem:[%s1566_s23 + $0x21] sm:$0xff]  ;;  %v173_v9 = vld [vmem:[%s1566_s23 + $0x9] sm:$0xff] }
  0x12   : > { %v172_v7 = vld [vmem:[%s1566_s23 + $0x1] sm:$0xff]  ;;  %v254_v8 = vpack.c.bf16 %v1160_v6, %v1159_v5  ;;  %v1161_v10 = vld [vmem:[%s1566_s23 + $0x31] sm:$0xff]  ;;  %v1162_v11 = vld [vmem:[%s1566_s23 + $0x39] sm:$0xff] }
  0x13   : > { %v204_v12 = vpack.c.bf16 %v173_v9, %v172_v7  ;;  %v255_v13 = vpack.c.bf16 %v1162_v11, %v1161_v10  ;;  %v1163_v14 = vld [vmem:[%s1566_s23 + $0x49] sm:$0xff]  ;;  %v1164_v15 = vld [vmem:[%s1566_s23 + $0x51] sm:$0xff]  ;;  %v1165_v18 = vld [vmem:[%s1566_s23 + $0x61] sm:$0xff] }
  0x14   : > { %1330 = vmatprep.mubr.msk.bf16.mxu1 %vm272_vm1, %v254_v8  ;;  %v256_v17 = vpack.c.bf16 %v1164_v15, %v1163_v14  ;;  %v1166_v19 = vld [vmem:[%s1566_s23 + $0x69] sm:$0xff]  ;;  %v1167_v20 = vld [vmem:[%s1566_s23 + $0x79] sm:$0xff]  ;;  %v1168_v21 = vld [vmem:[%s1566_s23 + $0x81] sm:$0xff] }
  0x15   : > { %1364 = vmatprep.mubr.msk.bf16.mxu0 %vm272_vm1, %v204_v12  ;;  %1331 = vmatmul.mubr.msk.bf16.vlgmr.msra.gmra.mrb[0].mxu1 %vm272_vm1, %v255_v13  ;;  %v257_v22 = vpack.c.bf16 %v1166_v19, %v1165_v18  ;;  %v258_v23 = vpack.c.bf16 %v1168_v21, %v1167_v20  ;;  %v1169_v24 = vld [vmem:[%s1566_s23 + $0x91] sm:$0xff]  ;;  %v1170_v25 = vld [vmem:[%s1566_s23 + $0x99] sm:$0xff]  ;;  %v1171_v26 = vld [vmem:[%s1566_s23 + $0xa9] sm:$0xff] }
  0x16   : > { %1431 = vmatpush3.bf16.msra.mxu1 %v535_v3  ;;  %1365 = vmatmul.mubr.msk.bf16.vlgmr.msra.gmra.mrb[0].mxu0 %vm272_vm1, %v254_v8  ;;  %v1172_v27 = vld [vmem:[%s1566_s23 + $0xb1] sm:$0xff]  ;;  %v259_v28 = vpack.c.bf16 %v1170_v25, %v1169_v24  ;;  %v1173_v30 = vld [vmem:[%s1566_s23 + $0xc1] sm:$0xff]  ;;  %v1174_v31 = vld [vmem:[%s1566_s23 + $0xc9] sm:$0xff] }
  0x17   : > { %1397 = vmatpush3.bf16.msra.mxu0 %v798_v16  ;;  %1334 = vmatprep.mubr.msk.bf16.mxu1 %vm272_vm1, %v256_v17  ;;  %v260_v29 = vpack.c.bf16 %v1172_v27, %v1171_v26  ;;  %v1175_v32 = vld [vmem:[%s1566_s23 + $0xd9] sm:$0xff]  ;;  %v1176_v33 = vld [vmem:[%s1566_s23 + $0xe1] sm:$0xff]  ;;  %v261_v34 = vpack.c.bf16 %v1174_v31, %v1173_v30  ;;  %v1177_v36 = vld [vmem:[%s1566_s23 + $0xf1] sm:$0xff] }
  0x18   : > { %1368 = vmatprep.mubr.msk.bf16.mxu0 %vm272_vm1, %v255_v13  ;;  %v262_v35 = vpack.c.bf16 %v1176_v33, %v1175_v32  ;;  %v1178_v37 = vld [vmem:[%s1566_s23 + $0xf9] sm:$0xff]  ;;  %v1179_v38 = vld [vmem:[%s1566_s23 + $0x109] sm:$0xff]  ;;  %v1180_v39 = vld [vmem:[%s1566_s23 + $0x111] sm:$0xff] }
  0x19   : > { %v263_v40 = vpack.c.bf16 %v1178_v37, %v1177_v36  ;;  %v264_v41 = vpack.c.bf16 %v1180_v39, %v1179_v38  ;;  %v1181_v42 = vld [vmem:[%s1566_s23 + $0x121] sm:$0xff]  ;;  %v1182_v43 = vld [vmem:[%s1566_s23 + $0x129] sm:$0xff]  ;;  %v1183_v44 = vld [vmem:[%s1566_s23 + $0x139] sm:$0xff] }
  0x1a   : > { %v1184_v45 = vld [vmem:[%s1566_s23 + $0x141] sm:$0xff]  ;;  %v265_v46 = vpack.c.bf16 %v1182_v43, %v1181_v42  ;;  %v1185_v48 = vld [vmem:[%s1566_s23 + $0x151] sm:$0xff]  ;;  %v1186_v49 = vld [vmem:[%s1566_s23 + $0x159] sm:$0xff] }
  0x1b   : > { %v266_v47 = vpack.c.bf16 %v1184_v45, %v1183_v44  ;;  %v1187_v50 = vld [vmem:[%s1566_s23 + $0x169] sm:$0xff]  ;;  %v1188_v51 = vld [vmem:[%s1566_s23 + $0x171] sm:$0xff]  ;;  %v267_v52 = vpack.c.bf16 %v1186_v49, %v1185_v48  ;;  %v1189_v54 = vld [vmem:[%s1566_s23 + $0x181] sm:$0xff] }
  0x1c   : > { %v268_v53 = vpack.c.bf16 %v1188_v51, %v1187_v50  ;;  %v1190_v55 = vld [vmem:[%s1566_s23 + $0x189] sm:$0xff]  ;;  %v1254_v57 = vld [vmem:[%s1566_s23 + $0x199] sm:$0xff]  ;;  %v1255_v58 = vld [vmem:[%s1566_s23 + $0x1a1] sm:$0xff] }
  0x1d   : > { %1335 = vmatmul.mubr.msk.bf16.gmra.mrb[4].mxu1 %vm272_vm1, %v257_v22  ;;  %v269_v56 = vpack.c.bf16 %v1190_v55, %v1189_v54  ;;  %v746_v59 = vpack.c.bf16 %v1255_v58, %v1254_v57 }
  0x1e   : > { %1369 = vmatmul.mubr.msk.bf16.gmra.mrb[4].mxu0 %vm272_vm1, %v256_v17  ;;  %1338 = vmatprep.mubr.msk.bf16.mxu1 %vm272_vm1, %v258_v23 }
  0x1f   : > { %1372 = vmatprep.mubr.msk.bf16.mxu0 %vm272_vm1, %v257_v22 }
  0x25   : > { %1339 = vmatmul.mubr.msk.bf16.gmra.mrb[8].mxu1 %vm272_vm1, %v259_v28 }
  0x26   : > { %1373 = vmatmul.mubr.msk.bf16.gmra.mrb[8].mxu0 %vm272_vm1, %v258_v23  ;;  %1342 = vmatprep.mubr.msk.bf16.mxu1 %vm272_vm1, %v260_v29 }
  0x27   : > { %1376 = vmatprep.mubr.msk.bf16.mxu0 %vm272_vm1, %v259_v28 }
  0x2d   : > { %1343 = vmatmul.mubr.msk.bf16.gmra.mrb[12].mxu1 %vm272_vm1, %v261_v34 }
  0x2e   : > { %1377 = vmatmul.mubr.msk.bf16.gmra.mrb[12].mxu0 %vm272_vm1, %v260_v29  ;;  %1346 = vmatprep.mubr.msk.bf16.mxu1 %vm272_vm1, %v262_v35 }
  0x2f   : > { %1398 = vmatprep.mubr.msk.bf16.mxu0 %vm272_vm1, %v255_v13  ;;  %v1664_v13 = vld [vmem:[%s1777_s2] ss:$0 sm:$0xff] }
  0x35   : > { %1347 = vmatmul.mubr.msk.bf16.gmra.mrb[16].mxu1 %vm272_vm1, %v263_v40 }
  0x36   : > { %1399 = vmatmul.mubr.msk.bf16.vlgmr.msra.gmra.mrb[0].mxu0 %vm272_vm1, %v256_v17  ;;  %1350 = vmatprep.mubr.msk.bf16.mxu1 %vm272_vm1, %v264_v41 }
  0x37   : > { %1402 = vmatprep.mubr.msk.bf16.mxu0 %vm272_vm1, %v257_v22 }
  0x3d   : > { %1351 = vmatmul.mubr.msk.bf16.gmra.mrb[20].mxu1 %vm272_vm1, %v265_v46 }
  0x3e   : > { %1403 = vmatmul.mubr.msk.bf16.gmra.mrb[4].mxu0 %vm272_vm1, %v258_v23  ;;  %1354 = vmatprep.mubr.msk.bf16.mxu1 %vm272_vm1, %v266_v47 }
  0x3f   : > { %1406 = vmatprep.mubr.msk.bf16.mxu0 %vm272_vm1, %v259_v28 }
  0x45   : > { %1355 = vmatmul.mubr.msk.bf16.gmra.mrb[24].mxu1 %vm272_vm1, %v267_v52 }
  0x46   : > { %1407 = vmatmul.mubr.msk.bf16.gmra.mrb[8].mxu0 %vm272_vm1, %v260_v29  ;;  %1358 = vmatprep.mubr.msk.bf16.mxu1 %vm272_vm1, %v268_v53 }
  0x47   : > { %1410 = vmatprep.mubr.msk.bf16.mxu0 %vm272_vm1, %v261_v34 }
  0x4d   : > { %1359 = vmatmul.mubr.msk.bf16.gmra.mrb[28].mxu1 %vm272_vm1, %v269_v56 }
  0x4e   : > { %1411 = vmatmul.mubr.msk.bf16.gmra.mrb[12].mxu0 %vm272_vm1, %v262_v35  ;;  %1380 = vmatprep.mubr.msk.bf16.mxu1 %vm272_vm1, %v261_v34 }
  0x4f   : > { %1414 = vmatprep.mubr.msk.bf16.mxu0 %vm272_vm1, %v263_v40 }
  0x55   : > { %1381 = vmatmul.mubr.msk.bf16.vlgmr.msra.gmra.mrb[16].mxu1 %vm272_vm1, %v262_v35 }
  0x56   : > { %1415 = vmatmul.mubr.msk.bf16.gmra.mrb[16].mxu0 %vm272_vm1, %v264_v41  ;;  %1384 = vmatprep.mubr.msk.bf16.mxu1 %vm272_vm1, %v263_v40 }
  0x57   : > { %1418 = vmatprep.mubr.msk.bf16.mxu0 %vm272_vm1, %v265_v46 }
  0x5d   : > { %1385 = vmatmul.mubr.msk.bf16.gmra.mrb[20].mxu1 %vm272_vm1, %v264_v41 }
  0x5e   : > { %1419 = vmatmul.mubr.msk.bf16.gmra.mrb[20].mxu0 %vm272_vm1, %v266_v47  ;;  %1388 = vmatprep.mubr.msk.bf16.mxu1 %vm272_vm1, %v265_v46 }
  0x5f   : > { %1422 = vmatprep.mubr.msk.bf16.mxu0 %vm272_vm1, %v267_v52 }
  0x65   : > { %1389 = vmatmul.mubr.msk.bf16.gmra.mrb[24].mxu1 %vm272_vm1, %v266_v47 }
  0x66   : > { %1423 = vmatmul.mubr.msk.bf16.gmra.mrb[24].mxu0 %vm272_vm1, %v268_v53  ;;  %1392 = vmatprep.mubr.msk.bf16.mxu1 %vm272_vm1, %v267_v52 }
  0x67   : > { %1426 = vmatprep.mubr.msk.bf16.mxu0 %vm272_vm1, %v269_v56 }
  0x6d   : > { %1393 = vmatmul.mubr.msk.bf16.gmra.mrb[28].mxu1 %vm272_vm1, %v268_v53 }
  0x6e   : > { %1427 = vmatmul.mubr.msk.bf16.gmra.mrb[28].mxu0 %vm272_vm1, %v746_v59 }
  0xe8   : > { %v1332_v60 = vpop.f32.mrb[0].mxu1 }
  0xe9   : > { %v359_v61 = vpop.f32.mrb[1].mxu1 }
  0xea   : > { %v1333_v62 = vpop.f32.mrb[2].mxu1 }
  0xeb   : > { %v362_v63 = vpop.f32.mrb[3].mxu1 }
  0xf0   : > { %v1336_v0 = vpop.f32.mrb[4].mxu1 }
  0xf1   : > { %v375_v1 = vpop.f32.mrb[5].mxu1 }
  0xf2   : > { %v1337_v2 = vpop.f32.mrb[6].mxu1 }
  0xf3   : > { %v378_v3 = vpop.f32.mrb[7].mxu1 }
  0xf8   : > { %v1340_v4 = vpop.f32.mrb[8].mxu1 }
  0xf9   : > { %v391_v5 = vpop.f32.mrb[9].mxu1 }
  0xfa   : > { %v1341_v6 = vpop.f32.mrb[10].mxu1 }
  0xfb   : > { %v394_v7 = vpop.f32.mrb[11].mxu1 }
 0x100   : > { %v1653_v8 = vpop.f32.mrb[12].mxu1 }
 0x101   : > { %v1655_v9 = vpop.f32.mrb[13].mxu1 }
 0x102   : > { %v1657_v10 = vpop.f32.mrb[14].mxu1 }
 0x103   : > { %v1659_v11 = vpop.f32.mrb[15].mxu1 }
 0x109   : > { %v1400_v12 = vpop.f32.mrb[0].mxu0 }
 0x10a   : > { %v1432_v14 = vadd.f32 %v1400_v12, %v1332_v60  ;;  %v834_v15 = vpop.f32.mrb[1].mxu0 }
 0x10b   : > { %v1433_v16 = vadd.f32 %v834_v15, %v359_v61  ;;  %v1401_v17 = vpop.f32.mrb[2].mxu0 }
 0x10c   : > { %v1002_v18 = vadd.f32 %v1432_v14, %v1664_v13  ;;  %v1434_v19 = vadd.f32 %v1401_v17, %v1333_v62  ;;  %v837_v20 = vpop.f32.mrb[3].mxu0 }
 0x10d   : > { %v1000_v21 = vadd.f32 %v1433_v16, %v1664_v13  ;;  %v1435_v22 = vadd.f32 %v837_v20, %v362_v63 }
 0x10e   : > { %v1034_v23 = vmax.f32 %v1002_v18, 0.0  ;;  %v1003_v24 = vadd.f32 %v1434_v19, %v1664_v13 }
 0x10f   : > { %v1032_v25 = vmax.f32 %v1000_v21, 0.0  ;;  %v1001_v26 = vadd.f32 %v1435_v22, %v1664_v13 }
 0x110   : > { %1066 = vst.msk [vmem:[%s1671_s29 + $0x10] sm:$0xff] %vm272_vm1, %v1034_v23  ;;  %v1035_v27 = vmax.f32 %v1003_v24, 0.0 }
 0x111   : > { %1064 = vst.msk [vmem:[%s1671_s29] sm:$0xff] %vm272_vm1, %v1032_v25  ;;  %v1033_v28 = vmax.f32 %v1001_v26, 0.0  ;;  %v1404_v29 = vpop.f32.mrb[4].mxu0 }
 0x112   : > { %1067 = vst.msk [vmem:[%s1671_s29 + $0x18] sm:$0xff] %vm272_vm1, %v1035_v27  ;;  %v1436_v30 = vadd.f32 %v1404_v29, %v1336_v0  ;;  %v850_v31 = vpop.f32.mrb[5].mxu0 }
 0x113   : > { %1065 = vst.msk [vmem:[%s1671_s29 + $0x8] sm:$0xff] %vm272_vm1, %v1033_v28  ;;  %v1437_v32 = vadd.f32 %v850_v31, %v375_v1  ;;  %v1405_v33 = vpop.f32.mrb[6].mxu0 }
 0x114   : > { %v1006_v34 = vadd.f32 %v1436_v30, %v1664_v13  ;;  %v1438_v35 = vadd.f32 %v1405_v33, %v1337_v2  ;;  %v853_v36 = vpop.f32.mrb[7].mxu0 }
 0x115   : > { %v1004_v37 = vadd.f32 %v1437_v32, %v1664_v13  ;;  %v1439_v38 = vadd.f32 %v853_v36, %v378_v3 }
 0x116   : > { %v1038_v39 = vmax.f32 %v1006_v34, 0.0  ;;  %v1007_v40 = vadd.f32 %v1438_v35, %v1664_v13 }
 0x117   : > { %v1036_v41 = vmax.f32 %v1004_v37, 0.0  ;;  %v1005_v42 = vadd.f32 %v1439_v38, %v1664_v13 }
 0x118   : > { %1070 = vst.msk [vmem:[%s1671_s29 + $0x30] sm:$0xff] %vm272_vm1, %v1038_v39  ;;  %v1039_v43 = vmax.f32 %v1007_v40, 0.0 }
 0x119   : > { %1068 = vst.msk [vmem:[%s1671_s29 + $0x20] sm:$0xff] %vm272_vm1, %v1036_v41  ;;  %v1037_v44 = vmax.f32 %v1005_v42, 0.0  ;;  %v1408_v45 = vpop.f32.mrb[8].mxu0 }
 0x11a   : > { %1071 = vst.msk [vmem:[%s1671_s29 + $0x38] sm:$0xff] %vm272_vm1, %v1039_v43  ;;  %v1440_v46 = vadd.f32 %v1408_v45, %v1340_v4  ;;  %v866_v47 = vpop.f32.mrb[9].mxu0 }
 0x11b   : > { %1069 = vst.msk [vmem:[%s1671_s29 + $0x28] sm:$0xff] %vm272_vm1, %v1037_v44  ;;  %v1441_v48 = vadd.f32 %v866_v47, %v391_v5  ;;  %v1409_v49 = vpop.f32.mrb[10].mxu0 }
 0x11c   : > { %v1010_v50 = vadd.f32 %v1440_v46, %v1664_v13  ;;  %v1442_v51 = vadd.f32 %v1409_v49, %v1341_v6  ;;  %v869_v52 = vpop.f32.mrb[11].mxu0 }
 0x11d   : > { %v1008_v53 = vadd.f32 %v1441_v48, %v1664_v13  ;;  %v1443_v54 = vadd.f32 %v869_v52, %v394_v7 }
 0x11e   : > { %v1042_v55 = vmax.f32 %v1010_v50, 0.0  ;;  %v1011_v56 = vadd.f32 %v1442_v51, %v1664_v13 }
 0x11f   : > { %v1040_v57 = vmax.f32 %v1008_v53, 0.0  ;;  %v1009_v58 = vadd.f32 %v1443_v54, %v1664_v13 }
 0x120   : > { %1074 = vst.msk [vmem:[%s1671_s29 + $0x50] sm:$0xff] %vm272_vm1, %v1042_v55  ;;  %v1043_v59 = vmax.f32 %v1011_v56, 0.0 }
 0x121   : > { %1072 = vst.msk [vmem:[%s1671_s29 + $0x40] sm:$0xff] %vm272_vm1, %v1040_v57  ;;  %v1041_v60 = vmax.f32 %v1009_v58, 0.0  ;;  %v1412_v61 = vpop.f32.mrb[12].mxu0 }
 0x122   : > { %1075 = vst.msk [vmem:[%s1671_s29 + $0x58] sm:$0xff] %vm272_vm1, %v1043_v59  ;;  %v1444_v62 = vadd.f32 %v1412_v61, %v1653_v8  ;;  %v882_v63 = vpop.f32.mrb[13].mxu0 }
 0x123   : > { %1073 = vst.msk [vmem:[%s1671_s29 + $0x48] sm:$0xff] %vm272_vm1, %v1041_v60  ;;  %v1445_v0 = vadd.f32 %v882_v63, %v1655_v9  ;;  %v1413_v1 = vpop.f32.mrb[14].mxu0 }
 0x124   : > { %v1014_v2 = vadd.f32 %v1444_v62, %v1664_v13  ;;  %v1446_v3 = vadd.f32 %v1413_v1, %v1657_v10  ;;  %v885_v4 = vpop.f32.mrb[15].mxu0 }
 0x125   : > { %v1012_v5 = vadd.f32 %v1445_v0, %v1664_v13  ;;  %v1447_v6 = vadd.f32 %v885_v4, %v1659_v11 }
 0x126   : > { %v1046_v7 = vmax.f32 %v1014_v2, 0.0  ;;  %v1015_v8 = vadd.f32 %v1446_v3, %v1664_v13 }
 0x127   : > { %v1044_v12 = vmax.f32 %v1012_v5, 0.0  ;;  %v1013_v14 = vadd.f32 %v1447_v6, %v1664_v13 }
 0x128   : > { %1078 = vst.msk [vmem:[%s1671_s29 + $0x70] sm:$0xff] %vm272_vm1, %v1046_v7  ;;  %v1047_v9 = vmax.f32 %v1015_v8, 0.0  ;;  %v1382_v15 = vpop.f32.mrb[16].mxu1 }
 0x129   : > { %1076 = vst.msk [vmem:[%s1671_s29 + $0x60] sm:$0xff] %vm272_vm1, %v1044_v12  ;;  %v1045_v16 = vmax.f32 %v1013_v14, 0.0  ;;  %v1416_v10 = vpop.f32.mrb[16].mxu0  ;;  %v635_v17 = vpop.f32.mrb[17].mxu1 }
 0x12a   : > { %1079 = vst.msk [vmem:[%s1671_s29 + $0x78] sm:$0xff] %vm272_vm1, %v1047_v9  ;;  %v1448_v18 = vadd.f32 %v1416_v10, %v1382_v15  ;;  %v898_v11 = vpop.f32.mrb[17].mxu0  ;;  %v1383_v19 = vpop.f32.mrb[18].mxu1 }
 0x12b   : > { %1077 = vst.msk [vmem:[%s1671_s29 + $0x68] sm:$0xff] %vm272_vm1, %v1045_v16  ;;  %v1449_v20 = vadd.f32 %v898_v11, %v635_v17  ;;  %v1417_v21 = vpop.f32.mrb[18].mxu0  ;;  %v638_v22 = vpop.f32.mrb[19].mxu1 }
 0x12c   : > { %v1018_v23 = vadd.f32 %v1448_v18, %v1664_v13  ;;  %v1450_v24 = vadd.f32 %v1417_v21, %v1383_v19  ;;  %v901_v25 = vpop.f32.mrb[19].mxu0 }
 0x12d   : > { %v1016_v26 = vadd.f32 %v1449_v20, %v1664_v13  ;;  %v1451_v27 = vadd.f32 %v901_v25, %v638_v22 }
 0x12e   : > { %v1050_v28 = vmax.f32 %v1018_v23, 0.0  ;;  %v1019_v29 = vadd.f32 %v1450_v24, %v1664_v13 }
 0x12f   : > { %v1048_v30 = vmax.f32 %v1016_v26, 0.0  ;;  %v1017_v31 = vadd.f32 %v1451_v27, %v1664_v13 }
 0x130   : > { %1082 = vst.msk [vmem:[%s1671_s29 + $0x90] sm:$0xff] %vm272_vm1, %v1050_v28  ;;  %v1051_v32 = vmax.f32 %v1019_v29, 0.0  ;;  %v1386_v33 = vpop.f32.mrb[20].mxu1 }
 0x131   : > { %1080 = vst.msk [vmem:[%s1671_s29 + $0x80] sm:$0xff] %vm272_vm1, %v1048_v30  ;;  %v1049_v34 = vmax.f32 %v1017_v31, 0.0  ;;  %v1420_v35 = vpop.f32.mrb[20].mxu0  ;;  %v651_v36 = vpop.f32.mrb[21].mxu1 }
 0x132   : > { %1083 = vst.msk [vmem:[%s1671_s29 + $0x98] sm:$0xff] %vm272_vm1, %v1051_v32  ;;  %v1452_v37 = vadd.f32 %v1420_v35, %v1386_v33  ;;  %v914_v38 = vpop.f32.mrb[21].mxu0  ;;  %v1387_v39 = vpop.f32.mrb[22].mxu1 }
 0x133   : > { %1081 = vst.msk [vmem:[%s1671_s29 + $0x88] sm:$0xff] %vm272_vm1, %v1049_v34  ;;  %v1453_v40 = vadd.f32 %v914_v38, %v651_v36  ;;  %v1421_v41 = vpop.f32.mrb[22].mxu0  ;;  %v654_v42 = vpop.f32.mrb[23].mxu1 }
 0x134   : > { %v1022_v43 = vadd.f32 %v1452_v37, %v1664_v13  ;;  %v1454_v44 = vadd.f32 %v1421_v41, %v1387_v39  ;;  %v917_v45 = vpop.f32.mrb[23].mxu0 }
 0x135   : > { %v1020_v46 = vadd.f32 %v1453_v40, %v1664_v13  ;;  %v1455_v47 = vadd.f32 %v917_v45, %v654_v42 }
 0x136   : > { %v1054_v48 = vmax.f32 %v1022_v43, 0.0  ;;  %v1023_v49 = vadd.f32 %v1454_v44, %v1664_v13 }
 0x137   : > { %v1052_v50 = vmax.f32 %v1020_v46, 0.0  ;;  %v1021_v51 = vadd.f32 %v1455_v47, %v1664_v13 }
 0x138   : > { %1086 = vst.msk [vmem:[%s1671_s29 + $0xb0] sm:$0xff] %vm272_vm1, %v1054_v48  ;;  %v1055_v52 = vmax.f32 %v1023_v49, 0.0  ;;  %v1390_v53 = vpop.f32.mrb[24].mxu1 }
 0x139   : > { %1084 = vst.msk [vmem:[%s1671_s29 + $0xa0] sm:$0xff] %vm272_vm1, %v1052_v50  ;;  %v1053_v54 = vmax.f32 %v1021_v51, 0.0  ;;  %v1424_v55 = vpop.f32.mrb[24].mxu0  ;;  %v667_v56 = vpop.f32.mrb[25].mxu1 }
 0x13a   : > { %1087 = vst.msk [vmem:[%s1671_s29 + $0xb8] sm:$0xff] %vm272_vm1, %v1055_v52  ;;  %v1456_v57 = vadd.f32 %v1424_v55, %v1390_v53  ;;  %v930_v58 = vpop.f32.mrb[25].mxu0  ;;  %v1391_v59 = vpop.f32.mrb[26].mxu1 }
 0x13b   : > { %1085 = vst.msk [vmem:[%s1671_s29 + $0xa8] sm:$0xff] %vm272_vm1, %v1053_v54  ;;  %v1457_v60 = vadd.f32 %v930_v58, %v667_v56  ;;  %v1425_v61 = vpop.f32.mrb[26].mxu0  ;;  %v670_v62 = vpop.f32.mrb[27].mxu1 }
 0x13c   : > { %v1026_v63 = vadd.f32 %v1456_v57, %v1664_v13  ;;  %v1458_v0 = vadd.f32 %v1425_v61, %v1391_v59  ;;  %v933_v1 = vpop.f32.mrb[27].mxu0 }
 0x13d   : > { %v1024_v2 = vadd.f32 %v1457_v60, %v1664_v13  ;;  %v1459_v3 = vadd.f32 %v933_v1, %v670_v62 }
 0x13e   : > { %v1058_v4 = vmax.f32 %v1026_v63, 0.0  ;;  %v1027_v5 = vadd.f32 %v1458_v0, %v1664_v13 }
 0x13f   : > { %v1056_v6 = vmax.f32 %v1024_v2, 0.0  ;;  %v1025_v7 = vadd.f32 %v1459_v3, %v1664_v13 }
 0x140   : > { %1090 = vst.msk [vmem:[%s1671_s29 + $0xd0] sm:$0xff] %vm272_vm1, %v1058_v4  ;;  %v1059_v8 = vmax.f32 %v1027_v5, 0.0  ;;  %v1394_v12 = vpop.f32.mrb[28].mxu1 }
 0x141   : > { %1088 = vst.msk [vmem:[%s1671_s29 + $0xc0] sm:$0xff] %vm272_vm1, %v1056_v6  ;;  %v1057_v14 = vmax.f32 %v1025_v7, 0.0  ;;  %v1428_v9 = vpop.f32.mrb[28].mxu0  ;;  %v683_v15 = vpop.f32.mrb[29].mxu1 }
 0x142   : > { %1091 = vst.msk [vmem:[%s1671_s29 + $0xd8] sm:$0xff] %vm272_vm1, %v1059_v8  ;;  %v1460_v16 = vadd.f32 %v1428_v9, %v1394_v12  ;;  %v946_v10 = vpop.f32.mrb[29].mxu0  ;;  %v1395_v17 = vpop.f32.mrb[30].mxu1 }
 0x143   : > { %1089 = vst.msk [vmem:[%s1671_s29 + $0xc8] sm:$0xff] %vm272_vm1, %v1057_v14  ;;  %v1461_v18 = vadd.f32 %v946_v10, %v683_v15  ;;  %v1429_v11 = vpop.f32.mrb[30].mxu0  ;;  %v686_v19 = vpop.f32.mrb[31].mxu1 }
 0x144   : > { %v1030_v20 = vadd.f32 %v1460_v16, %v1664_v13  ;;  %v1462_v21 = vadd.f32 %v1429_v11, %v1395_v17  ;;  %v949_v22 = vpop.f32.mrb[31].mxu0 }
 0x145   : > { %v1028_v23 = vadd.f32 %v1461_v18, %v1664_v13  ;;  %v1463_v24 = vadd.f32 %v949_v22, %v686_v19 }
 0x146   : > { %v1062_v25 = vmax.f32 %v1030_v20, 0.0  ;;  %v1031_v26 = vadd.f32 %v1462_v21, %v1664_v13 }
 0x147   : > { %v1060_v27 = vmax.f32 %v1028_v23, 0.0  ;;  %v1029_v28 = vadd.f32 %v1463_v24, %v1664_v13 }
 0x148   : > { %1094 = vst.msk [vmem:[%s1671_s29 + $0xf0] sm:$0xff] %vm272_vm1, %v1062_v25  ;;  %v1063_v29 = vmax.f32 %v1031_v26, 0.0 }
 0x149   : > { %1092 = vst.msk [vmem:[%s1671_s29 + $0xe0] sm:$0xff] %vm272_vm1, %v1060_v27  ;;  %v1061_v30 = vmax.f32 %v1029_v28, 0.0 }
 0x14a   : > { %1095 = vst.msk [vmem:[%s1671_s29 + $0xf8] sm:$0xff] %vm272_vm1, %v1063_v29 }
 0x14b   : > { %1093 = vst.msk [vmem:[%s1671_s29 + $0xe8] sm:$0xff] %vm272_vm1, %v1061_v30 }
 0x14c PF: > { %s13_s12 = sadd.s32 1, %s1515_s12  }
 0x14d   : > { %p10_p4 = scmp.ge.s32.totalorder %s13_s12, 4  }
 0x14f   :  { %12 = sbr.rel (!%p10_p4) target bundleno = 1 (0x1), region = 66 }

// kernel: module_e_forward.8
= control target key start
LH: loop header
LB: loop body
LE: loop exit
PB: predicated region body
PF: predicated region fallthrough
CT: control target
= control target key end

     0   :  { %s1569_s12 = smov 0   ;;  %s1867_s0 = inlined_call_operand.vmem [shape: f32[2,18,18,6], index: 0, kind: input, shape index: {}]   ;;  %s1868_s1 = inlined_call_operand.vmem [shape: bf16[3,6,8], index: 1, kind: input, shape index: {}]   ;;  %s1869_s2 = inlined_call_operand.vmem [shape: f32[1,8], index: 2, kind: input, shape index: {}]   ;;  %s1870_s3 = inlined_call_operand.vmem [shape: f32[2,256,8], index: 3, kind: output, shape index: {}]  }
   0x1 LB: > { %s1151_s13 = sadd.s32 4294967295, %s1547_s12   ;;  %p1155_p0 = scmp.ge.s32.totalorder %s1547_s12, 1  ;;  %s1547_s12 = sphi %s1569_s12, %s13_s12  }
   0x2   : > { %p137_p1 = scmp.lt.s32.totalorder %s1547_s12, 3 }
   0x4   : > { %p138_p2 = pnand %p1155_p0, %p137_p1 }
   0x5   : > { %v1223_v0 = vld [vmem:[%s1868_s1 + $0x4] sm:$0x7] (!%p138_p2)  ;;  %vm321_vm0 = vcmask (!%p138_p2), 1042432   ;;  %v221_v1 = vld [vmem:[%s1868_s1] sm:$0x7] (!%p138_p2)  ;;  %p161_p3 = scmp.lt.s32.totalorder (!%p138_p2), %s1151_s13, 1 }
   0x6   : > { %141 = sbr.rel (%p138_p2) target bundleno = 333 (0x14d), region = 32  ;;  %1528 = vmatprep.subr.msk.bf16.mxu1 (!%p138_p2), %vm321_vm0, %v1223_v0  ;;  %1529 = vmatprep.subr.msk.bf16.mxu0 (!%p138_p2), %vm321_vm0, %v221_v1  ;;  %v323_v2 = vsel (!%p138_p2), %vm321_vm0, %v1223_v0, 0  ;;  %v535_v3 = vsel (!%p138_p2), %vm321_vm0, %v221_v1, 0  ;;  %v1288_v4 = vld [vmem:[%s1868_s1 + $0x8] sm:$0x7] (!%p138_p2)  ;;  %vm272_vm1 = vcmask (!%p138_p2), 48128  }
   0x7   : > { %1361 = vmatpush3.bf16.msra.mxu1 (!%p138_p2), %v323_v2  ;;  %1395 = vmatpush3.bf16.msra.mxu0 (!%p138_p2), %v535_v3  ;;  %v797_v18 = vsel (!%p138_p2), %vm321_vm0, %v1288_v4, 0  ;;  %vm1063_vm2 = vcmask (!%p138_p2), 64512  }
   0x8   : > { %1530 = vmatprep.subr.msk.bf16.mxu1 (!%p138_p2), %vm321_vm0, %v221_v1  ;;  %1531 = vmatprep.subr.msk.bf16.mxu0 (!%p138_p2), %vm321_vm0, %v1288_v4 }
   0xd   : > { %s1872_s13 = smov (!%p161_p3, %s1151_s13), 1 }
   0xe   : > { %s1532_s20 = smul.u32 432, %s1872_s13  ;;  %s1308_s26 = sshll.u32 %s1872_s13, 8 }
   0xf   : > { %s1763_s29 = scalar_lea.vmem %s1870_s3, %s1308_s26 }
  0x10   : > { %s1598_s23 = scalar_lea.vmem %s1867_s0, %s1532_s20 }
  0x11   : > { %v1191_v5 = vld [vmem:[%s1598_s23 + $0x19] sm:$0xff]  ;;  %v1192_v6 = vld [vmem:[%s1598_s23 + $0x21] sm:$0xff]  ;;  %v1193_v10 = vld [vmem:[%s1598_s23 + $0x31] sm:$0xff] }
  0x12   : > { %v1159_v7 = vld [vmem:[%s1598_s23 + $0x18] sm:$0xff]  ;;  %v254_v8 = vpack.c.bf16 %v1192_v6, %v1191_v5  ;;  %v1160_v9 = vld [vmem:[%s1598_s23 + $0x20] sm:$0xff]  ;;  %v1161_v14 = vld [vmem:[%s1598_s23 + $0x30] sm:$0xff] }
  0x13   : > { %v1194_v11 = vld [vmem:[%s1598_s23 + $0x39] sm:$0xff]  ;;  %v205_v12 = vpack.c.bf16 %v1160_v9, %v1159_v7  ;;  %v1195_v16 = vld [vmem:[%s1598_s23 + $0x49] sm:$0xff]  ;;  %v1196_v19 = vld [vmem:[%s1598_s23 + $0x51] sm:$0xff] }
  0x14   : > { %v255_v13 = vpack.c.bf16 %v1194_v11, %v1193_v10  ;;  %v1162_v15 = vld [vmem:[%s1598_s23 + $0x38] sm:$0xff]  ;;  %1362 = vmatprep.mubr.msk.bf16.mxu1 %vm272_vm1, %v254_v8  ;;  %v1163_v20 = vld [vmem:[%s1598_s23 + $0x48] sm:$0xff]  ;;  %v1164_v21 = vld [vmem:[%s1598_s23 + $0x50] sm:$0xff]  ;;  %v256_v22 = vpack.c.bf16 %v1196_v19, %v1195_v16 }
  0x15   : > { %v206_v17 = vpack.c.bf16 %v1162_v15, %v1161_v14  ;;  %1396 = vmatprep.mubr.msk.bf16.mxu0 %vm272_vm1, %v205_v12  ;;  %v207_v23 = vpack.c.bf16 %v1164_v21, %v1163_v20  ;;  %v1197_v24 = vld [vmem:[%s1598_s23 + $0x61] sm:$0xff]  ;;  %v1198_v25 = vld [vmem:[%s1598_s23 + $0x69] sm:$0xff]  ;;  %v1199_v28 = vld [vmem:[%s1598_s23 + $0x79] sm:$0xff] }
  0x16   : > { %1363 = vmatmul.mubr.msk.bf16.vlgmr.msra.gmra.mrb[0].mxu1 %vm272_vm1, %v255_v13  ;;  %v1165_v26 = vld [vmem:[%s1598_s23 + $0x60] sm:$0xff]  ;;  %v1166_v27 = vld [vmem:[%s1598_s23 + $0x68] sm:$0xff]  ;;  %v1167_v30 = vld [vmem:[%s1598_s23 + $0x78] sm:$0xff]  ;;  %v257_v32 = vpack.c.bf16 %v1198_v25, %v1197_v24 }
  0x17   : > { %1463 = vmatpush3.bf16.msra.mxu1 %v535_v3  ;;  %1397 = vmatmul.mubr.msk.bf16.vlgmr.msra.gmra.mrb[0].mxu0 %vm272_vm1, %v206_v17  ;;  %v1200_v29 = vld [vmem:[%s1598_s23 + $0x81] sm:$0xff]  ;;  %v208_v33 = vpack.c.bf16 %v1166_v27, %v1165_v26  ;;  %v1201_v36 = vld [vmem:[%s1598_s23 + $0x91] sm:$0xff]  ;;  %v1202_v37 = vld [vmem:[%s1598_s23 + $0x99] sm:$0xff] }
  0x18   : > { %1429 = vmatpush3.bf16.msra.mxu0 %v797_v18  ;;  %1366 = vmatprep.mubr.msk.bf16.mxu1 %vm272_vm1, %v256_v22  ;;  %v1168_v31 = vld [vmem:[%s1598_s23 + $0x80] sm:$0xff]  ;;  %v258_v34 = vpack.c.bf16 %v1200_v29, %v1199_v28  ;;  %v1169_v38 = vld [vmem:[%s1598_s23 + $0x90] sm:$0xff]  ;;  %v1170_v39 = vld [vmem:[%s1598_s23 + $0x98] sm:$0xff]  ;;  %v259_v44 = vpack.c.bf16 %v1202_v37, %v1201_v36 }
  0x19   : > { %1400 = vmatprep.mubr.msk.bf16.mxu0 %vm272_vm1, %v207_v23  ;;  %v209_v35 = vpack.c.bf16 %v1168_v31, %v1167_v30  ;;  %v1203_v40 = vld [vmem:[%s1598_s23 + $0xa9] sm:$0xff]  ;;  %v1204_v41 = vld [vmem:[%s1598_s23 + $0xb1] sm:$0xff]  ;;  %v210_v45 = vpack.c.bf16 %v1170_v39, %v1169_v38  ;;  %v1205_v48 = vld [vmem:[%s1598_s23 + $0xc1] sm:$0xff] }
  0x1a   : > { %v1171_v42 = vld [vmem:[%s1598_s23 + $0xa8] sm:$0xff]  ;;  %v1172_v43 = vld [vmem:[%s1598_s23 + $0xb0] sm:$0xff]  ;;  %v260_v46 = vpack.c.bf16 %v1204_v41, %v1203_v40  ;;  %v1173_v50 = vld [vmem:[%s1598_s23 + $0xc0] sm:$0xff] }
  0x1b   : > { %v211_v47 = vpack.c.bf16 %v1172_v43, %v1171_v42  ;;  %v1206_v49 = vld [vmem:[%s1598_s23 + $0xc9] sm:$0xff]  ;;  %v1207_v52 = vld [vmem:[%s1598_s23 + $0xd9] sm:$0xff]  ;;  %v1208_v53 = vld [vmem:[%s1598_s23 + $0xe1] sm:$0xff] }
  0x1c   : > { %v1174_v51 = vld [vmem:[%s1598_s23 + $0xc8] sm:$0xff]  ;;  %v1256_v54 = vld [vmem:[%s1598_s23 + $0x1a] sm:$0xff]  ;;  %v261_v56 = vpack.c.bf16 %v1206_v49, %v1205_v48  ;;  %v262_v58 = vpack.c.bf16 %v1208_v53, %v1207_v52  ;;  %v1209_v60 = vld [vmem:[%s1598_s23 + $0xf1] sm:$0xff] }
  0x1d   : > { %v1257_v55 = vld [vmem:[%s1598_s23 + $0x22] sm:$0xff]  ;;  %v212_v57 = vpack.c.bf16 %v1174_v51, %v1173_v50  ;;  %v1210_v61 = vld [vmem:[%s1598_s23 + $0xf9] sm:$0xff]  ;;  %v1212_v1 = vld [vmem:[%s1598_s23 + $0x111] sm:$0xff] }
  0x1e   : > { %1367 = vmatmul.mubr.msk.bf16.gmra.mrb[4].mxu1 %vm272_vm1, %v257_v32  ;;  %v730_v59 = vpack.c.bf16 %v1257_v55, %v1256_v54  ;;  %v1258_v62 = vld [vmem:[%s1598_s23 + $0x32] sm:$0xff]  ;;  %v1259_v63 = vld [vmem:[%s1598_s23 + $0x3a] sm:$0xff]  ;;  %v1211_v0 = vld [vmem:[%s1598_s23 + $0x109] sm:$0xff]  ;;  %v263_v4 = vpack.c.bf16 %v1210_v61, %v1209_v60 }
  0x1f   : > { %1401 = vmatmul.mubr.msk.bf16.gmra.mrb[4].mxu0 %vm272_vm1, %v208_v33  ;;  %1370 = vmatprep.mubr.msk.bf16.mxu1 %vm272_vm1, %v258_v34  ;;  %v1260_v2 = vld [vmem:[%s1598_s23 + $0x4a] sm:$0xff]  ;;  %v1261_v3 = vld [vmem:[%s1598_s23 + $0x52] sm:$0xff]  ;;  %v731_v5 = vpack.c.bf16 %v1259_v63, %v1258_v62  ;;  %v264_v6 = vpack.c.bf16 %v1212_v1, %v1211_v0  ;;  %v1213_v8 = vld [vmem:[%s1598_s23 + $0x121] sm:$0xff] }
  0x20   : > { %1404 = vmatprep.mubr.msk.bf16.mxu0 %vm272_vm1, %v209_v35  ;;  %v732_v7 = vpack.c.bf16 %v1261_v3, %v1260_v2  ;;  %v1214_v9 = vld [vmem:[%s1598_s23 + $0x129] sm:$0xff]  ;;  %v1215_v12 = vld [vmem:[%s1598_s23 + $0x139] sm:$0xff]  ;;  %v1216_v13 = vld [vmem:[%s1598_s23 + $0x141] sm:$0xff] }
  0x21   : > { %v1262_v10 = vld [vmem:[%s1598_s23 + $0x62] sm:$0xff]  ;;  %v1263_v11 = vld [vmem:[%s1598_s23 + $0x6a] sm:$0xff]  ;;  %v1264_v14 = vld [vmem:[%s1598_s23 + $0x7a] sm:$0xff]  ;;  %v265_v16 = vpack.c.bf16 %v1214_v9, %v1213_v8  ;;  %v266_v18 = vpack.c.bf16 %v1216_v13, %v1215_v12 }
  0x22   : > { %v1265_v15 = vld [vmem:[%s1598_s23 + $0x82] sm:$0xff]  ;;  %v733_v17 = vpack.c.bf16 %v1263_v11, %v1262_v10  ;;  %v1217_v20 = vld [vmem:[%s1598_s23 + $0x151] sm:$0xff]  ;;  %v1218_v21 = vld [vmem:[%s1598_s23 + $0x159] sm:$0xff] }
  0x23   : > { %v734_v19 = vpack.c.bf16 %v1265_v15, %v1264_v14  ;;  %v1266_v22 = vld [vmem:[%s1598_s23 + $0x92] sm:$0xff]  ;;  %v1267_v23 = vld [vmem:[%s1598_s23 + $0x9a] sm:$0xff]  ;;  %v1219_v24 = vld [vmem:[%s1598_s23 + $0x169] sm:$0xff]  ;;  %v267_v28 = vpack.c.bf16 %v1218_v21, %v1217_v20 }
  0x24   : > { %v1220_v25 = vld [vmem:[%s1598_s23 + $0x171] sm:$0xff]  ;;  %v735_v29 = vpack.c.bf16 %v1267_v23, %v1266_v22  ;;  %v1221_v32 = vld [vmem:[%s1598_s23 + $0x181] sm:$0xff]  ;;  %v1222_v33 = vld [vmem:[%s1598_s23 + $0x189] sm:$0xff] }
  0x25   : > { %v1268_v26 = vld [vmem:[%s1598_s23 + $0xaa] sm:$0xff]  ;;  %v1269_v27 = vld [vmem:[%s1598_s23 + $0xb2] sm:$0xff]  ;;  %v268_v30 = vpack.c.bf16 %v1220_v25, %v1219_v24  ;;  %v1270_v34 = vld [vmem:[%s1598_s23 + $0xc2] sm:$0xff]  ;;  %v269_v40 = vpack.c.bf16 %v1222_v33, %v1221_v32 }
  0x26   : > { %1371 = vmatmul.mubr.msk.bf16.gmra.mrb[8].mxu1 %vm272_vm1, %v259_v44  ;;  %v736_v31 = vpack.c.bf16 %v1269_v27, %v1268_v26  ;;  %v1271_v35 = vld [vmem:[%s1598_s23 + $0xca] sm:$0xff]  ;;  %v1175_v36 = vld [vmem:[%s1598_s23 + $0xd8] sm:$0xff]  ;;  %v1176_v37 = vld [vmem:[%s1598_s23 + $0xe0] sm:$0xff] }
  0x27   : > { %1405 = vmatmul.mubr.msk.bf16.gmra.mrb[8].mxu0 %vm272_vm1, %v210_v45  ;;  %1374 = vmatprep.mubr.msk.bf16.mxu1 %vm272_vm1, %v260_v46  ;;  %v1272_v38 = vld [vmem:[%s1598_s23 + $0xda] sm:$0xff]  ;;  %v1273_v39 = vld [vmem:[%s1598_s23 + $0xe2] sm:$0xff]  ;;  %v737_v41 = vpack.c.bf16 %v1271_v35, %v1270_v34  ;;  %v213_v42 = vpack.c.bf16 %v1176_v37, %v1175_v36  ;;  %v1177_v44 = vld [vmem:[%s1598_s23 + $0xf0] sm:$0xff] }
  0x28   : > { %1408 = vmatprep.mubr.msk.bf16.mxu0 %vm272_vm1, %v211_v47  ;;  %v738_v43 = vpack.c.bf16 %v1273_v39, %v1272_v38  ;;  %v1178_v45 = vld [vmem:[%s1598_s23 + $0xf8] sm:$0xff]  ;;  %v1179_v48 = vld [vmem:[%s1598_s23 + $0x108] sm:$0xff]  ;;  %v1180_v49 = vld [vmem:[%s1598_s23 + $0x110] sm:$0xff] }
  0x29   : > { %v1274_v46 = vld [vmem:[%s1598_s23 + $0xf2] sm:$0xff]  ;;  %v1275_v47 = vld [vmem:[%s1598_s23 + $0xfa] sm:$0xff]  ;;  %v1276_v50 = vld [vmem:[%s1598_s23 + $0x10a] sm:$0xff]  ;;  %v214_v52 = vpack.c.bf16 %v1178_v45, %v1177_v44  ;;  %v215_v54 = vpack.c.bf16 %v1180_v49, %v1179_v48 }
  0x2a   : > { %v1277_v51 = vld [vmem:[%s1598_s23 + $0x112] sm:$0xff]  ;;  %v739_v53 = vpack.c.bf16 %v1275_v47, %v1274_v46  ;;  %v1184_v61 = vld [vmem:[%s1598_s23 + $0x140] sm:$0xff]  ;;  %v1187_v8 = vld [vmem:[%s1598_s23 + $0x168] sm:$0xff] }
  0x2b   : > { %v740_v55 = vpack.c.bf16 %v1277_v51, %v1276_v50  ;;  %v1183_v60 = vld [vmem:[%s1598_s23 + $0x138] sm:$0xff]  ;;  %v1281_v63 = vld [vmem:[%s1598_s23 + $0x142] sm:$0xff]  ;;  %v1188_v9 = vld [vmem:[%s1598_s23 + $0x170] sm:$0xff] }
  0x2c   : > { %v1280_v62 = vld [vmem:[%s1598_s23 + $0x13a] sm:$0xff]  ;;  %v217_v2 = vpack.c.bf16 %v1184_v61, %v1183_v60  ;;  %v1284_v10 = vld [vmem:[%s1598_s23 + $0x16a] sm:$0xff]  ;;  %v1285_v11 = vld [vmem:[%s1598_s23 + $0x172] sm:$0xff]  ;;  %v219_v14 = vpack.c.bf16 %v1188_v9, %v1187_v8 }
  0x2d   : > { %v742_v3 = vpack.c.bf16 %v1281_v63, %v1280_v62  ;;  %v744_v15 = vpack.c.bf16 %v1285_v11, %v1284_v10  ;;  %v1756_v39 = vld [vmem:[%s1869_s2] ss:$0 sm:$0xff] }
  0x2e   : > { %1375 = vmatmul.mubr.msk.bf16.gmra.mrb[12].mxu1 %vm272_vm1, %v261_v56  ;;  %v1181_v56 = vld [vmem:[%s1598_s23 + $0x120] sm:$0xff] }
  0x2f   : > { %1409 = vmatmul.mubr.msk.bf16.gmra.mrb[12].mxu0 %vm272_vm1, %v212_v57  ;;  %1378 = vmatprep.mubr.msk.bf16.mxu1 %vm272_vm1, %v262_v58  ;;  %v1182_v57 = vld [vmem:[%s1598_s23 + $0x128] sm:$0xff] }
  0x30   : > { %1430 = vmatprep.mubr.msk.bf16.mxu0 %vm272_vm1, %v730_v59  ;;  %v1278_v58 = vld [vmem:[%s1598_s23 + $0x122] sm:$0xff]  ;;  %v1279_v59 = vld [vmem:[%s1598_s23 + $0x12a] sm:$0xff]  ;;  %v216_v0 = vpack.c.bf16 %v1182_v57, %v1181_v56 }
  0x31   : > { %v741_v1 = vpack.c.bf16 %v1279_v59, %v1278_v58 }
  0x36   : > { %1379 = vmatmul.mubr.msk.bf16.gmra.mrb[16].mxu1 %vm272_vm1, %v263_v4  ;;  %v1185_v4 = vld [vmem:[%s1598_s23 + $0x150] sm:$0xff] }
  0x37   : > { %1431 = vmatmul.mubr.msk.bf16.vlgmr.msra.gmra.mrb[0].mxu0 %vm272_vm1, %v731_v5  ;;  %1382 = vmatprep.mubr.msk.bf16.mxu1 %vm272_vm1, %v264_v6  ;;  %v1186_v5 = vld [vmem:[%s1598_s23 + $0x158] sm:$0xff] }
  0x38   : > { %1434 = vmatprep.mubr.msk.bf16.mxu0 %vm272_vm1, %v732_v7  ;;  %v1282_v6 = vld [vmem:[%s1598_s23 + $0x152] sm:$0xff]  ;;  %v1283_v7 = vld [vmem:[%s1598_s23 + $0x15a] sm:$0xff]  ;;  %v218_v12 = vpack.c.bf16 %v1186_v5, %v1185_v4 }
  0x39   : > { %v743_v13 = vpack.c.bf16 %v1283_v7, %v1282_v6 }
  0x3e   : > { %1383 = vmatmul.mubr.msk.bf16.gmra.mrb[20].mxu1 %vm272_vm1, %v265_v16  ;;  %v1189_v16 = vld [vmem:[%s1598_s23 + $0x180] sm:$0xff] }
  0x3f   : > { %1435 = vmatmul.mubr.msk.bf16.gmra.mrb[4].mxu0 %vm272_vm1, %v733_v17  ;;  %1386 = vmatprep.mubr.msk.bf16.mxu1 %vm272_vm1, %v266_v18  ;;  %v1190_v17 = vld [vmem:[%s1598_s23 + $0x188] sm:$0xff] }
  0x40   : > { %1438 = vmatprep.mubr.msk.bf16.mxu0 %vm272_vm1, %v734_v19  ;;  %v1286_v18 = vld [vmem:[%s1598_s23 + $0x182] sm:$0xff]  ;;  %v1287_v19 = vld [vmem:[%s1598_s23 + $0x18a] sm:$0xff]  ;;  %v220_v20 = vpack.c.bf16 %v1190_v17, %v1189_v16 }
  0x41   : > { %v745_v21 = vpack.c.bf16 %v1287_v19, %v1286_v18 }
  0x46   : > { %1387 = vmatmul.mubr.msk.bf16.gmra.mrb[24].mxu1 %vm272_vm1, %v267_v28 }
  0x47   : > { %1439 = vmatmul.mubr.msk.bf16.gmra.mrb[8].mxu0 %vm272_vm1, %v735_v29  ;;  %1390 = vmatprep.mubr.msk.bf16.mxu1 %vm272_vm1, %v268_v30 }
  0x48   : > { %1442 = vmatprep.mubr.msk.bf16.mxu0 %vm272_vm1, %v736_v31 }
  0x4e   : > { %1391 = vmatmul.mubr.msk.bf16.gmra.mrb[28].mxu1 %vm272_vm1, %v269_v40 }
  0x4f   : > { %1443 = vmatmul.mubr.msk.bf16.gmra.mrb[12].mxu0 %vm272_vm1, %v737_v41  ;;  %1412 = vmatprep.mubr.msk.bf16.mxu1 %vm272_vm1, %v213_v42 }
  0x50   : > { %1446 = vmatprep.mubr.msk.bf16.mxu0 %vm272_vm1, %v738_v43 }
  0x56   : > { %1413 = vmatmul.mubr.msk.bf16.vlgmr.msra.gmra.mrb[16].mxu1 %vm272_vm1, %v214_v52 }
  0x57   : > { %1447 = vmatmul.mubr.msk.bf16.gmra.mrb[16].mxu0 %vm272_vm1, %v739_v53  ;;  %1416 = vmatprep.mubr.msk.bf16.mxu1 %vm272_vm1, %v215_v54 }
  0x58   : > { %1450 = vmatprep.mubr.msk.bf16.mxu0 %vm272_vm1, %v740_v55 }
  0x5e   : > { %1417 = vmatmul.mubr.msk.bf16.gmra.mrb[20].mxu1 %vm272_vm1, %v216_v0 }
  0x5f   : > { %1451 = vmatmul.mubr.msk.bf16.gmra.mrb[20].mxu0 %vm272_vm1, %v741_v1  ;;  %1420 = vmatprep.mubr.msk.bf16.mxu1 %vm272_vm1, %v217_v2 }
  0x60   : > { %1454 = vmatprep.mubr.msk.bf16.mxu0 %vm272_vm1, %v742_v3 }
  0x66   : > { %1421 = vmatmul.mubr.msk.bf16.gmra.mrb[24].mxu1 %vm272_vm1, %v218_v12 }
  0x67   : > { %1455 = vmatmul.mubr.msk.bf16.gmra.mrb[24].mxu0 %vm272_vm1, %v743_v13  ;;  %1424 = vmatprep.mubr.msk.bf16.mxu1 %vm272_vm1, %v219_v14 }
  0x68   : > { %1458 = vmatprep.mubr.msk.bf16.mxu0 %vm272_vm1, %v744_v15 }
  0x6e   : > { %1425 = vmatmul.mubr.msk.bf16.gmra.mrb[28].mxu1 %vm272_vm1, %v220_v20 }
  0x6f   : > { %1459 = vmatmul.mubr.msk.bf16.gmra.mrb[28].mxu0 %vm272_vm1, %v745_v21 }
  0xe9   : > { %v1364_v22 = vpop.f32.mrb[0].mxu1 }
  0xea   : > { %v359_v23 = vpop.f32.mrb[1].mxu1 }
  0xeb   : > { %v1365_v24 = vpop.f32.mrb[2].mxu1 }
  0xec   : > { %v362_v25 = vpop.f32.mrb[3].mxu1 }
  0xf1   : > { %v1368_v26 = vpop.f32.mrb[4].mxu1 }
  0xf2   : > { %v375_v27 = vpop.f32.mrb[5].mxu1 }
  0xf3   : > { %v1369_v28 = vpop.f32.mrb[6].mxu1 }
  0xf4   : > { %v378_v29 = vpop.f32.mrb[7].mxu1 }
  0xf9   : > { %v1372_v30 = vpop.f32.mrb[8].mxu1 }
  0xfa   : > { %v391_v31 = vpop.f32.mrb[9].mxu1 }
  0xfb   : > { %v1373_v32 = vpop.f32.mrb[10].mxu1 }
  0xfc   : > { %v394_v33 = vpop.f32.mrb[11].mxu1 }
 0x101   : > { %v1745_v34 = vpop.f32.mrb[12].mxu1 }
 0x102   : > { %v1747_v35 = vpop.f32.mrb[13].mxu1 }
 0x103   : > { %v1749_v36 = vpop.f32.mrb[14].mxu1 }
 0x104   : > { %v1751_v37 = vpop.f32.mrb[15].mxu1 }
 0x10a   : > { %v1432_v38 = vpop.f32.mrb[0].mxu0 }
 0x10b   : > { %v1464_v40 = vadd.f32 %v1432_v38, %v1364_v22  ;;  %v833_v41 = vpop.f32.mrb[1].mxu0 }
 0x10c   : > { %v1465_v42 = vadd.f32 %v833_v41, %v359_v23  ;;  %v1433_v43 = vpop.f32.mrb[2].mxu0 }
 0x10d   : > { %v1001_v44 = vadd.f32 %v1464_v40, %v1756_v39  ;;  %v1466_v45 = vadd.f32 %v1433_v43, %v1365_v24  ;;  %v836_v46 = vpop.f32.mrb[3].mxu0 }
 0x10e   : > { %v999_v47 = vadd.f32 %v1465_v42, %v1756_v39  ;;  %v1467_v48 = vadd.f32 %v836_v46, %v362_v25 }
 0x10f   : > { %v1033_v49 = vmax.f32 %v1001_v44, 0.0  ;;  %v1002_v50 = vadd.f32 %v1466_v45, %v1756_v39 }
 0x110   : > { %v1031_v51 = vmax.f32 %v999_v47, 0.0  ;;  %v1000_v52 = vadd.f32 %v1467_v48, %v1756_v39 }
 0x111   : > { %1066 = vst.msk [vmem:[%s1763_s29 + $0x10] sm:$0xff] %vm1063_vm2, %v1033_v49  ;;  %v1034_v53 = vmax.f32 %v1002_v50, 0.0 }
 0x112   : > { %1064 = vst.msk [vmem:[%s1763_s29] sm:$0xff] %vm1063_vm2, %v1031_v51  ;;  %v1032_v54 = vmax.f32 %v1000_v52, 0.0  ;;  %v1436_v55 = vpop.f32.mrb[4].mxu0 }
 0x113   : > { %1067 = vst.msk [vmem:[%s1763_s29 + $0x18] sm:$0xff] %vm1063_vm2, %v1034_v53  ;;  %v1468_v56 = vadd.f32 %v1436_v55, %v1368_v26  ;;  %v849_v57 = vpop.f32.mrb[5].mxu0 }
 0x114   : > { %1065 = vst.msk [vmem:[%s1763_s29 + $0x8] sm:$0xff] %vm1063_vm2, %v1032_v54  ;;  %v1469_v58 = vadd.f32 %v849_v57, %v375_v27  ;;  %v1437_v59 = vpop.f32.mrb[6].mxu0 }
 0x115   : > { %v1005_v60 = vadd.f32 %v1468_v56, %v1756_v39  ;;  %v1470_v61 = vadd.f32 %v1437_v59, %v1369_v28  ;;  %v852_v62 = vpop.f32.mrb[7].mxu0 }
 0x116   : > { %v1003_v63 = vadd.f32 %v1469_v58, %v1756_v39  ;;  %v1471_v0 = vadd.f32 %v852_v62, %v378_v29 }
 0x117   : > { %v1037_v1 = vmax.f32 %v1005_v60, 0.0  ;;  %v1006_v2 = vadd.f32 %v1470_v61, %v1756_v39 }
 0x118   : > { %v1035_v3 = vmax.f32 %v1003_v63, 0.0  ;;  %v1004_v4 = vadd.f32 %v1471_v0, %v1756_v39 }
 0x119   : > { %1070 = vst.msk [vmem:[%s1763_s29 + $0x30] sm:$0xff] %vm1063_vm2, %v1037_v1  ;;  %v1038_v5 = vmax.f32 %v1006_v2, 0.0 }
 0x11a   : > { %1068 = vst.msk [vmem:[%s1763_s29 + $0x20] sm:$0xff] %vm1063_vm2, %v1035_v3  ;;  %v1036_v6 = vmax.f32 %v1004_v4, 0.0  ;;  %v1440_v7 = vpop.f32.mrb[8].mxu0 }
 0x11b   : > { %1071 = vst.msk [vmem:[%s1763_s29 + $0x38] sm:$0xff] %vm1063_vm2, %v1038_v5  ;;  %v1472_v8 = vadd.f32 %v1440_v7, %v1372_v30  ;;  %v865_v9 = vpop.f32.mrb[9].mxu0 }
 0x11c   : > { %1069 = vst.msk [vmem:[%s1763_s29 + $0x28] sm:$0xff] %vm1063_vm2, %v1036_v6  ;;  %v1473_v10 = vadd.f32 %v865_v9, %v391_v31  ;;  %v1441_v11 = vpop.f32.mrb[10].mxu0 }
 0x11d   : > { %v1009_v12 = vadd.f32 %v1472_v8, %v1756_v39  ;;  %v1474_v13 = vadd.f32 %v1441_v11, %v1373_v32  ;;  %v868_v14 = vpop.f32.mrb[11].mxu0 }
 0x11e   : > { %v1007_v15 = vadd.f32 %v1473_v10, %v1756_v39  ;;  %v1475_v16 = vadd.f32 %v868_v14, %v394_v33 }
 0x11f   : > { %v1041_v17 = vmax.f32 %v1009_v12, 0.0  ;;  %v1010_v18 = vadd.f32 %v1474_v13, %v1756_v39 }
 0x120   : > { %v1039_v19 = vmax.f32 %v1007_v15, 0.0  ;;  %v1008_v20 = vadd.f32 %v1475_v16, %v1756_v39 }
 0x121   : > { %1074 = vst.msk [vmem:[%s1763_s29 + $0x50] sm:$0xff] %vm1063_vm2, %v1041_v17  ;;  %v1042_v21 = vmax.f32 %v1010_v18, 0.0 }
 0x122   : > { %1072 = vst.msk [vmem:[%s1763_s29 + $0x40] sm:$0xff] %vm1063_vm2, %v1039_v19  ;;  %v1040_v22 = vmax.f32 %v1008_v20, 0.0  ;;  %v1444_v23 = vpop.f32.mrb[12].mxu0 }
 0x123   : > { %1075 = vst.msk [vmem:[%s1763_s29 + $0x58] sm:$0xff] %vm1063_vm2, %v1042_v21  ;;  %v1476_v24 = vadd.f32 %v1444_v23, %v1745_v34  ;;  %v881_v25 = vpop.f32.mrb[13].mxu0 }
 0x124   : > { %1073 = vst.msk [vmem:[%s1763_s29 + $0x48] sm:$0xff] %vm1063_vm2, %v1040_v22  ;;  %v1477_v26 = vadd.f32 %v881_v25, %v1747_v35  ;;  %v1445_v27 = vpop.f32.mrb[14].mxu0 }
 0x125   : > { %v1013_v28 = vadd.f32 %v1476_v24, %v1756_v39  ;;  %v1478_v29 = vadd.f32 %v1445_v27, %v1749_v36  ;;  %v884_v30 = vpop.f32.mrb[15].mxu0 }
 0x126   : > { %v1011_v31 = vadd.f32 %v1477_v26, %v1756_v39  ;;  %v1479_v32 = vadd.f32 %v884_v30, %v1751_v37 }
 0x127   : > { %v1045_v33 = vmax.f32 %v1013_v28, 0.0  ;;  %v1014_v34 = vadd.f32 %v1478_v29, %v1756_v39 }
 0x128   : > { %v1043_v38 = vmax.f32 %v1011_v31, 0.0  ;;  %v1012_v40 = vadd.f32 %v1479_v32, %v1756_v39 }
 0x129   : > { %1078 = vst.msk [vmem:[%s1763_s29 + $0x70] sm:$0xff] %vm1063_vm2, %v1045_v33  ;;  %v1046_v35 = vmax.f32 %v1014_v34, 0.0  ;;  %v1414_v41 = vpop.f32.mrb[16].mxu1 }
 0x12a   : > { %1076 = vst.msk [vmem:[%s1763_s29 + $0x60] sm:$0xff] %vm1063_vm2, %v1043_v38  ;;  %v1044_v42 = vmax.f32 %v1012_v40, 0.0  ;;  %v1448_v36 = vpop.f32.mrb[16].mxu0  ;;  %v635_v43 = vpop.f32.mrb[17].mxu1 }
 0x12b   : > { %1079 = vst.msk [vmem:[%s1763_s29 + $0x78] sm:$0xff] %vm1063_vm2, %v1046_v35  ;;  %v1480_v44 = vadd.f32 %v1448_v36, %v1414_v41  ;;  %v897_v37 = vpop.f32.mrb[17].mxu0  ;;  %v1415_v45 = vpop.f32.mrb[18].mxu1 }
 0x12c   : > { %1077 = vst.msk [vmem:[%s1763_s29 + $0x68] sm:$0xff] %vm1063_vm2, %v1044_v42  ;;  %v1481_v46 = vadd.f32 %v897_v37, %v635_v43  ;;  %v1449_v47 = vpop.f32.mrb[18].mxu0  ;;  %v638_v48 = vpop.f32.mrb[19].mxu1 }
 0x12d   : > { %v1017_v49 = vadd.f32 %v1480_v44, %v1756_v39  ;;  %v1482_v50 = vadd.f32 %v1449_v47, %v1415_v45  ;;  %v900_v51 = vpop.f32.mrb[19].mxu0 }
 0x12e   : > { %v1015_v52 = vadd.f32 %v1481_v46, %v1756_v39  ;;  %v1483_v53 = vadd.f32 %v900_v51, %v638_v48 }
 0x12f   : > { %v1049_v54 = vmax.f32 %v1017_v49, 0.0  ;;  %v1018_v55 = vadd.f32 %v1482_v50, %v1756_v39 }
 0x130   : > { %v1047_v56 = vmax.f32 %v1015_v52, 0.0  ;;  %v1016_v57 = vadd.f32 %v1483_v53, %v1756_v39 }
 0x131   : > { %1082 = vst.msk [vmem:[%s1763_s29 + $0x90] sm:$0xff] %vm1063_vm2, %v1049_v54  ;;  %v1050_v58 = vmax.f32 %v1018_v55, 0.0  ;;  %v1418_v59 = vpop.f32.mrb[20].mxu1 }
 0x132   : > { %1080 = vst.msk [vmem:[%s1763_s29 + $0x80] sm:$0xff] %vm1063_vm2, %v1047_v56  ;;  %v1048_v60 = vmax.f32 %v1016_v57, 0.0  ;;  %v1452_v61 = vpop.f32.mrb[20].mxu0  ;;  %v651_v62 = vpop.f32.mrb[21].mxu1 }
 0x133   : > { %1083 = vst.msk [vmem:[%s1763_s29 + $0x98] sm:$0xff] %vm1063_vm2, %v1050_v58  ;;  %v1484_v63 = vadd.f32 %v1452_v61, %v1418_v59  ;;  %v913_v0 = vpop.f32.mrb[21].mxu0  ;;  %v1419_v1 = vpop.f32.mrb[22].mxu1 }
 0x134   : > { %1081 = vst.msk [vmem:[%s1763_s29 + $0x88] sm:$0xff] %vm1063_vm2, %v1048_v60  ;;  %v1485_v2 = vadd.f32 %v913_v0, %v651_v62  ;;  %v1453_v3 = vpop.f32.mrb[22].mxu0  ;;  %v654_v4 = vpop.f32.mrb[23].mxu1 }
 0x135   : > { %v1021_v5 = vadd.f32 %v1484_v63, %v1756_v39  ;;  %v1486_v6 = vadd.f32 %v1453_v3, %v1419_v1  ;;  %v916_v7 = vpop.f32.mrb[23].mxu0 }
 0x136   : > { %v1019_v8 = vadd.f32 %v1485_v2, %v1756_v39  ;;  %v1487_v9 = vadd.f32 %v916_v7, %v654_v4 }
 0x137   : > { %v1053_v10 = vmax.f32 %v1021_v5, 0.0  ;;  %v1022_v11 = vadd.f32 %v1486_v6, %v1756_v39 }
 0x138   : > { %v1051_v12 = vmax.f32 %v1019_v8, 0.0  ;;  %v1020_v13 = vadd.f32 %v1487_v9, %v1756_v39 }
 0x139   : > { %1086 = vst.msk [vmem:[%s1763_s29 + $0xb0] sm:$0xff] %vm1063_vm2, %v1053_v10  ;;  %v1054_v14 = vmax.f32 %v1022_v11, 0.0  ;;  %v1422_v15 = vpop.f32.mrb[24].mxu1 }
 0x13a   : > { %1084 = vst.msk [vmem:[%s1763_s29 + $0xa0] sm:$0xff] %vm1063_vm2, %v1051_v12  ;;  %v1052_v16 = vmax.f32 %v1020_v13, 0.0  ;;  %v1456_v17 = vpop.f32.mrb[24].mxu0  ;;  %v667_v18 = vpop.f32.mrb[25].mxu1 }
 0x13b   : > { %1087 = vst.msk [vmem:[%s1763_s29 + $0xb8] sm:$0xff] %vm1063_vm2, %v1054_v14  ;;  %v1488_v19 = vadd.f32 %v1456_v17, %v1422_v15  ;;  %v929_v20 = vpop.f32.mrb[25].mxu0  ;;  %v1423_v21 = vpop.f32.mrb[26].mxu1 }
 0x13c   : > { %1085 = vst.msk [vmem:[%s1763_s29 + $0xa8] sm:$0xff] %vm1063_vm2, %v1052_v16  ;;  %v1489_v22 = vadd.f32 %v929_v20, %v667_v18  ;;  %v1457_v23 = vpop.f32.mrb[26].mxu0  ;;  %v670_v24 = vpop.f32.mrb[27].mxu1 }
 0x13d   : > { %v1025_v25 = vadd.f32 %v1488_v19, %v1756_v39  ;;  %v1490_v26 = vadd.f32 %v1457_v23, %v1423_v21  ;;  %v932_v27 = vpop.f32.mrb[27].mxu0 }
 0x13e   : > { %v1023_v28 = vadd.f32 %v1489_v22, %v1756_v39  ;;  %v1491_v29 = vadd.f32 %v932_v27, %v670_v24 }
 0x13f   : > { %v1057_v30 = vmax.f32 %v1025_v25, 0.0  ;;  %v1026_v31 = vadd.f32 %v1490_v26, %v1756_v39 }
 0x140   : > { %v1055_v32 = vmax.f32 %v1023_v28, 0.0  ;;  %v1024_v33 = vadd.f32 %v1491_v29, %v1756_v39 }
 0x141   : > { %1090 = vst.msk [vmem:[%s1763_s29 + $0xd0] sm:$0xff] %vm1063_vm2, %v1057_v30  ;;  %v1058_v34 = vmax.f32 %v1026_v31, 0.0  ;;  %v1426_v38 = vpop.f32.mrb[28].mxu1 }
 0x142   : > { %1088 = vst.msk [vmem:[%s1763_s29 + $0xc0] sm:$0xff] %vm1063_vm2, %v1055_v32  ;;  %v1056_v40 = vmax.f32 %v1024_v33, 0.0  ;;  %v1460_v35 = vpop.f32.mrb[28].mxu0  ;;  %v683_v41 = vpop.f32.mrb[29].mxu1 }
 0x143   : > { %1091 = vst.msk [vmem:[%s1763_s29 + $0xd8] sm:$0xff] %vm1063_vm2, %v1058_v34  ;;  %v1492_v42 = vadd.f32 %v1460_v35, %v1426_v38  ;;  %v945_v36 = vpop.f32.mrb[29].mxu0  ;;  %v1427_v43 = vpop.f32.mrb[30].mxu1 }
 0x144   : > { %1089 = vst.msk [vmem:[%s1763_s29 + $0xc8] sm:$0xff] %vm1063_vm2, %v1056_v40  ;;  %v1493_v44 = vadd.f32 %v945_v36, %v683_v41  ;;  %v1461_v37 = vpop.f32.mrb[30].mxu0  ;;  %v686_v45 = vpop.f32.mrb[31].mxu1 }
 0x145   : > { %v1029_v46 = vadd.f32 %v1492_v42, %v1756_v39  ;;  %v1494_v47 = vadd.f32 %v1461_v37, %v1427_v43  ;;  %v948_v48 = vpop.f32.mrb[31].mxu0 }
 0x146   : > { %v1027_v49 = vadd.f32 %v1493_v44, %v1756_v39  ;;  %v1495_v50 = vadd.f32 %v948_v48, %v686_v45 }
 0x147   : > { %v1061_v51 = vmax.f32 %v1029_v46, 0.0  ;;  %v1030_v52 = vadd.f32 %v1494_v47, %v1756_v39 }
 0x148   : > { %v1059_v53 = vmax.f32 %v1027_v49, 0.0  ;;  %v1028_v54 = vadd.f32 %v1495_v50, %v1756_v39 }
 0x149   : > { %1094 = vst.msk [vmem:[%s1763_s29 + $0xf0] sm:$0xff] %vm1063_vm2, %v1061_v51  ;;  %v1062_v55 = vmax.f32 %v1030_v52, 0.0 }
 0x14a   : > { %1092 = vst.msk [vmem:[%s1763_s29 + $0xe0] sm:$0xff] %vm1063_vm2, %v1059_v53  ;;  %v1060_v56 = vmax.f32 %v1028_v54, 0.0 }
 0x14b   : > { %1095 = vst.msk [vmem:[%s1763_s29 + $0xf8] sm:$0xff] %vm1063_vm2, %v1062_v55 }
 0x14c   : > { %1093 = vst.msk [vmem:[%s1763_s29 + $0xe8] sm:$0xff] %vm1063_vm2, %v1060_v56 }
 0x14d PF: > { %s13_s12 = sadd.s32 1, %s1547_s12  }
 0x14e   : > { %p10_p4 = scmp.ge.s32.totalorder %s13_s12, 4  }
 0x150   :  { %12 = sbr.rel (!%p10_p4) target bundleno = 1 (0x1), region = 65 }

// kernel: module_e_forward.10
= control target key start
LH: loop header
LB: loop body
LE: loop exit
PB: predicated region body
PF: predicated region fallthrough
CT: control target
= control target key end

     0   :  { %s4036_s12 = smov 0   ;;  %s4719_s0 = inlined_call_operand.vmem [shape: f32[2,18,18,6], index: 0, kind: input, shape index: {}]   ;;  %s4720_s1 = inlined_call_operand.vmem [shape: bf16[9,6,8], index: 1, kind: input, shape index: {}]   ;;  %s4721_s2 = inlined_call_operand.vmem [shape: f32[1,8], index: 2, kind: input, shape index: {}]   ;;  %s4722_s3 = inlined_call_operand.vmem [shape: f32[2,256,8], index: 3, kind: output, shape index: {}]  }
   0x1 LB: > { %s2916_s13 = sadd.s32 4294967295, %s4014_s12   ;;  %p2920_p0 = scmp.ge.s32.totalorder %s4014_s12, 1  ;;  %s4014_s12 = sphi %s4036_s12, %s13_s12  }
   0x2   : > { %p137_p1 = scmp.lt.s32.totalorder %s4014_s12, 3 }
   0x4   : > { %p138_p2 = pnand %p2920_p0, %p137_p1 }
   0x5   : > { %v2924_v0 = vld [vmem:[%s4720_s1 + $0x4] sm:$0x7] (!%p138_p2)  ;;  %vm320_vm0 = vcmask (!%p138_p2), 1042432   ;;  %v4050_v1 = vld [vmem:[%s4720_s1 + $0x10] sm:$0x7] (!%p138_p2)  ;;  %p161_p3 = scmp.lt.s32.totalorder (!%p138_p2), %s2916_s13, 1 }
   0x6   : > { %141 = sbr.rel (%p138_p2) target bundleno = 524 (0x20c), region = 32  ;;  %3989 = vmatprep.subr.msk.bf16.mxu1 (!%p138_p2), %vm320_vm0, %v2924_v0  ;;  %3993 = vmatprep.subr.msk.bf16.mxu0 (!%p138_p2), %vm320_vm0, %v4050_v1  ;;  %v322_v2 = vsel (!%p138_p2), %vm320_vm0, %v2924_v0, 0  ;;  %v4058_v3 = vsel (!%p138_p2), %vm320_vm0, %v4050_v1, 0  ;;  %v220_v4 = vld [vmem:[%s4720_s1] sm:$0x7] (!%p138_p2)  ;;  %vm271_vm1 = vcmask (!%p138_p2), 48128  }
   0x7   : > { %3426 = vmatpush3.bf16.msra.mxu1 (!%p138_p2), %v322_v2  ;;  %3562 = vmatpush3.bf16.msra.mxu0 (!%p138_p2), %v4058_v3  ;;  %v3104_v5 = vld [vmem:[%s4720_s1 + $0x14] sm:$0x7] (!%p138_p2)  ;;  %v534_v14 = vsel (!%p138_p2), %vm320_vm0, %v220_v4, 0  ;;  %v3153_v20 = vld [vmem:[%s4720_s1 + $0x18] sm:$0x7] (!%p138_p2)  ;;  %vm2828_vm2 = vcmask (!%p138_p2), 64512  }
   0x8   : > { %3990 = vmatprep.subr.msk.bf16.mxu1 (!%p138_p2), %vm320_vm0, %v220_v4  ;;  %3995 = vmatprep.subr.msk.bf16.mxu0 (!%p138_p2), %vm320_vm0, %v3104_v5  ;;  %v1679_v18 = vsel (!%p138_p2), %vm320_vm0, %v3104_v5, 0  ;;  %v4102_v21 = vld [vmem:[%s4720_s1 + $0x8] sm:$0x7] (!%p138_p2)  ;;  %v1974_v52 = vsel (!%p138_p2), %vm320_vm0, %v3153_v20, 0  ;;  %v4181_v53 = vld [vmem:[%s4720_s1 + $0x1c] sm:$0x7] (!%p138_p2) }
   0xd   : > { %s4724_s13 = smov (!%p161_p3, %s2916_s13), 1 }
   0xe   : > { %s3999_s22 = smul.u32 432, %s4724_s13  ;;  %s3271_s11 = sshll.u32 %s4724_s13, 8 }
   0xf   : > { %s4615_s16 = scalar_lea.vmem %s4722_s3, %s3271_s11 }
  0x10   : > { %s4075_s25 = scalar_lea.vmem %s4719_s0, %s3999_s22 }
  0x11   : > { %v221_v6 = vld [vmem:[%s4075_s25 + $0x1] sm:$0xff]  ;;  %v222_v7 = vld [vmem:[%s4075_s25 + $0x9] sm:$0xff]  ;;  %v3023_v8 = vld [vmem:[%s4075_s25 + $0x19] sm:$0xff] }
  0x12   : > { %v253_v9 = vpack.c.bf16 %v222_v7, %v221_v6  ;;  %v3024_v10 = vld [vmem:[%s4075_s25 + $0x21] sm:$0xff]  ;;  %v3025_v11 = vld [vmem:[%s4075_s25 + $0x31] sm:$0xff]  ;;  %v3026_v12 = vld [vmem:[%s4075_s25 + $0x39] sm:$0xff] }
  0x13   : > { %v1318_v13 = vpack.c.bf16 %v3024_v10, %v3023_v8  ;;  %v4084_v15 = vpack.c.bf16 %v3026_v12, %v3025_v11  ;;  %v3027_v16 = vld [vmem:[%s4075_s25 + $0x49] sm:$0xff]  ;;  %v3028_v17 = vld [vmem:[%s4075_s25 + $0x51] sm:$0xff]  ;;  %v3029_v22 = vld [vmem:[%s4075_s25 + $0x61] sm:$0xff] }
  0x14   : > { %3427 = vmatprep.mubr.msk.bf16.mxu1 %vm271_vm1, %v253_v9  ;;  %v4090_v19 = vpack.c.bf16 %v3028_v17, %v3027_v16  ;;  %v3030_v23 = vld [vmem:[%s4075_s25 + $0x69] sm:$0xff]  ;;  %v3031_v24 = vld [vmem:[%s4075_s25 + $0x79] sm:$0xff]  ;;  %v3032_v25 = vld [vmem:[%s4075_s25 + $0x81] sm:$0xff] }
  0x15   : > { %3563 = vmatprep.mubr.msk.bf16.mxu0 %vm271_vm1, %v1318_v13  ;;  %3428 = vmatmul.mubr.msk.bf16.vlgmr.msra.gmra.mrb[0].mxu1 %vm271_vm1, %v1318_v13  ;;  %v4115_v26 = vpack.c.bf16 %v3030_v23, %v3029_v22  ;;  %v4117_v27 = vpack.c.bf16 %v3032_v25, %v3031_v24  ;;  %v3033_v28 = vld [vmem:[%s4075_s25 + $0x91] sm:$0xff]  ;;  %v3034_v29 = vld [vmem:[%s4075_s25 + $0x99] sm:$0xff]  ;;  %v3035_v30 = vld [vmem:[%s4075_s25 + $0xa9] sm:$0xff] }
  0x16   : > { %3460 = vmatpush3.bf16.msra.mxu1 %v534_v14  ;;  %3564 = vmatmul.mubr.msk.bf16.vlgmr.msra.gmra.mrb[0].mxu0 %vm271_vm1, %v4084_v15  ;;  %v3036_v31 = vld [vmem:[%s4075_s25 + $0xb1] sm:$0xff]  ;;  %v4131_v32 = vpack.c.bf16 %v3034_v29, %v3033_v28  ;;  %v3037_v34 = vld [vmem:[%s4075_s25 + $0xc1] sm:$0xff]  ;;  %v3038_v35 = vld [vmem:[%s4075_s25 + $0xc9] sm:$0xff] }
  0x17   : > { %3596 = vmatpush3.bf16.msra.mxu0 %v1679_v18  ;;  %3431 = vmatprep.mubr.msk.bf16.mxu1 %vm271_vm1, %v4084_v15  ;;  %v4133_v33 = vpack.c.bf16 %v3036_v31, %v3035_v30  ;;  %v3072_v36 = vld [vmem:[%s4075_s25 + $0x1a] sm:$0xff]  ;;  %v3073_v37 = vld [vmem:[%s4075_s25 + $0x22] sm:$0xff]  ;;  %v4147_v38 = vpack.c.bf16 %v3038_v35, %v3037_v34  ;;  %v3074_v42 = vld [vmem:[%s4075_s25 + $0x32] sm:$0xff] }
  0x18   : > { %3567 = vmatprep.mubr.msk.bf16.mxu0 %vm271_vm1, %v4090_v19  ;;  %3996 = vmatprep.subr.msk.bf16.mxu0 %vm320_vm0, %v3153_v20  ;;  %v4149_v39 = vpack.c.bf16 %v3073_v37, %v3072_v36  ;;  %v239_v40 = vld [vmem:[%s4075_s25 + $0xd9] sm:$0xff]  ;;  %v240_v41 = vld [vmem:[%s4075_s25 + $0xe1] sm:$0xff]  ;;  %v241_v44 = vld [vmem:[%s4075_s25 + $0xf1] sm:$0xff] }
  0x19   : > { %3991 = vmatprep.subr.msk.bf16.mxu1 %vm320_vm0, %v4102_v21  ;;  %v3075_v43 = vld [vmem:[%s4075_s25 + $0x3a] sm:$0xff]  ;;  %v3076_v46 = vld [vmem:[%s4075_s25 + $0x4a] sm:$0xff]  ;;  %v3077_v47 = vld [vmem:[%s4075_s25 + $0x52] sm:$0xff]  ;;  %v4167_v48 = vpack.c.bf16 %v240_v41, %v239_v40 }
  0x1a   : > { %v242_v45 = vld [vmem:[%s4075_s25 + $0xf9] sm:$0xff]  ;;  %v4169_v49 = vpack.c.bf16 %v3075_v43, %v3074_v42  ;;  %v4173_v51 = vpack.c.bf16 %v3077_v47, %v3076_v46  ;;  %v243_v54 = vld [vmem:[%s4075_s25 + $0x109] sm:$0xff]  ;;  %v244_v55 = vld [vmem:[%s4075_s25 + $0x111] sm:$0xff]  ;;  %v796_v47 = vsel %vm320_vm0, %v4102_v21, 0 }
  0x1b   : > { %v4171_v50 = vpack.c.bf16 %v242_v45, %v241_v44  ;;  %v3078_v56 = vld [vmem:[%s4075_s25 + $0x62] sm:$0xff]  ;;  %v3079_v57 = vld [vmem:[%s4075_s25 + $0x6a] sm:$0xff]  ;;  %v3080_v60 = vld [vmem:[%s4075_s25 + $0x7a] sm:$0xff]  ;;  %v4199_v62 = vpack.c.bf16 %v244_v55, %v243_v54 }
  0x1c   : > { %v245_v58 = vld [vmem:[%s4075_s25 + $0x121] sm:$0xff]  ;;  %v246_v59 = vld [vmem:[%s4075_s25 + $0x129] sm:$0xff]  ;;  %v4201_v63 = vpack.c.bf16 %v3079_v57, %v3078_v56  ;;  %v247_v4 = vld [vmem:[%s4075_s25 + $0x139] sm:$0xff] }
  0x1d   : > { %3432 = vmatmul.mubr.msk.bf16.gmra.mrb[4].mxu1 %vm271_vm1, %v4090_v19  ;;  %v3081_v61 = vld [vmem:[%s4075_s25 + $0x82] sm:$0xff]  ;;  %v4203_v0 = vpack.c.bf16 %v246_v59, %v245_v58  ;;  %v3082_v6 = vld [vmem:[%s4075_s25 + $0x92] sm:$0xff]  ;;  %v3083_v7 = vld [vmem:[%s4075_s25 + $0x9a] sm:$0xff] }
  0x1e   : > { %3568 = vmatmul.mubr.msk.bf16.gmra.mrb[4].mxu0 %vm271_vm1, %v4115_v26  ;;  %3435 = vmatprep.mubr.msk.bf16.mxu1 %vm271_vm1, %v4115_v26  ;;  %v4205_v2 = vpack.c.bf16 %v3081_v61, %v3080_v60  ;;  %v248_v5 = vld [vmem:[%s4075_s25 + $0x141] sm:$0xff]  ;;  %v249_v8 = vld [vmem:[%s4075_s25 + $0x151] sm:$0xff]  ;;  %v250_v9 = vld [vmem:[%s4075_s25 + $0x159] sm:$0xff]  ;;  %v4225_v13 = vpack.c.bf16 %v3083_v7, %v3082_v6 }
  0x1f   : > { %3571 = vmatprep.mubr.msk.bf16.mxu0 %vm271_vm1, %v4117_v27  ;;  %v3084_v10 = vld [vmem:[%s4075_s25 + $0xaa] sm:$0xff]  ;;  %v3085_v11 = vld [vmem:[%s4075_s25 + $0xb2] sm:$0xff]  ;;  %v4223_v12 = vpack.c.bf16 %v248_v5, %v247_v4  ;;  %v4227_v14 = vpack.c.bf16 %v250_v9, %v249_v8  ;;  %v3086_v20 = vld [vmem:[%s4075_s25 + $0xc2] sm:$0xff] }
  0x20   : > { %v4229_v16 = vpack.c.bf16 %v3085_v11, %v3084_v10  ;;  %v251_v17 = vld [vmem:[%s4075_s25 + $0x169] sm:$0xff]  ;;  %v252_v18 = vld [vmem:[%s4075_s25 + $0x171] sm:$0xff]  ;;  %v172_v23 = vld [vmem:[%s4075_s25] sm:$0xff] }
  0x21   : > { %v3087_v22 = vld [vmem:[%s4075_s25 + $0xca] sm:$0xff]  ;;  %v3088_v25 = vld [vmem:[%s4075_s25 + $0xda] sm:$0xff]  ;;  %v3089_v28 = vld [vmem:[%s4075_s25 + $0xe2] sm:$0xff]  ;;  %v4247_v29 = vpack.c.bf16 %v252_v18, %v251_v17 }
  0x22   : > { %v173_v24 = vld [vmem:[%s4075_s25 + $0x8] sm:$0xff]  ;;  %v4249_v30 = vpack.c.bf16 %v3087_v22, %v3086_v20  ;;  %v4251_v34 = vpack.c.bf16 %v3089_v28, %v3088_v25  ;;  %v174_v35 = vld [vmem:[%s4075_s25 + $0x18] sm:$0xff]  ;;  %v175_v36 = vld [vmem:[%s4075_s25 + $0x20] sm:$0xff] }
  0x23   : > { %v204_v31 = vpack.c.bf16 %v173_v24, %v172_v23  ;;  %v3090_v37 = vld [vmem:[%s4075_s25 + $0xf2] sm:$0xff]  ;;  %v3091_v40 = vld [vmem:[%s4075_s25 + $0xfa] sm:$0xff]  ;;  %v3092_v43 = vld [vmem:[%s4075_s25 + $0x10a] sm:$0xff]  ;;  %v4268_v45 = vpack.c.bf16 %v175_v36, %v174_v35 }
  0x24   : > { %v176_v41 = vld [vmem:[%s4075_s25 + $0x30] sm:$0xff]  ;;  %v177_v42 = vld [vmem:[%s4075_s25 + $0x38] sm:$0xff]  ;;  %v4270_v46 = vpack.c.bf16 %v3091_v40, %v3090_v37  ;;  %v4283_v55 = vld [vmem:[%s4720_s1 + $0xc] sm:$0x7] }
  0x25   : > { %3436 = vmatmul.mubr.msk.bf16.gmra.mrb[8].mxu1 %vm271_vm1, %v4117_v27  ;;  %v3093_v44 = vld [vmem:[%s4075_s25 + $0x112] sm:$0xff]  ;;  %v178_v56 = vld [vmem:[%s4075_s25 + $0x48] sm:$0xff]  ;;  %v180_v59 = vld [vmem:[%s4075_s25 + $0x60] sm:$0xff] }
  0x26   : > { %3572 = vmatmul.mubr.msk.bf16.gmra.mrb[8].mxu0 %vm271_vm1, %v4131_v32  ;;  %3439 = vmatprep.mubr.msk.bf16.mxu1 %vm271_vm1, %v4131_v32  ;;  %v4276_v54 = vpack.c.bf16 %v3093_v44, %v3092_v43  ;;  %v179_v57 = vld [vmem:[%s4075_s25 + $0x50] sm:$0xff]  ;;  %v3094_v21 = vld [vmem:[%s4075_s25 + $0x122] sm:$0xff]  ;;  %v3096_v61 = vld [vmem:[%s4075_s25 + $0x13a] sm:$0xff] }
  0x27   : > { %3575 = vmatprep.mubr.msk.bf16.mxu0 %vm271_vm1, %v4133_v33  ;;  %v3095_v58 = vld [vmem:[%s4075_s25 + $0x12a] sm:$0xff]  ;;  %v3097_v4 = vld [vmem:[%s4075_s25 + $0x142] sm:$0xff]  ;;  %v4301_v5 = vpack.c.bf16 %v179_v57, %v178_v56  ;;  %v182_v9 = vld [vmem:[%s4075_s25 + $0x78] sm:$0xff] }
  0x28   : > { %v181_v60 = vld [vmem:[%s4075_s25 + $0x68] sm:$0xff]  ;;  %v4303_v6 = vpack.c.bf16 %v3095_v58, %v3094_v21  ;;  %v4307_v8 = vpack.c.bf16 %v3097_v4, %v3096_v61  ;;  %v183_v10 = vld [vmem:[%s4075_s25 + $0x80] sm:$0xff]  ;;  %v3098_v11 = vld [vmem:[%s4075_s25 + $0x152] sm:$0xff]  ;;  %v2268_v61 = vsel %vm320_vm0, %v4181_v53, 0 }
  0x29   : > { %v4305_v7 = vpack.c.bf16 %v181_v60, %v180_v59  ;;  %v3099_v17 = vld [vmem:[%s4075_s25 + $0x15a] sm:$0xff]  ;;  %v184_v18 = vld [vmem:[%s4075_s25 + $0x90] sm:$0xff]  ;;  %v4325_v24 = vpack.c.bf16 %v183_v10, %v182_v9  ;;  %v186_v35 = vld [vmem:[%s4075_s25 + $0xa8] sm:$0xff] }
  0x2a   : > { %v185_v20 = vld [vmem:[%s4075_s25 + $0x98] sm:$0xff]  ;;  %v3100_v22 = vld [vmem:[%s4075_s25 + $0x16a] sm:$0xff]  ;;  %v4327_v25 = vpack.c.bf16 %v3099_v17, %v3098_v11  ;;  %v3102_v37 = vld [vmem:[%s4075_s25 + $0x182] sm:$0xff] }
  0x2b   : > { %v3101_v23 = vld [vmem:[%s4075_s25 + $0x172] sm:$0xff]  ;;  %v4329_v28 = vpack.c.bf16 %v185_v20, %v184_v18  ;;  %v3103_v40 = vld [vmem:[%s4075_s25 + $0x18a] sm:$0xff]  ;;  %v191_v57 = vld [vmem:[%s4075_s25 + $0xe0] sm:$0xff] }
  0x2c   : > { %v187_v36 = vld [vmem:[%s4075_s25 + $0xb0] sm:$0xff]  ;;  %v4349_v44 = vpack.c.bf16 %v3103_v40, %v3102_v37  ;;  %v190_v56 = vld [vmem:[%s4075_s25 + $0xd8] sm:$0xff]  ;;  %v3251_v4 = vld [vmem:[%s4720_s1 + $0x20] sm:$0x7] }
  0x2d   : > { %3440 = vmatmul.mubr.msk.bf16.gmra.mrb[12].mxu1 %vm271_vm1, %v4133_v33  ;;  %v4347_v43 = vpack.c.bf16 %v187_v36, %v186_v35  ;;  %v192_v21 = vld [vmem:[%s4075_s25 + $0xf0] sm:$0xff]  ;;  %v193_v58 = vld [vmem:[%s4075_s25 + $0xf8] sm:$0xff]  ;;  %v4365_v59 = vpack.c.bf16 %v191_v57, %v190_v56  ;;  %v194_v9 = vld [vmem:[%s4075_s25 + $0x108] sm:$0xff] }
  0x2e   : > { %3576 = vmatmul.mubr.msk.bf16.gmra.mrb[12].mxu0 %vm271_vm1, %v4147_v38  ;;  %3443 = vmatprep.mubr.msk.bf16.mxu1 %vm271_vm1, %v4147_v38  ;;  %v4367_v60 = vpack.c.bf16 %v193_v58, %v192_v21  ;;  %v195_v10 = vld [vmem:[%s4075_s25 + $0x110] sm:$0xff]  ;;  %v197_v11 = vld [vmem:[%s4075_s25 + $0x128] sm:$0xff]  ;;  %v198_v20 = vld [vmem:[%s4075_s25 + $0x138] sm:$0xff]  ;;  %v1091_v58 = vsel %vm320_vm0, %v4283_v55, 0 }
  0x2f   : > { %3597 = vmatprep.mubr.msk.bf16.mxu0 %vm271_vm1, %v4149_v39  ;;  %v4387_v17 = vpack.c.bf16 %v195_v10, %v194_v9  ;;  %v201_v35 = vld [vmem:[%s4075_s25 + $0x158] sm:$0xff]  ;;  %v202_v40 = vld [vmem:[%s4075_s25 + $0x168] sm:$0xff]  ;;  %v3152_v9 = vld [vmem:[%s4075_s25 + $0x1a0] sm:$0xff] }
  0x30   : > { %v698_v56 = vld [vmem:[%s4075_s25 + $0xa] sm:$0xff] }
  0x35   : > { %3444 = vmatmul.mubr.msk.bf16.gmra.mrb[16].mxu1 %vm271_vm1, %v4167_v48 }
  0x36   : > { %3598 = vmatmul.mubr.msk.bf16.vlgmr.msra.gmra.mrb[0].mxu0 %vm271_vm1, %v4169_v49  ;;  %3447 = vmatprep.mubr.msk.bf16.mxu1 %vm271_vm1, %v4171_v50 }
  0x37   : > { %3630 = vmatpush3.bf16.msra.mxu0 %v1974_v52  ;;  %3601 = vmatprep.mubr.msk.bf16.mxu0 %vm271_vm1, %v4173_v51  ;;  %v4274_v52 = vpack.c.bf16 %v177_v42, %v176_v41  ;;  %v188_v41 = vld [vmem:[%s4075_s25 + $0xc0] sm:$0xff]  ;;  %v189_v42 = vld [vmem:[%s4075_s25 + $0xc8] sm:$0xff] }
  0x38   : > { %3997 = vmatprep.subr.msk.bf16.mxu0 %vm320_vm0, %v4181_v53  ;;  %v196_v53 = vld [vmem:[%s4075_s25 + $0x120] sm:$0xff] }
  0x39   : > { %v4389_v18 = vpack.c.bf16 %v197_v11, %v196_v53  ;;  %v2562_v53 = vsel %vm320_vm0, %v3251_v4, 0 }
  0x3d   : > { %3448 = vmatmul.mubr.msk.bf16.gmra.mrb[20].mxu1 %vm271_vm1, %v4199_v62 }
  0x3e   : > { %3602 = vmatmul.mubr.msk.bf16.gmra.mrb[4].mxu0 %vm271_vm1, %v4201_v63  ;;  %3451 = vmatprep.mubr.msk.bf16.mxu1 %vm271_vm1, %v4203_v0 }
  0x3f   : > { %3605 = vmatprep.mubr.msk.bf16.mxu0 %vm271_vm1, %v4205_v2 }
  0x45   : > { %3452 = vmatmul.mubr.msk.bf16.gmra.mrb[24].mxu1 %vm271_vm1, %v4223_v12 }
  0x46   : > { %3606 = vmatmul.mubr.msk.bf16.gmra.mrb[8].mxu0 %vm271_vm1, %v4225_v13  ;;  %3455 = vmatprep.mubr.msk.bf16.mxu1 %vm271_vm1, %v4227_v14 }
  0x47   : > { %3609 = vmatprep.mubr.msk.bf16.mxu0 %vm271_vm1, %v4229_v16 }
  0x4d   : > { %3456 = vmatmul.mubr.msk.bf16.gmra.mrb[28].mxu1 %vm271_vm1, %v4247_v29 }
  0x4e   : > { %3610 = vmatmul.mubr.msk.bf16.gmra.mrb[12].mxu0 %vm271_vm1, %v4249_v30  ;;  %3461 = vmatprep.mubr.msk.bf16.mxu1 %vm271_vm1, %v204_v31  ;;  %v4331_v31 = vpack.c.bf16 %v3101_v23, %v3100_v22  ;;  %v199_v22 = vld [vmem:[%s4075_s25 + $0x140] sm:$0xff]  ;;  %v200_v23 = vld [vmem:[%s4075_s25 + $0x150] sm:$0xff] }
  0x4f   : > { %3613 = vmatprep.mubr.msk.bf16.mxu0 %vm271_vm1, %v4251_v34  ;;  %v4403_v36 = vpack.c.bf16 %v199_v22, %v198_v20  ;;  %v4405_v37 = vpack.c.bf16 %v201_v35, %v200_v23 }
  0x55   : > { %3462 = vmatmul.mubr.msk.bf16.vlgmr.msra.gmra.mrb[0].mxu1 %vm271_vm1, %v4268_v45 }
  0x56   : > { %3494 = vmatpush3.bf16.msra.mxu1 %v796_v47  ;;  %3614 = vmatmul.mubr.msk.bf16.gmra.mrb[16].mxu0 %vm271_vm1, %v4270_v46  ;;  %v4351_v47 = vpack.c.bf16 %v189_v42, %v188_v41  ;;  %v203_v41 = vld [vmem:[%s4075_s25 + $0x170] sm:$0xff]  ;;  %v697_v42 = vld [vmem:[%s4075_s25 + $0x2] sm:$0xff] }
  0x57   : > { %3465 = vmatprep.mubr.msk.bf16.mxu1 %vm271_vm1, %v4274_v52  ;;  %3617 = vmatprep.mubr.msk.bf16.mxu0 %vm271_vm1, %v4276_v54  ;;  %v4419_v57 = vpack.c.bf16 %v203_v41, %v202_v40  ;;  %v729_v21 = vpack.c.bf16 %v698_v56, %v697_v42 }
  0x58   : > { %3992 = vmatprep.subr.msk.bf16.mxu1 %vm320_vm0, %v4283_v55  ;;  %v3150_v55 = vld [vmem:[%s4075_s25 + $0x188] sm:$0xff] }
  0x5d   : > { %3466 = vmatmul.mubr.msk.bf16.gmra.mrb[4].mxu1 %vm271_vm1, %v4301_v5 }
  0x5e   : > { %3618 = vmatmul.mubr.msk.bf16.gmra.mrb[20].mxu0 %vm271_vm1, %v4303_v6  ;;  %3469 = vmatprep.mubr.msk.bf16.mxu1 %vm271_vm1, %v4305_v7 }
  0x5f   : > { %3621 = vmatprep.mubr.msk.bf16.mxu0 %vm271_vm1, %v4307_v8 }
  0x65   : > { %3470 = vmatmul.mubr.msk.bf16.gmra.mrb[8].mxu1 %vm271_vm1, %v4325_v24 }
  0x66   : > { %3622 = vmatmul.mubr.msk.bf16.gmra.mrb[24].mxu0 %vm271_vm1, %v4327_v25  ;;  %3473 = vmatprep.mubr.msk.bf16.mxu1 %vm271_vm1, %v4329_v28 }
  0x67   : > { %3625 = vmatprep.mubr.msk.bf16.mxu0 %vm271_vm1, %v4331_v31 }
  0x6d   : > { %3474 = vmatmul.mubr.msk.bf16.gmra.mrb[12].mxu1 %vm271_vm1, %v4347_v43 }
  0x6e   : > { %3626 = vmatmul.mubr.msk.bf16.gmra.mrb[28].mxu0 %vm271_vm1, %v4349_v44  ;;  %3477 = vmatprep.mubr.msk.bf16.mxu1 %vm271_vm1, %v4351_v47 }
  0x6f   : > { %3631 = vmatprep.mubr.msk.bf16.mxu0 %vm271_vm1, %v4274_v52 }
  0x75   : > { %3478 = vmatmul.mubr.msk.bf16.gmra.mrb[16].mxu1 %vm271_vm1, %v4365_v59 }
  0x76   : > { %3632 = vmatmul.mubr.msk.bf16.vlgmr.msra.gmra.mrb[0].mxu0 %vm271_vm1, %v4301_v5  ;;  %3481 = vmatprep.mubr.msk.bf16.mxu1 %vm271_vm1, %v4367_v60 }
  0x77   : > { %3664 = vmatpush3.bf16.msra.mxu0 %v2268_v61  ;;  %3635 = vmatprep.mubr.msk.bf16.mxu0 %vm271_vm1, %v4305_v7 }
  0x78   : > { %3998 = vmatprep.subr.msk.bf16.mxu0 %vm320_vm0, %v3251_v4 }
  0x7d   : > { %3482 = vmatmul.mubr.msk.bf16.gmra.mrb[20].mxu1 %vm271_vm1, %v4387_v17 }
  0x7e   : > { %3636 = vmatmul.mubr.msk.bf16.gmra.mrb[4].mxu0 %vm271_vm1, %v4325_v24  ;;  %3485 = vmatprep.mubr.msk.bf16.mxu1 %vm271_vm1, %v4389_v18 }
  0x7f   : > { %3639 = vmatprep.mubr.msk.bf16.mxu0 %vm271_vm1, %v4329_v28 }
  0x85   : > { %3486 = vmatmul.mubr.msk.bf16.gmra.mrb[24].mxu1 %vm271_vm1, %v4403_v36 }
  0x86   : > { %3640 = vmatmul.mubr.msk.bf16.gmra.mrb[8].mxu0 %vm271_vm1, %v4347_v43  ;;  %3489 = vmatprep.mubr.msk.bf16.mxu1 %vm271_vm1, %v4405_v37 }
  0x87   : > { %3643 = vmatprep.mubr.msk.bf16.mxu0 %vm271_vm1, %v4351_v47 }
  0x8d   : > { %3490 = vmatmul.mubr.msk.bf16.gmra.mrb[28].mxu1 %vm271_vm1, %v4419_v57 }
  0x8e   : > { %3644 = vmatmul.mubr.msk.bf16.gmra.mrb[12].mxu0 %vm271_vm1, %v4365_v59  ;;  %3495 = vmatprep.mubr.msk.bf16.mxu1 %vm271_vm1, %v729_v21 }
  0x8f   : > { %3647 = vmatprep.mubr.msk.bf16.mxu0 %vm271_vm1, %v4367_v60 }
  0x95   : > { %3496 = vmatmul.mubr.msk.bf16.vlgmr.msra.gmra.mrb[0].mxu1 %vm271_vm1, %v4149_v39  ;;  %v3149_v39 = vld [vmem:[%s4075_s25 + $0x180] sm:$0xff] }
  0x96   : > { %3528 = vmatpush3.bf16.msra.mxu1 %v1091_v58  ;;  %3648 = vmatmul.mubr.msk.bf16.gmra.mrb[16].mxu0 %vm271_vm1, %v4387_v17  ;;  %v4450_v61 = vpack.c.bf16 %v3150_v55, %v3149_v39 }
  0x97   : > { %3499 = vmatprep.mubr.msk.bf16.mxu1 %vm271_vm1, %v4169_v49  ;;  %3651 = vmatprep.mubr.msk.bf16.mxu0 %vm271_vm1, %v4389_v18 }
  0x98   : > { %3994 = vmatprep.subr.msk.bf16.mxu1 %vm320_vm0, %v4050_v1  ;;  %v3151_v1 = vld [vmem:[%s4075_s25 + $0x198] sm:$0xff] }
  0x99   : > { %v1922_v10 = vpack.c.bf16 %v3152_v9, %v3151_v1 }
  0x9d   : > { %3500 = vmatmul.mubr.msk.bf16.gmra.mrb[4].mxu1 %vm271_vm1, %v4173_v51 }
  0x9e   : > { %3652 = vmatmul.mubr.msk.bf16.gmra.mrb[20].mxu0 %vm271_vm1, %v4403_v36  ;;  %3503 = vmatprep.mubr.msk.bf16.mxu1 %vm271_vm1, %v4201_v63 }
  0x9f   : > { %3655 = vmatprep.mubr.msk.bf16.mxu0 %vm271_vm1, %v4405_v37 }
  0xa5   : > { %3504 = vmatmul.mubr.msk.bf16.gmra.mrb[8].mxu1 %vm271_vm1, %v4205_v2 }
  0xa6   : > { %3656 = vmatmul.mubr.msk.bf16.gmra.mrb[24].mxu0 %vm271_vm1, %v4419_v57  ;;  %3507 = vmatprep.mubr.msk.bf16.mxu1 %vm271_vm1, %v4225_v13 }
  0xa7   : > { %3659 = vmatprep.mubr.msk.bf16.mxu0 %vm271_vm1, %v4450_v61 }
  0xad   : > { %3508 = vmatmul.mubr.msk.bf16.gmra.mrb[12].mxu1 %vm271_vm1, %v4229_v16 }
  0xae   : > { %3660 = vmatmul.mubr.msk.bf16.gmra.mrb[28].mxu0 %vm271_vm1, %v1922_v10  ;;  %3511 = vmatprep.mubr.msk.bf16.mxu1 %vm271_vm1, %v4249_v30 }
  0xaf   : > { %3665 = vmatprep.mubr.msk.bf16.mxu0 %vm271_vm1, %v4084_v15  ;;  %v3199_v15 = vld [vmem:[%s4075_s25 + $0x189] sm:$0xff] }
  0xb5   : > { %3512 = vmatmul.mubr.msk.bf16.gmra.mrb[16].mxu1 %vm271_vm1, %v4251_v34 }
  0xb6   : > { %3666 = vmatmul.mubr.msk.bf16.vlgmr.msra.gmra.mrb[0].mxu0 %vm271_vm1, %v4090_v19  ;;  %3515 = vmatprep.mubr.msk.bf16.mxu1 %vm271_vm1, %v4270_v46 }
  0xb7   : > { %3698 = vmatpush3.bf16.msra.mxu0 %v2562_v53  ;;  %3669 = vmatprep.mubr.msk.bf16.mxu0 %vm271_vm1, %v4115_v26  ;;  %v3200_v26 = vld [vmem:[%s4075_s25 + $0x199] sm:$0xff] }
  0xbd   : > { %3516 = vmatmul.mubr.msk.bf16.gmra.mrb[20].mxu1 %vm271_vm1, %v4276_v54 }
  0xbe   : > { %3670 = vmatmul.mubr.msk.bf16.gmra.mrb[4].mxu0 %vm271_vm1, %v4117_v27  ;;  %3519 = vmatprep.mubr.msk.bf16.mxu1 %vm271_vm1, %v4303_v6  ;;  %v3201_v27 = vld [vmem:[%s4075_s25 + $0x1a1] sm:$0xff] }
  0xbf   : > { %3673 = vmatprep.mubr.msk.bf16.mxu0 %vm271_vm1, %v4131_v32  ;;  %v2216_v32 = vpack.c.bf16 %v3201_v27, %v3200_v26 }
  0xc5   : > { %3520 = vmatmul.mubr.msk.bf16.gmra.mrb[24].mxu1 %vm271_vm1, %v4307_v8 }
  0xc6   : > { %3674 = vmatmul.mubr.msk.bf16.gmra.mrb[8].mxu0 %vm271_vm1, %v4133_v33  ;;  %3523 = vmatprep.mubr.msk.bf16.mxu1 %vm271_vm1, %v4327_v25  ;;  %v3249_v33 = vld [vmem:[%s4075_s25 + $0x19a] sm:$0xff] }
  0xc7   : > { %3677 = vmatprep.mubr.msk.bf16.mxu0 %vm271_vm1, %v4147_v38  ;;  %v3250_v38 = vld [vmem:[%s4075_s25 + $0x1a2] sm:$0xff] }
  0xcd   : > { %3524 = vmatmul.mubr.msk.bf16.gmra.mrb[28].mxu1 %vm271_vm1, %v4331_v31 }
  0xce   : > { %3678 = vmatmul.mubr.msk.bf16.gmra.mrb[12].mxu0 %vm271_vm1, %v4167_v48  ;;  %3529 = vmatprep.mubr.msk.bf16.mxu1 %vm271_vm1, %v4268_v45 }
  0xcf   : > { %3681 = vmatprep.mubr.msk.bf16.mxu0 %vm271_vm1, %v4171_v50 }
  0xd5   : > { %3530 = vmatmul.mubr.msk.bf16.vlgmr.msra.gmra.mrb[0].mxu1 %vm271_vm1, %v4274_v52 }
  0xd6   : > { %3732 = vmatpush3.bf16.msra.mxu1 %v4058_v3  ;;  %3682 = vmatmul.mubr.msk.bf16.gmra.mrb[16].mxu0 %vm271_vm1, %v4199_v62  ;;  %v3198_v3 = vld [vmem:[%s4075_s25 + $0x181] sm:$0xff] }
  0xd7   : > { %3533 = vmatprep.mubr.msk.bf16.mxu1 %vm271_vm1, %v4301_v5  ;;  %3685 = vmatprep.mubr.msk.bf16.mxu0 %vm271_vm1, %v4203_v0  ;;  %v2215_v19 = vpack.c.bf16 %v3199_v15, %v3198_v3 }
  0xdd   : > { %3534 = vmatmul.mubr.msk.bf16.gmra.mrb[4].mxu1 %vm271_vm1, %v4305_v7 }
  0xde   : > { %3686 = vmatmul.mubr.msk.bf16.gmra.mrb[20].mxu0 %vm271_vm1, %v4223_v12  ;;  %3537 = vmatprep.mubr.msk.bf16.mxu1 %vm271_vm1, %v4325_v24 }
  0xdf   : > { %3689 = vmatprep.mubr.msk.bf16.mxu0 %vm271_vm1, %v4227_v14 }
  0xe5   : > { %3538 = vmatmul.mubr.msk.bf16.gmra.mrb[8].mxu1 %vm271_vm1, %v4329_v28 }
  0xe6   : > { %3690 = vmatmul.mubr.msk.bf16.gmra.mrb[24].mxu0 %vm271_vm1, %v4247_v29  ;;  %3541 = vmatprep.mubr.msk.bf16.mxu1 %vm271_vm1, %v4347_v43 }
  0xe7   : > { %3693 = vmatprep.mubr.msk.bf16.mxu0 %vm271_vm1, %v2215_v19 }
  0xed   : > { %3542 = vmatmul.mubr.msk.bf16.gmra.mrb[12].mxu1 %vm271_vm1, %v4351_v47 }
  0xee   : > { %3694 = vmatmul.mubr.msk.bf16.gmra.mrb[28].mxu0 %vm271_vm1, %v2216_v32  ;;  %3545 = vmatprep.mubr.msk.bf16.mxu1 %vm271_vm1, %v4365_v59 }
  0xef   : > { %3699 = vmatprep.mubr.msk.bf16.mxu0 %vm271_vm1, %v4169_v49 }
  0xf5   : > { %3546 = vmatmul.mubr.msk.bf16.gmra.mrb[16].mxu1 %vm271_vm1, %v4367_v60 }
  0xf6   : > { %3700 = vmatmul.mubr.msk.bf16.vlgmr.msra.gmra.mrb[0].mxu0 %vm271_vm1, %v4173_v51  ;;  %3549 = vmatprep.mubr.msk.bf16.mxu1 %vm271_vm1, %v4387_v17 }
  0xf7   : > { %3703 = vmatprep.mubr.msk.bf16.mxu0 %vm271_vm1, %v4201_v63 }
  0xfd   : > { %3550 = vmatmul.mubr.msk.bf16.gmra.mrb[20].mxu1 %vm271_vm1, %v4389_v18 }
  0xfe   : > { %3704 = vmatmul.mubr.msk.bf16.gmra.mrb[4].mxu0 %vm271_vm1, %v4205_v2  ;;  %3553 = vmatprep.mubr.msk.bf16.mxu1 %vm271_vm1, %v4403_v36 }
  0xff   : > { %3707 = vmatprep.mubr.msk.bf16.mxu0 %vm271_vm1, %v4225_v13 }
 0x105   : > { %3554 = vmatmul.mubr.msk.bf16.gmra.mrb[24].mxu1 %vm271_vm1, %v4405_v37 }
 0x106   : > { %3708 = vmatmul.mubr.msk.bf16.gmra.mrb[8].mxu0 %vm271_vm1, %v4229_v16  ;;  %3557 = vmatprep.mubr.msk.bf16.mxu1 %vm271_vm1, %v4419_v57 }
 0x107   : > { %3711 = vmatprep.mubr.msk.bf16.mxu0 %vm271_vm1, %v4249_v30 }
 0x10d   : > { %3558 = vmatmul.mubr.msk.bf16.gmra.mrb[28].mxu1 %vm271_vm1, %v4450_v61 }
 0x10e   : > { %3712 = vmatmul.mubr.msk.bf16.gmra.mrb[12].mxu0 %vm271_vm1, %v4251_v34  ;;  %3579 = vmatprep.mubr.msk.bf16.mxu1 %vm271_vm1, %v4167_v48  ;;  %v2510_v48 = vpack.c.bf16 %v3250_v38, %v3249_v33 }
 0x10f   : > { %3715 = vmatprep.mubr.msk.bf16.mxu0 %vm271_vm1, %v4270_v46 }
 0x115   : > { %3580 = vmatmul.mubr.msk.bf16.vlgmr.msra.gmra.mrb[16].mxu1 %vm271_vm1, %v4171_v50 }
 0x116   : > { %3716 = vmatmul.mubr.msk.bf16.gmra.mrb[16].mxu0 %vm271_vm1, %v4276_v54  ;;  %3583 = vmatprep.mubr.msk.bf16.mxu1 %vm271_vm1, %v4199_v62  ;;  %v4608_v54 = vld [vmem:[%s4721_s2] ss:$0 sm:$0xff] }
 0x117   : > { %3719 = vmatprep.mubr.msk.bf16.mxu0 %vm271_vm1, %v4303_v6 }
 0x11d   : > { %3584 = vmatmul.mubr.msk.bf16.gmra.mrb[20].mxu1 %vm271_vm1, %v4203_v0 }
 0x11e   : > { %3720 = vmatmul.mubr.msk.bf16.gmra.mrb[20].mxu0 %vm271_vm1, %v4307_v8  ;;  %3587 = vmatprep.mubr.msk.bf16.mxu1 %vm271_vm1, %v4223_v12 }
 0x11f   : > { %3723 = vmatprep.mubr.msk.bf16.mxu0 %vm271_vm1, %v4327_v25 }
 0x125   : > { %3588 = vmatmul.mubr.msk.bf16.gmra.mrb[24].mxu1 %vm271_vm1, %v4227_v14 }
 0x126   : > { %3724 = vmatmul.mubr.msk.bf16.gmra.mrb[24].mxu0 %vm271_vm1, %v4331_v31  ;;  %3591 = vmatprep.mubr.msk.bf16.mxu1 %vm271_vm1, %v4247_v29 }
 0x127   : > { %3727 = vmatprep.mubr.msk.bf16.mxu0 %vm271_vm1, %v4349_v44 }
 0x12d   : > { %3592 = vmatmul.mubr.msk.bf16.gmra.mrb[28].mxu1 %vm271_vm1, %v2215_v19 }
 0x12e   : > { %3728 = vmatmul.mubr.msk.bf16.gmra.mrb[28].mxu0 %vm271_vm1, %v2510_v48 }
 0x1a8   : > { %v3531_v49 = vpop.f32.mrb[0].mxu1 }
 0x1a9   : > { %v1127_v50 = vpop.f32.mrb[1].mxu1 }
 0x1aa   : > { %v3532_v51 = vpop.f32.mrb[2].mxu1 }
 0x1ab   : > { %v1130_v62 = vpop.f32.mrb[3].mxu1 }
 0x1b0   : > { %v3535_v63 = vpop.f32.mrb[4].mxu1 }
 0x1b1   : > { %v1143_v0 = vpop.f32.mrb[5].mxu1 }
 0x1b2   : > { %v3536_v2 = vpop.f32.mrb[6].mxu1 }
 0x1b3   : > { %v1146_v12 = vpop.f32.mrb[7].mxu1 }
 0x1b8   : > { %v3539_v13 = vpop.f32.mrb[8].mxu1 }
 0x1b9   : > { %v1159_v14 = vpop.f32.mrb[9].mxu1 }
 0x1ba   : > { %v3540_v16 = vpop.f32.mrb[10].mxu1 }
 0x1bb   : > { %v1162_v29 = vpop.f32.mrb[11].mxu1 }
 0x1c0   : > { %v4597_v30 = vpop.f32.mrb[12].mxu1 }
 0x1c1   : > { %v4599_v34 = vpop.f32.mrb[13].mxu1 }
 0x1c2   : > { %v4601_v45 = vpop.f32.mrb[14].mxu1 }
 0x1c3   : > { %v4603_v46 = vpop.f32.mrb[15].mxu1 }
 0x1c9   : > { %v3701_v52 = vpop.f32.mrb[0].mxu0 }
 0x1ca   : > { %v3733_v5 = vadd.f32 %v3701_v52, %v3531_v49  ;;  %v2598_v6 = vpop.f32.mrb[1].mxu0 }
 0x1cb   : > { %v3734_v7 = vadd.f32 %v2598_v6, %v1127_v50  ;;  %v3702_v8 = vpop.f32.mrb[2].mxu0 }
 0x1cc   : > { %v2766_v24 = vadd.f32 %v3733_v5, %v4608_v54  ;;  %v3735_v25 = vadd.f32 %v3702_v8, %v3532_v51  ;;  %v2601_v28 = vpop.f32.mrb[3].mxu0 }
 0x1cd   : > { %v2764_v31 = vadd.f32 %v3734_v7, %v4608_v54  ;;  %v3736_v43 = vadd.f32 %v2601_v28, %v1130_v62 }
 0x1ce   : > { %v2798_v44 = vmax.f32 %v2766_v24, 0.0  ;;  %v2767_v47 = vadd.f32 %v3735_v25, %v4608_v54 }
 0x1cf   : > { %v2796_v59 = vmax.f32 %v2764_v31, 0.0  ;;  %v2765_v60 = vadd.f32 %v3736_v43, %v4608_v54 }
 0x1d0   : > { %2831 = vst.msk [vmem:[%s4615_s16 + $0x10] sm:$0xff] %vm2828_vm2, %v2798_v44  ;;  %v2799_v4 = vmax.f32 %v2767_v47, 0.0 }
 0x1d1   : > { %2829 = vst.msk [vmem:[%s4615_s16] sm:$0xff] %vm2828_vm2, %v2796_v59  ;;  %v2797_v11 = vmax.f32 %v2765_v60, 0.0  ;;  %v3705_v17 = vpop.f32.mrb[4].mxu0 }
 0x1d2   : > { %2832 = vst.msk [vmem:[%s4615_s16 + $0x18] sm:$0xff] %vm2828_vm2, %v2799_v4  ;;  %v3737_v18 = vadd.f32 %v3705_v17, %v3535_v63  ;;  %v2614_v20 = vpop.f32.mrb[5].mxu0 }
 0x1d3   : > { %2830 = vst.msk [vmem:[%s4615_s16 + $0x8] sm:$0xff] %vm2828_vm2, %v2797_v11  ;;  %v3738_v22 = vadd.f32 %v2614_v20, %v1143_v0  ;;  %v3706_v23 = vpop.f32.mrb[6].mxu0 }
 0x1d4   : > { %v2770_v35 = vadd.f32 %v3737_v18, %v4608_v54  ;;  %v3739_v36 = vadd.f32 %v3706_v23, %v3536_v2  ;;  %v2617_v37 = vpop.f32.mrb[7].mxu0 }
 0x1d5   : > { %v2768_v40 = vadd.f32 %v3738_v22, %v4608_v54  ;;  %v3740_v41 = vadd.f32 %v2617_v37, %v1146_v12 }
 0x1d6   : > { %v2802_v42 = vmax.f32 %v2770_v35, 0.0  ;;  %v2771_v56 = vadd.f32 %v3739_v36, %v4608_v54 }
 0x1d7   : > { %v2800_v57 = vmax.f32 %v2768_v40, 0.0  ;;  %v2769_v21 = vadd.f32 %v3740_v41, %v4608_v54 }
 0x1d8   : > { %2835 = vst.msk [vmem:[%s4615_s16 + $0x30] sm:$0xff] %vm2828_vm2, %v2802_v42  ;;  %v2803_v58 = vmax.f32 %v2771_v56, 0.0 }
 0x1d9   : > { %2833 = vst.msk [vmem:[%s4615_s16 + $0x20] sm:$0xff] %vm2828_vm2, %v2800_v57  ;;  %v2801_v39 = vmax.f32 %v2769_v21, 0.0  ;;  %v3709_v55 = vpop.f32.mrb[8].mxu0 }
 0x1da   : > { %2836 = vst.msk [vmem:[%s4615_s16 + $0x38] sm:$0xff] %vm2828_vm2, %v2803_v58  ;;  %v3741_v61 = vadd.f32 %v3709_v55, %v3539_v13  ;;  %v2630_v1 = vpop.f32.mrb[9].mxu0 }
 0x1db   : > { %2834 = vst.msk [vmem:[%s4615_s16 + $0x28] sm:$0xff] %vm2828_vm2, %v2801_v39  ;;  %v3742_v9 = vadd.f32 %v2630_v1, %v1159_v14  ;;  %v3710_v10 = vpop.f32.mrb[10].mxu0 }
 0x1dc   : > { %v2774_v53 = vadd.f32 %v3741_v61, %v4608_v54  ;;  %v3743_v3 = vadd.f32 %v3710_v10, %v3540_v16  ;;  %v2633_v15 = vpop.f32.mrb[11].mxu0 }
 0x1dd   : > { %v2772_v19 = vadd.f32 %v3742_v9, %v4608_v54  ;;  %v3744_v26 = vadd.f32 %v2633_v15, %v1162_v29 }
 0x1de   : > { %v2806_v27 = vmax.f32 %v2774_v53, 0.0  ;;  %v2775_v32 = vadd.f32 %v3743_v3, %v4608_v54 }
 0x1df   : > { %v2804_v33 = vmax.f32 %v2772_v19, 0.0  ;;  %v2773_v38 = vadd.f32 %v3744_v26, %v4608_v54 }
 0x1e0   : > { %2839 = vst.msk [vmem:[%s4615_s16 + $0x50] sm:$0xff] %vm2828_vm2, %v2806_v27  ;;  %v2807_v48 = vmax.f32 %v2775_v32, 0.0 }
 0x1e1   : > { %2837 = vst.msk [vmem:[%s4615_s16 + $0x40] sm:$0xff] %vm2828_vm2, %v2804_v33  ;;  %v2805_v49 = vmax.f32 %v2773_v38, 0.0  ;;  %v3713_v50 = vpop.f32.mrb[12].mxu0 }
 0x1e2   : > { %2840 = vst.msk [vmem:[%s4615_s16 + $0x58] sm:$0xff] %vm2828_vm2, %v2807_v48  ;;  %v3745_v51 = vadd.f32 %v3713_v50, %v4597_v30  ;;  %v2646_v62 = vpop.f32.mrb[13].mxu0 }
 0x1e3   : > { %2838 = vst.msk [vmem:[%s4615_s16 + $0x48] sm:$0xff] %vm2828_vm2, %v2805_v49  ;;  %v3746_v63 = vadd.f32 %v2646_v62, %v4599_v34  ;;  %v3714_v0 = vpop.f32.mrb[14].mxu0 }
 0x1e4   : > { %v2778_v2 = vadd.f32 %v3745_v51, %v4608_v54  ;;  %v3747_v12 = vadd.f32 %v3714_v0, %v4601_v45  ;;  %v2649_v13 = vpop.f32.mrb[15].mxu0 }
 0x1e5   : > { %v2776_v14 = vadd.f32 %v3746_v63, %v4608_v54  ;;  %v3748_v16 = vadd.f32 %v2649_v13, %v4603_v46 }
 0x1e6   : > { %v2810_v29 = vmax.f32 %v2778_v2, 0.0  ;;  %v2779_v30 = vadd.f32 %v3747_v12, %v4608_v54 }
 0x1e7   : > { %v2808_v52 = vmax.f32 %v2776_v14, 0.0  ;;  %v2777_v5 = vadd.f32 %v3748_v16, %v4608_v54 }
 0x1e8   : > { %2843 = vst.msk [vmem:[%s4615_s16 + $0x70] sm:$0xff] %vm2828_vm2, %v2810_v29  ;;  %v2811_v34 = vmax.f32 %v2779_v30, 0.0  ;;  %v3581_v6 = vpop.f32.mrb[16].mxu1 }
 0x1e9   : > { %2841 = vst.msk [vmem:[%s4615_s16 + $0x60] sm:$0xff] %vm2828_vm2, %v2808_v52  ;;  %v2809_v7 = vmax.f32 %v2777_v5, 0.0  ;;  %v3717_v45 = vpop.f32.mrb[16].mxu0  ;;  %v1485_v8 = vpop.f32.mrb[17].mxu1 }
 0x1ea   : > { %2844 = vst.msk [vmem:[%s4615_s16 + $0x78] sm:$0xff] %vm2828_vm2, %v2811_v34  ;;  %v3749_v24 = vadd.f32 %v3717_v45, %v3581_v6  ;;  %v2662_v46 = vpop.f32.mrb[17].mxu0  ;;  %v3582_v25 = vpop.f32.mrb[18].mxu1 }
 0x1eb   : > { %2842 = vst.msk [vmem:[%s4615_s16 + $0x68] sm:$0xff] %vm2828_vm2, %v2809_v7  ;;  %v3750_v28 = vadd.f32 %v2662_v46, %v1485_v8  ;;  %v3718_v31 = vpop.f32.mrb[18].mxu0  ;;  %v1488_v43 = vpop.f32.mrb[19].mxu1 }
 0x1ec   : > { %v2782_v44 = vadd.f32 %v3749_v24, %v4608_v54  ;;  %v3751_v47 = vadd.f32 %v3718_v31, %v3582_v25  ;;  %v2665_v59 = vpop.f32.mrb[19].mxu0 }
 0x1ed   : > { %v2780_v60 = vadd.f32 %v3750_v28, %v4608_v54  ;;  %v3752_v4 = vadd.f32 %v2665_v59, %v1488_v43 }
 0x1ee   : > { %v2814_v11 = vmax.f32 %v2782_v44, 0.0  ;;  %v2783_v17 = vadd.f32 %v3751_v47, %v4608_v54 }
 0x1ef   : > { %v2812_v18 = vmax.f32 %v2780_v60, 0.0  ;;  %v2781_v20 = vadd.f32 %v3752_v4, %v4608_v54 }
 0x1f0   : > { %2847 = vst.msk [vmem:[%s4615_s16 + $0x90] sm:$0xff] %vm2828_vm2, %v2814_v11  ;;  %v2815_v22 = vmax.f32 %v2783_v17, 0.0  ;;  %v3585_v23 = vpop.f32.mrb[20].mxu1 }
 0x1f1   : > { %2845 = vst.msk [vmem:[%s4615_s16 + $0x80] sm:$0xff] %vm2828_vm2, %v2812_v18  ;;  %v2813_v35 = vmax.f32 %v2781_v20, 0.0  ;;  %v3721_v36 = vpop.f32.mrb[20].mxu0  ;;  %v1501_v37 = vpop.f32.mrb[21].mxu1 }
 0x1f2   : > { %2848 = vst.msk [vmem:[%s4615_s16 + $0x98] sm:$0xff] %vm2828_vm2, %v2815_v22  ;;  %v3753_v40 = vadd.f32 %v3721_v36, %v3585_v23  ;;  %v2678_v41 = vpop.f32.mrb[21].mxu0  ;;  %v3586_v42 = vpop.f32.mrb[22].mxu1 }
 0x1f3   : > { %2846 = vst.msk [vmem:[%s4615_s16 + $0x88] sm:$0xff] %vm2828_vm2, %v2813_v35  ;;  %v3754_v56 = vadd.f32 %v2678_v41, %v1501_v37  ;;  %v3722_v57 = vpop.f32.mrb[22].mxu0  ;;  %v1504_v21 = vpop.f32.mrb[23].mxu1 }
 0x1f4   : > { %v2786_v58 = vadd.f32 %v3753_v40, %v4608_v54  ;;  %v3755_v39 = vadd.f32 %v3722_v57, %v3586_v42  ;;  %v2681_v55 = vpop.f32.mrb[23].mxu0 }
 0x1f5   : > { %v2784_v61 = vadd.f32 %v3754_v56, %v4608_v54  ;;  %v3756_v1 = vadd.f32 %v2681_v55, %v1504_v21 }
 0x1f6   : > { %v2818_v9 = vmax.f32 %v2786_v58, 0.0  ;;  %v2787_v10 = vadd.f32 %v3755_v39, %v4608_v54 }
 0x1f7   : > { %v2816_v53 = vmax.f32 %v2784_v61, 0.0  ;;  %v2785_v3 = vadd.f32 %v3756_v1, %v4608_v54 }
 0x1f8   : > { %2851 = vst.msk [vmem:[%s4615_s16 + $0xb0] sm:$0xff] %vm2828_vm2, %v2818_v9  ;;  %v2819_v15 = vmax.f32 %v2787_v10, 0.0  ;;  %v3589_v19 = vpop.f32.mrb[24].mxu1 }
 0x1f9   : > { %2849 = vst.msk [vmem:[%s4615_s16 + $0xa0] sm:$0xff] %vm2828_vm2, %v2816_v53  ;;  %v2817_v26 = vmax.f32 %v2785_v3, 0.0  ;;  %v3725_v27 = vpop.f32.mrb[24].mxu0  ;;  %v1517_v32 = vpop.f32.mrb[25].mxu1 }
 0x1fa   : > { %2852 = vst.msk [vmem:[%s4615_s16 + $0xb8] sm:$0xff] %vm2828_vm2, %v2819_v15  ;;  %v3757_v33 = vadd.f32 %v3725_v27, %v3589_v19  ;;  %v2694_v38 = vpop.f32.mrb[25].mxu0  ;;  %v3590_v48 = vpop.f32.mrb[26].mxu1 }
 0x1fb   : > { %2850 = vst.msk [vmem:[%s4615_s16 + $0xa8] sm:$0xff] %vm2828_vm2, %v2817_v26  ;;  %v3758_v49 = vadd.f32 %v2694_v38, %v1517_v32  ;;  %v3726_v50 = vpop.f32.mrb[26].mxu0  ;;  %v1520_v51 = vpop.f32.mrb[27].mxu1 }
 0x1fc   : > { %v2790_v62 = vadd.f32 %v3757_v33, %v4608_v54  ;;  %v3759_v63 = vadd.f32 %v3726_v50, %v3590_v48  ;;  %v2697_v0 = vpop.f32.mrb[27].mxu0 }
 0x1fd   : > { %v2788_v2 = vadd.f32 %v3758_v49, %v4608_v54  ;;  %v3760_v12 = vadd.f32 %v2697_v0, %v1520_v51 }
 0x1fe   : > { %v2822_v13 = vmax.f32 %v2790_v62, 0.0  ;;  %v2791_v14 = vadd.f32 %v3759_v63, %v4608_v54 }
 0x1ff   : > { %v2820_v16 = vmax.f32 %v2788_v2, 0.0  ;;  %v2789_v29 = vadd.f32 %v3760_v12, %v4608_v54 }
 0x200   : > { %2855 = vst.msk [vmem:[%s4615_s16 + $0xd0] sm:$0xff] %vm2828_vm2, %v2822_v13  ;;  %v2823_v30 = vmax.f32 %v2791_v14, 0.0  ;;  %v3593_v52 = vpop.f32.mrb[28].mxu1 }
 0x201   : > { %2853 = vst.msk [vmem:[%s4615_s16 + $0xc0] sm:$0xff] %vm2828_vm2, %v2820_v16  ;;  %v2821_v5 = vmax.f32 %v2789_v29, 0.0  ;;  %v3729_v34 = vpop.f32.mrb[28].mxu0  ;;  %v1533_v6 = vpop.f32.mrb[29].mxu1 }
 0x202   : > { %2856 = vst.msk [vmem:[%s4615_s16 + $0xd8] sm:$0xff] %vm2828_vm2, %v2823_v30  ;;  %v3761_v7 = vadd.f32 %v3729_v34, %v3593_v52  ;;  %v2710_v45 = vpop.f32.mrb[29].mxu0  ;;  %v3594_v8 = vpop.f32.mrb[30].mxu1 }
 0x203   : > { %2854 = vst.msk [vmem:[%s4615_s16 + $0xc8] sm:$0xff] %vm2828_vm2, %v2821_v5  ;;  %v3762_v24 = vadd.f32 %v2710_v45, %v1533_v6  ;;  %v3730_v46 = vpop.f32.mrb[30].mxu0  ;;  %v1536_v25 = vpop.f32.mrb[31].mxu1 }
 0x204   : > { %v2794_v28 = vadd.f32 %v3761_v7, %v4608_v54  ;;  %v3763_v31 = vadd.f32 %v3730_v46, %v3594_v8  ;;  %v2713_v43 = vpop.f32.mrb[31].mxu0 }
 0x205   : > { %v2792_v44 = vadd.f32 %v3762_v24, %v4608_v54  ;;  %v3764_v47 = vadd.f32 %v2713_v43, %v1536_v25 }
 0x206   : > { %v2826_v59 = vmax.f32 %v2794_v28, 0.0  ;;  %v2795_v60 = vadd.f32 %v3763_v31, %v4608_v54 }
 0x207   : > { %v2824_v4 = vmax.f32 %v2792_v44, 0.0  ;;  %v2793_v11 = vadd.f32 %v3764_v47, %v4608_v54 }
 0x208   : > { %2859 = vst.msk [vmem:[%s4615_s16 + $0xf0] sm:$0xff] %vm2828_vm2, %v2826_v59  ;;  %v2827_v17 = vmax.f32 %v2795_v60, 0.0 }
 0x209   : > { %2857 = vst.msk [vmem:[%s4615_s16 + $0xe0] sm:$0xff] %vm2828_vm2, %v2824_v4  ;;  %v2825_v18 = vmax.f32 %v2793_v11, 0.0 }
 0x20a   : > { %2860 = vst.msk [vmem:[%s4615_s16 + $0xf8] sm:$0xff] %vm2828_vm2, %v2827_v17 }
 0x20b   : > { %2858 = vst.msk [vmem:[%s4615_s16 + $0xe8] sm:$0xff] %vm2828_vm2, %v2825_v18 }
 0x20c PF: > { %s13_s12 = sadd.s32 1, %s4014_s12  }
 0x20d   : > { %p10_p4 = scmp.ge.s32.totalorder %s13_s12, 4  }
 0x20f   :  { %12 = sbr.rel (!%p10_p4) target bundleno = 1 (0x1), region = 72 }

// kernel: module_e_forward.11
= control target key start
LH: loop header
LB: loop body
LE: loop exit
PB: predicated region body
PF: predicated region fallthrough
CT: control target
= control target key end

     0   :  { %s1568_s12 = smov 0   ;;  %s1866_s0 = inlined_call_operand.vmem [shape: f32[2,18,18,8], index: 0, kind: input, shape index: {}]   ;;  %s1867_s1 = inlined_call_operand.vmem [shape: bf16[3,8,8], index: 1, kind: input, shape index: {}]   ;;  %s1868_s2 = inlined_call_operand.vmem [shape: f32[1,8], index: 2, kind: input, shape index: {}]   ;;  %s1869_s3 = inlined_call_operand.vmem [shape: f32[2,256,8], index: 3, kind: output, shape index: {}]  }
   0x1 LB: > { %s1150_s13 = sadd.s32 4294967295, %s1546_s12   ;;  %p1154_p0 = scmp.ge.s32.totalorder %s1546_s12, 1  ;;  %s1546_s12 = sphi %s1568_s12, %s13_s12  }
   0x2   : > { %p137_p1 = scmp.lt.s32.totalorder %s1546_s12, 3 }
   0x4   : > { %p138_p2 = pnand %p1154_p0, %p137_p1 }
   0x5   : > { %v1222_v0 = vld [vmem:[%s1867_s1 + $0x4] sm:$0xf] (!%p138_p2)  ;;  %vm321_vm0 = vcmask (!%p138_p2), 1043456   ;;  %v221_v1 = vld [vmem:[%s1867_s1] sm:$0xf] (!%p138_p2)  ;;  %p161_p3 = scmp.lt.s32.totalorder (!%p138_p2), %s1150_s13, 1 }
   0x6   : > { %141 = sbr.rel (%p138_p2) target bundleno = 333 (0x14d), region = 32  ;;  %1527 = vmatprep.subr.msk.bf16.mxu1 (!%p138_p2), %vm321_vm0, %v1222_v0  ;;  %1528 = vmatprep.subr.msk.bf16.mxu0 (!%p138_p2), %vm321_vm0, %v221_v1  ;;  %v323_v2 = vsel (!%p138_p2), %vm321_vm0, %v1222_v0, 0  ;;  %v535_v3 = vsel (!%p138_p2), %vm321_vm0, %v221_v1, 0  ;;  %v1287_v4 = vld [vmem:[%s1867_s1 + $0x8] sm:$0xf] (!%p138_p2)  ;;  %vm272_vm1 = vcmask (!%p138_p2), 64512  }
   0x7   : > { %1360 = vmatpush3.bf16.msra.mxu1 (!%p138_p2), %v323_v2  ;;  %1394 = vmatpush3.bf16.msra.mxu0 (!%p138_p2), %v535_v3  ;;  %v797_v18 = vsel (!%p138_p2), %vm321_vm0, %v1287_v4, 0 }
   0x8   : > { %1529 = vmatprep.subr.msk.bf16.mxu1 (!%p138_p2), %vm321_vm0, %v221_v1  ;;  %1530 = vmatprep.subr.msk.bf16.mxu0 (!%p138_p2), %vm321_vm0, %v1287_v4 }
   0xd   : > { %s1871_s13 = smov (!%p161_p3, %s1150_s13), 1 }
   0xe   : > { %s1531_s20 = smul.u32 432, %s1871_s13  ;;  %s1307_s26 = sshll.u32 %s1871_s13, 8 }
   0xf   : > { %s1762_s29 = scalar_lea.vmem %s1869_s3, %s1307_s26 }
  0x10   : > { %s1597_s23 = scalar_lea.vmem %s1866_s0, %s1531_s20 }
  0x11   : > { %v1190_v5 = vld [vmem:[%s1597_s23 + $0x19] sm:$0xff]  ;;  %v1191_v6 = vld [vmem:[%s1597_s23 + $0x21] sm:$0xff]  ;;  %v1192_v10 = vld [vmem:[%s1597_s23 + $0x31] sm:$0xff] }
  0x12   : > { %v1158_v7 = vld [vmem:[%s1597_s23 + $0x18] sm:$0xff]  ;;  %v254_v8 = vpack.c.bf16 %v1191_v6, %v1190_v5  ;;  %v1159_v9 = vld [vmem:[%s1597_s23 + $0x20] sm:$0xff]  ;;  %v1160_v14 = vld [vmem:[%s1597_s23 + $0x30] sm:$0xff] }
  0x13   : > { %v1193_v11 = vld [vmem:[%s1597_s23 + $0x39] sm:$0xff]  ;;  %v205_v12 = vpack.c.bf16 %v1159_v9, %v1158_v7  ;;  %v1194_v16 = vld [vmem:[%s1597_s23 + $0x49] sm:$0xff]  ;;  %v1195_v19 = vld [vmem:[%s1597_s23 + $0x51] sm:$0xff] }
  0x14   : > { %v255_v13 = vpack.c.bf16 %v1193_v11, %v1192_v10  ;;  %v1161_v15 = vld [vmem:[%s1597_s23 + $0x38] sm:$0xff]  ;;  %1361 = vmatprep.mubr.msk.bf16.mxu1 %vm272_vm1, %v254_v8  ;;  %v1162_v20 = vld [vmem:[%s1597_s23 + $0x48] sm:$0xff]  ;;  %v1163_v21 = vld [vmem:[%s1597_s23 + $0x50] sm:$0xff]  ;;  %v256_v22 = vpack.c.bf16 %v1195_v19, %v1194_v16 }
  0x15   : > { %v206_v17 = vpack.c.bf16 %v1161_v15, %v1160_v14  ;;  %1395 = vmatprep.mubr.msk.bf16.mxu0 %vm272_vm1, %v205_v12  ;;  %v207_v23 = vpack.c.bf16 %v1163_v21, %v1162_v20  ;;  %v1196_v24 = vld [vmem:[%s1597_s23 + $0x61] sm:$0xff]  ;;  %v1197_v25 = vld [vmem:[%s1597_s23 + $0x69] sm:$0xff]  ;;  %v1198_v28 = vld [vmem:[%s1597_s23 + $0x79] sm:$0xff] }
  0x16   : > { %1362 = vmatmul.mubr.msk.bf16.vlgmr.msra.gmra.mrb[0].mxu1 %vm272_vm1, %v255_v13  ;;  %v1164_v26 = vld [vmem:[%s1597_s23 + $0x60] sm:$0xff]  ;;  %v1165_v27 = vld [vmem:[%s1597_s23 + $0x68] sm:$0xff]  ;;  %v1166_v30 = vld [vmem:[%s1597_s23 + $0x78] sm:$0xff]  ;;  %v257_v32 = vpack.c.bf16 %v1197_v25, %v1196_v24 }
  0x17   : > { %1462 = vmatpush3.bf16.msra.mxu1 %v535_v3  ;;  %1396 = vmatmul.mubr.msk.bf16.vlgmr.msra.gmra.mrb[0].mxu0 %vm272_vm1, %v206_v17  ;;  %v1199_v29 = vld [vmem:[%s1597_s23 + $0x81] sm:$0xff]  ;;  %v208_v33 = vpack.c.bf16 %v1165_v27, %v1164_v26  ;;  %v1200_v36 = vld [vmem:[%s1597_s23 + $0x91] sm:$0xff]  ;;  %v1201_v37 = vld [vmem:[%s1597_s23 + $0x99] sm:$0xff] }
  0x18   : > { %1428 = vmatpush3.bf16.msra.mxu0 %v797_v18  ;;  %1365 = vmatprep.mubr.msk.bf16.mxu1 %vm272_vm1, %v256_v22  ;;  %v1167_v31 = vld [vmem:[%s1597_s23 + $0x80] sm:$0xff]  ;;  %v258_v34 = vpack.c.bf16 %v1199_v29, %v1198_v28  ;;  %v1168_v38 = vld [vmem:[%s1597_s23 + $0x90] sm:$0xff]  ;;  %v1169_v39 = vld [vmem:[%s1597_s23 + $0x98] sm:$0xff]  ;;  %v259_v44 = vpack.c.bf16 %v1201_v37, %v1200_v36 }
  0x19   : > { %1399 = vmatprep.mubr.msk.bf16.mxu0 %vm272_vm1, %v207_v23  ;;  %v209_v35 = vpack.c.bf16 %v1167_v31, %v1166_v30  ;;  %v1202_v40 = vld [vmem:[%s1597_s23 + $0xa9] sm:$0xff]  ;;  %v1203_v41 = vld [vmem:[%s1597_s23 + $0xb1] sm:$0xff]  ;;  %v210_v45 = vpack.c.bf16 %v1169_v39, %v1168_v38  ;;  %v1204_v48 = vld [vmem:[%s1597_s23 + $0xc1] sm:$0xff] }
  0x1a   : > { %v1170_v42 = vld [vmem:[%s1597_s23 + $0xa8] sm:$0xff]  ;;  %v1171_v43 = vld [vmem:[%s1597_s23 + $0xb0] sm:$0xff]  ;;  %v260_v46 = vpack.c.bf16 %v1203_v41, %v1202_v40  ;;  %v1172_v50 = vld [vmem:[%s1597_s23 + $0xc0] sm:$0xff] }
  0x1b   : > { %v211_v47 = vpack.c.bf16 %v1171_v43, %v1170_v42  ;;  %v1205_v49 = vld [vmem:[%s1597_s23 + $0xc9] sm:$0xff]  ;;  %v1206_v52 = vld [vmem:[%s1597_s23 + $0xd9] sm:$0xff]  ;;  %v1207_v53 = vld [vmem:[%s1597_s23 + $0xe1] sm:$0xff] }
  0x1c   : > { %v1173_v51 = vld [vmem:[%s1597_s23 + $0xc8] sm:$0xff]  ;;  %v1255_v54 = vld [vmem:[%s1597_s23 + $0x1a] sm:$0xff]  ;;  %v261_v56 = vpack.c.bf16 %v1205_v49, %v1204_v48  ;;  %v262_v58 = vpack.c.bf16 %v1207_v53, %v1206_v52  ;;  %v1208_v60 = vld [vmem:[%s1597_s23 + $0xf1] sm:$0xff] }
  0x1d   : > { %v1256_v55 = vld [vmem:[%s1597_s23 + $0x22] sm:$0xff]  ;;  %v212_v57 = vpack.c.bf16 %v1173_v51, %v1172_v50  ;;  %v1209_v61 = vld [vmem:[%s1597_s23 + $0xf9] sm:$0xff]  ;;  %v1211_v1 = vld [vmem:[%s1597_s23 + $0x111] sm:$0xff] }
  0x1e   : > { %1366 = vmatmul.mubr.msk.bf16.gmra.mrb[4].mxu1 %vm272_vm1, %v257_v32  ;;  %v730_v59 = vpack.c.bf16 %v1256_v55, %v1255_v54  ;;  %v1257_v62 = vld [vmem:[%s1597_s23 + $0x32] sm:$0xff]  ;;  %v1258_v63 = vld [vmem:[%s1597_s23 + $0x3a] sm:$0xff]  ;;  %v1210_v0 = vld [vmem:[%s1597_s23 + $0x109] sm:$0xff]  ;;  %v263_v4 = vpack.c.bf16 %v1209_v61, %v1208_v60 }
  0x1f   : > { %1400 = vmatmul.mubr.msk.bf16.gmra.mrb[4].mxu0 %vm272_vm1, %v208_v33  ;;  %1369 = vmatprep.mubr.msk.bf16.mxu1 %vm272_vm1, %v258_v34  ;;  %v1259_v2 = vld [vmem:[%s1597_s23 + $0x4a] sm:$0xff]  ;;  %v1260_v3 = vld [vmem:[%s1597_s23 + $0x52] sm:$0xff]  ;;  %v731_v5 = vpack.c.bf16 %v1258_v63, %v1257_v62  ;;  %v264_v6 = vpack.c.bf16 %v1211_v1, %v1210_v0  ;;  %v1212_v8 = vld [vmem:[%s1597_s23 + $0x121] sm:$0xff] }
  0x20   : > { %1403 = vmatprep.mubr.msk.bf16.mxu0 %vm272_vm1, %v209_v35  ;;  %v732_v7 = vpack.c.bf16 %v1260_v3, %v1259_v2  ;;  %v1213_v9 = vld [vmem:[%s1597_s23 + $0x129] sm:$0xff]  ;;  %v1214_v12 = vld [vmem:[%s1597_s23 + $0x139] sm:$0xff]  ;;  %v1215_v13 = vld [vmem:[%s1597_s23 + $0x141] sm:$0xff] }
  0x21   : > { %v1261_v10 = vld [vmem:[%s1597_s23 + $0x62] sm:$0xff]  ;;  %v1262_v11 = vld [vmem:[%s1597_s23 + $0x6a] sm:$0xff]  ;;  %v1263_v14 = vld [vmem:[%s1597_s23 + $0x7a] sm:$0xff]  ;;  %v265_v16 = vpack.c.bf16 %v1213_v9, %v1212_v8  ;;  %v266_v18 = vpack.c.bf16 %v1215_v13, %v1214_v12 }
  0x22   : > { %v1264_v15 = vld [vmem:[%s1597_s23 + $0x82] sm:$0xff]  ;;  %v733_v17 = vpack.c.bf16 %v1262_v11, %v1261_v10  ;;  %v1216_v20 = vld [vmem:[%s1597_s23 + $0x151] sm:$0xff]  ;;  %v1217_v21 = vld [vmem:[%s1597_s23 + $0x159] sm:$0xff] }
  0x23   : > { %v734_v19 = vpack.c.bf16 %v1264_v15, %v1263_v14  ;;  %v1265_v22 = vld [vmem:[%s1597_s23 + $0x92] sm:$0xff]  ;;  %v1266_v23 = vld [vmem:[%s1597_s23 + $0x9a] sm:$0xff]  ;;  %v1218_v24 = vld [vmem:[%s1597_s23 + $0x169] sm:$0xff]  ;;  %v267_v28 = vpack.c.bf16 %v1217_v21, %v1216_v20 }
  0x24   : > { %v1219_v25 = vld [vmem:[%s1597_s23 + $0x171] sm:$0xff]  ;;  %v735_v29 = vpack.c.bf16 %v1266_v23, %v1265_v22  ;;  %v1220_v32 = vld [vmem:[%s1597_s23 + $0x181] sm:$0xff]  ;;  %v1221_v33 = vld [vmem:[%s1597_s23 + $0x189] sm:$0xff] }
  0x25   : > { %v1267_v26 = vld [vmem:[%s1597_s23 + $0xaa] sm:$0xff]  ;;  %v1268_v27 = vld [vmem:[%s1597_s23 + $0xb2] sm:$0xff]  ;;  %v268_v30 = vpack.c.bf16 %v1219_v25, %v1218_v24  ;;  %v1269_v34 = vld [vmem:[%s1597_s23 + $0xc2] sm:$0xff]  ;;  %v269_v40 = vpack.c.bf16 %v1221_v33, %v1220_v32 }
  0x26   : > { %1370 = vmatmul.mubr.msk.bf16.gmra.mrb[8].mxu1 %vm272_vm1, %v259_v44  ;;  %v736_v31 = vpack.c.bf16 %v1268_v27, %v1267_v26  ;;  %v1270_v35 = vld [vmem:[%s1597_s23 + $0xca] sm:$0xff]  ;;  %v1174_v36 = vld [vmem:[%s1597_s23 + $0xd8] sm:$0xff]  ;;  %v1175_v37 = vld [vmem:[%s1597_s23 + $0xe0] sm:$0xff] }
  0x27   : > { %1404 = vmatmul.mubr.msk.bf16.gmra.mrb[8].mxu0 %vm272_vm1, %v210_v45  ;;  %1373 = vmatprep.mubr.msk.bf16.mxu1 %vm272_vm1, %v260_v46  ;;  %v1271_v38 = vld [vmem:[%s1597_s23 + $0xda] sm:$0xff]  ;;  %v1272_v39 = vld [vmem:[%s1597_s23 + $0xe2] sm:$0xff]  ;;  %v737_v41 = vpack.c.bf16 %v1270_v35, %v1269_v34  ;;  %v213_v42 = vpack.c.bf16 %v1175_v37, %v1174_v36  ;;  %v1176_v44 = vld [vmem:[%s1597_s23 + $0xf0] sm:$0xff] }
  0x28   : > { %1407 = vmatprep.mubr.msk.bf16.mxu0 %vm272_vm1, %v211_v47  ;;  %v738_v43 = vpack.c.bf16 %v1272_v39, %v1271_v38  ;;  %v1177_v45 = vld [vmem:[%s1597_s23 + $0xf8] sm:$0xff]  ;;  %v1178_v48 = vld [vmem:[%s1597_s23 + $0x108] sm:$0xff]  ;;  %v1179_v49 = vld [vmem:[%s1597_s23 + $0x110] sm:$0xff] }
  0x29   : > { %v1273_v46 = vld [vmem:[%s1597_s23 + $0xf2] sm:$0xff]  ;;  %v1274_v47 = vld [vmem:[%s1597_s23 + $0xfa] sm:$0xff]  ;;  %v1275_v50 = vld [vmem:[%s1597_s23 + $0x10a] sm:$0xff]  ;;  %v214_v52 = vpack.c.bf16 %v1177_v45, %v1176_v44  ;;  %v215_v54 = vpack.c.bf16 %v1179_v49, %v1178_v48 }
  0x2a   : > { %v1276_v51 = vld [vmem:[%s1597_s23 + $0x112] sm:$0xff]  ;;  %v739_v53 = vpack.c.bf16 %v1274_v47, %v1273_v46  ;;  %v1183_v61 = vld [vmem:[%s1597_s23 + $0x140] sm:$0xff]  ;;  %v1186_v8 = vld [vmem:[%s1597_s23 + $0x168] sm:$0xff] }
  0x2b   : > { %v740_v55 = vpack.c.bf16 %v1276_v51, %v1275_v50  ;;  %v1182_v60 = vld [vmem:[%s1597_s23 + $0x138] sm:$0xff]  ;;  %v1280_v63 = vld [vmem:[%s1597_s23 + $0x142] sm:$0xff]  ;;  %v1187_v9 = vld [vmem:[%s1597_s23 + $0x170] sm:$0xff] }
  0x2c   : > { %v1279_v62 = vld [vmem:[%s1597_s23 + $0x13a] sm:$0xff]  ;;  %v217_v2 = vpack.c.bf16 %v1183_v61, %v1182_v60  ;;  %v1283_v10 = vld [vmem:[%s1597_s23 + $0x16a] sm:$0xff]  ;;  %v1284_v11 = vld [vmem:[%s1597_s23 + $0x172] sm:$0xff]  ;;  %v219_v14 = vpack.c.bf16 %v1187_v9, %v1186_v8 }
  0x2d   : > { %v742_v3 = vpack.c.bf16 %v1280_v63, %v1279_v62  ;;  %v744_v15 = vpack.c.bf16 %v1284_v11, %v1283_v10  ;;  %v1755_v39 = vld [vmem:[%s1868_s2] ss:$0 sm:$0xff] }
  0x2e   : > { %1374 = vmatmul.mubr.msk.bf16.gmra.mrb[12].mxu1 %vm272_vm1, %v261_v56  ;;  %v1180_v56 = vld [vmem:[%s1597_s23 + $0x120] sm:$0xff] }
  0x2f   : > { %1408 = vmatmul.mubr.msk.bf16.gmra.mrb[12].mxu0 %vm272_vm1, %v212_v57  ;;  %1377 = vmatprep.mubr.msk.bf16.mxu1 %vm272_vm1, %v262_v58  ;;  %v1181_v57 = vld [vmem:[%s1597_s23 + $0x128] sm:$0xff] }
  0x30   : > { %1429 = vmatprep.mubr.msk.bf16.mxu0 %vm272_vm1, %v730_v59  ;;  %v1277_v58 = vld [vmem:[%s1597_s23 + $0x122] sm:$0xff]  ;;  %v1278_v59 = vld [vmem:[%s1597_s23 + $0x12a] sm:$0xff]  ;;  %v216_v0 = vpack.c.bf16 %v1181_v57, %v1180_v56 }
  0x31   : > { %v741_v1 = vpack.c.bf16 %v1278_v59, %v1277_v58 }
  0x36   : > { %1378 = vmatmul.mubr.msk.bf16.gmra.mrb[16].mxu1 %vm272_vm1, %v263_v4  ;;  %v1184_v4 = vld [vmem:[%s1597_s23 + $0x150] sm:$0xff] }
  0x37   : > { %1430 = vmatmul.mubr.msk.bf16.vlgmr.msra.gmra.mrb[0].mxu0 %vm272_vm1, %v731_v5  ;;  %1381 = vmatprep.mubr.msk.bf16.mxu1 %vm272_vm1, %v264_v6  ;;  %v1185_v5 = vld [vmem:[%s1597_s23 + $0x158] sm:$0xff] }
  0x38   : > { %1433 = vmatprep.mubr.msk.bf16.mxu0 %vm272_vm1, %v732_v7  ;;  %v1281_v6 = vld [vmem:[%s1597_s23 + $0x152] sm:$0xff]  ;;  %v1282_v7 = vld [vmem:[%s1597_s23 + $0x15a] sm:$0xff]  ;;  %v218_v12 = vpack.c.bf16 %v1185_v5, %v1184_v4 }
  0x39   : > { %v743_v13 = vpack.c.bf16 %v1282_v7, %v1281_v6 }
  0x3e   : > { %1382 = vmatmul.mubr.msk.bf16.gmra.mrb[20].mxu1 %vm272_vm1, %v265_v16  ;;  %v1188_v16 = vld [vmem:[%s1597_s23 + $0x180] sm:$0xff] }
  0x3f   : > { %1434 = vmatmul.mubr.msk.bf16.gmra.mrb[4].mxu0 %vm272_vm1, %v733_v17  ;;  %1385 = vmatprep.mubr.msk.bf16.mxu1 %vm272_vm1, %v266_v18  ;;  %v1189_v17 = vld [vmem:[%s1597_s23 + $0x188] sm:$0xff] }
  0x40   : > { %1437 = vmatprep.mubr.msk.bf16.mxu0 %vm272_vm1, %v734_v19  ;;  %v1285_v18 = vld [vmem:[%s1597_s23 + $0x182] sm:$0xff]  ;;  %v1286_v19 = vld [vmem:[%s1597_s23 + $0x18a] sm:$0xff]  ;;  %v220_v20 = vpack.c.bf16 %v1189_v17, %v1188_v16 }
  0x41   : > { %v745_v21 = vpack.c.bf16 %v1286_v19, %v1285_v18 }
  0x46   : > { %1386 = vmatmul.mubr.msk.bf16.gmra.mrb[24].mxu1 %vm272_vm1, %v267_v28 }
  0x47   : > { %1438 = vmatmul.mubr.msk.bf16.gmra.mrb[8].mxu0 %vm272_vm1, %v735_v29  ;;  %1389 = vmatprep.mubr.msk.bf16.mxu1 %vm272_vm1, %v268_v30 }
  0x48   : > { %1441 = vmatprep.mubr.msk.bf16.mxu0 %vm272_vm1, %v736_v31 }
  0x4e   : > { %1390 = vmatmul.mubr.msk.bf16.gmra.mrb[28].mxu1 %vm272_vm1, %v269_v40 }
  0x4f   : > { %1442 = vmatmul.mubr.msk.bf16.gmra.mrb[12].mxu0 %vm272_vm1, %v737_v41  ;;  %1411 = vmatprep.mubr.msk.bf16.mxu1 %vm272_vm1, %v213_v42 }
  0x50   : > { %1445 = vmatprep.mubr.msk.bf16.mxu0 %vm272_vm1, %v738_v43 }
  0x56   : > { %1412 = vmatmul.mubr.msk.bf16.vlgmr.msra.gmra.mrb[16].mxu1 %vm272_vm1, %v214_v52 }
  0x57   : > { %1446 = vmatmul.mubr.msk.bf16.gmra.mrb[16].mxu0 %vm272_vm1, %v739_v53  ;;  %1415 = vmatprep.mubr.msk.bf16.mxu1 %vm272_vm1, %v215_v54 }
  0x58   : > { %1449 = vmatprep.mubr.msk.bf16.mxu0 %vm272_vm1, %v740_v55 }
  0x5e   : > { %1416 = vmatmul.mubr.msk.bf16.gmra.mrb[20].mxu1 %vm272_vm1, %v216_v0 }
  0x5f   : > { %1450 = vmatmul.mubr.msk.bf16.gmra.mrb[20].mxu0 %vm272_vm1, %v741_v1  ;;  %1419 = vmatprep.mubr.msk.bf16.mxu1 %vm272_vm1, %v217_v2 }
  0x60   : > { %1453 = vmatprep.mubr.msk.bf16.mxu0 %vm272_vm1, %v742_v3 }
  0x66   : > { %1420 = vmatmul.mubr.msk.bf16.gmra.mrb[24].mxu1 %vm272_vm1, %v218_v12 }
  0x67   : > { %1454 = vmatmul.mubr.msk.bf16.gmra.mrb[24].mxu0 %vm272_vm1, %v743_v13  ;;  %1423 = vmatprep.mubr.msk.bf16.mxu1 %vm272_vm1, %v219_v14 }
  0x68   : > { %1457 = vmatprep.mubr.msk.bf16.mxu0 %vm272_vm1, %v744_v15 }
  0x6e   : > { %1424 = vmatmul.mubr.msk.bf16.gmra.mrb[28].mxu1 %vm272_vm1, %v220_v20 }
  0x6f   : > { %1458 = vmatmul.mubr.msk.bf16.gmra.mrb[28].mxu0 %vm272_vm1, %v745_v21 }
  0xe9   : > { %v1363_v22 = vpop.f32.mrb[0].mxu1 }
  0xea   : > { %v359_v23 = vpop.f32.mrb[1].mxu1 }
  0xeb   : > { %v1364_v24 = vpop.f32.mrb[2].mxu1 }
  0xec   : > { %v362_v25 = vpop.f32.mrb[3].mxu1 }
  0xf1   : > { %v1367_v26 = vpop.f32.mrb[4].mxu1 }
  0xf2   : > { %v375_v27 = vpop.f32.mrb[5].mxu1 }
  0xf3   : > { %v1368_v28 = vpop.f32.mrb[6].mxu1 }
  0xf4   : > { %v378_v29 = vpop.f32.mrb[7].mxu1 }
  0xf9   : > { %v1371_v30 = vpop.f32.mrb[8].mxu1 }
  0xfa   : > { %v391_v31 = vpop.f32.mrb[9].mxu1 }
  0xfb   : > { %v1372_v32 = vpop.f32.mrb[10].mxu1 }
  0xfc   : > { %v394_v33 = vpop.f32.mrb[11].mxu1 }
 0x101   : > { %v1744_v34 = vpop.f32.mrb[12].mxu1 }
 0x102   : > { %v1746_v35 = vpop.f32.mrb[13].mxu1 }
 0x103   : > { %v1748_v36 = vpop.f32.mrb[14].mxu1 }
 0x104   : > { %v1750_v37 = vpop.f32.mrb[15].mxu1 }
 0x10a   : > { %v1431_v38 = vpop.f32.mrb[0].mxu0 }
 0x10b   : > { %v1463_v40 = vadd.f32 %v1431_v38, %v1363_v22  ;;  %v833_v41 = vpop.f32.mrb[1].mxu0 }
 0x10c   : > { %v1464_v42 = vadd.f32 %v833_v41, %v359_v23  ;;  %v1432_v43 = vpop.f32.mrb[2].mxu0 }
 0x10d   : > { %v1001_v44 = vadd.f32 %v1463_v40, %v1755_v39  ;;  %v1465_v45 = vadd.f32 %v1432_v43, %v1364_v24  ;;  %v836_v46 = vpop.f32.mrb[3].mxu0 }
 0x10e   : > { %v999_v47 = vadd.f32 %v1464_v42, %v1755_v39  ;;  %v1466_v48 = vadd.f32 %v836_v46, %v362_v25 }
 0x10f   : > { %v1033_v49 = vmax.f32 %v1001_v44, 0.0  ;;  %v1002_v50 = vadd.f32 %v1465_v45, %v1755_v39 }
 0x110   : > { %v1031_v51 = vmax.f32 %v999_v47, 0.0  ;;  %v1000_v52 = vadd.f32 %v1466_v48, %v1755_v39 }
 0x111   : > { %1065 = vst.msk [vmem:[%s1762_s29 + $0x10] sm:$0xff] %vm272_vm1, %v1033_v49  ;;  %v1034_v53 = vmax.f32 %v1002_v50, 0.0 }
 0x112   : > { %1063 = vst.msk [vmem:[%s1762_s29] sm:$0xff] %vm272_vm1, %v1031_v51  ;;  %v1032_v54 = vmax.f32 %v1000_v52, 0.0  ;;  %v1435_v55 = vpop.f32.mrb[4].mxu0 }
 0x113   : > { %1066 = vst.msk [vmem:[%s1762_s29 + $0x18] sm:$0xff] %vm272_vm1, %v1034_v53  ;;  %v1467_v56 = vadd.f32 %v1435_v55, %v1367_v26  ;;  %v849_v57 = vpop.f32.mrb[5].mxu0 }
 0x114   : > { %1064 = vst.msk [vmem:[%s1762_s29 + $0x8] sm:$0xff] %vm272_vm1, %v1032_v54  ;;  %v1468_v58 = vadd.f32 %v849_v57, %v375_v27  ;;  %v1436_v59 = vpop.f32.mrb[6].mxu0 }
 0x115   : > { %v1005_v60 = vadd.f32 %v1467_v56, %v1755_v39  ;;  %v1469_v61 = vadd.f32 %v1436_v59, %v1368_v28  ;;  %v852_v62 = vpop.f32.mrb[7].mxu0 }
 0x116   : > { %v1003_v63 = vadd.f32 %v1468_v58, %v1755_v39  ;;  %v1470_v0 = vadd.f32 %v852_v62, %v378_v29 }
 0x117   : > { %v1037_v1 = vmax.f32 %v1005_v60, 0.0  ;;  %v1006_v2 = vadd.f32 %v1469_v61, %v1755_v39 }
 0x118   : > { %v1035_v3 = vmax.f32 %v1003_v63, 0.0  ;;  %v1004_v4 = vadd.f32 %v1470_v0, %v1755_v39 }
 0x119   : > { %1069 = vst.msk [vmem:[%s1762_s29 + $0x30] sm:$0xff] %vm272_vm1, %v1037_v1  ;;  %v1038_v5 = vmax.f32 %v1006_v2, 0.0 }
 0x11a   : > { %1067 = vst.msk [vmem:[%s1762_s29 + $0x20] sm:$0xff] %vm272_vm1, %v1035_v3  ;;  %v1036_v6 = vmax.f32 %v1004_v4, 0.0  ;;  %v1439_v7 = vpop.f32.mrb[8].mxu0 }
 0x11b   : > { %1070 = vst.msk [vmem:[%s1762_s29 + $0x38] sm:$0xff] %vm272_vm1, %v1038_v5  ;;  %v1471_v8 = vadd.f32 %v1439_v7, %v1371_v30  ;;  %v865_v9 = vpop.f32.mrb[9].mxu0 }
 0x11c   : > { %1068 = vst.msk [vmem:[%s1762_s29 + $0x28] sm:$0xff] %vm272_vm1, %v1036_v6  ;;  %v1472_v10 = vadd.f32 %v865_v9, %v391_v31  ;;  %v1440_v11 = vpop.f32.mrb[10].mxu0 }
 0x11d   : > { %v1009_v12 = vadd.f32 %v1471_v8, %v1755_v39  ;;  %v1473_v13 = vadd.f32 %v1440_v11, %v1372_v32  ;;  %v868_v14 = vpop.f32.mrb[11].mxu0 }
 0x11e   : > { %v1007_v15 = vadd.f32 %v1472_v10, %v1755_v39  ;;  %v1474_v16 = vadd.f32 %v868_v14, %v394_v33 }
 0x11f   : > { %v1041_v17 = vmax.f32 %v1009_v12, 0.0  ;;  %v1010_v18 = vadd.f32 %v1473_v13, %v1755_v39 }
 0x120   : > { %v1039_v19 = vmax.f32 %v1007_v15, 0.0  ;;  %v1008_v20 = vadd.f32 %v1474_v16, %v1755_v39 }
 0x121   : > { %1073 = vst.msk [vmem:[%s1762_s29 + $0x50] sm:$0xff] %vm272_vm1, %v1041_v17  ;;  %v1042_v21 = vmax.f32 %v1010_v18, 0.0 }
 0x122   : > { %1071 = vst.msk [vmem:[%s1762_s29 + $0x40] sm:$0xff] %vm272_vm1, %v1039_v19  ;;  %v1040_v22 = vmax.f32 %v1008_v20, 0.0  ;;  %v1443_v23 = vpop.f32.mrb[12].mxu0 }
 0x123   : > { %1074 = vst.msk [vmem:[%s1762_s29 + $0x58] sm:$0xff] %vm272_vm1, %v1042_v21  ;;  %v1475_v24 = vadd.f32 %v1443_v23, %v1744_v34  ;;  %v881_v25 = vpop.f32.mrb[13].mxu0 }
 0x124   : > { %1072 = vst.msk [vmem:[%s1762_s29 + $0x48] sm:$0xff] %vm272_vm1, %v1040_v22  ;;  %v1476_v26 = vadd.f32 %v881_v25, %v1746_v35  ;;  %v1444_v27 = vpop.f32.mrb[14].mxu0 }
 0x125   : > { %v1013_v28 = vadd.f32 %v1475_v24, %v1755_v39  ;;  %v1477_v29 = vadd.f32 %v1444_v27, %v1748_v36  ;;  %v884_v30 = vpop.f32.mrb[15].mxu0 }
 0x126   : > { %v1011_v31 = vadd.f32 %v1476_v26, %v1755_v39  ;;  %v1478_v32 = vadd.f32 %v884_v30, %v1750_v37 }
 0x127   : > { %v1045_v33 = vmax.f32 %v1013_v28, 0.0  ;;  %v1014_v34 = vadd.f32 %v1477_v29, %v1755_v39 }
 0x128   : > { %v1043_v38 = vmax.f32 %v1011_v31, 0.0  ;;  %v1012_v40 = vadd.f32 %v1478_v32, %v1755_v39 }
 0x129   : > { %1077 = vst.msk [vmem:[%s1762_s29 + $0x70] sm:$0xff] %vm272_vm1, %v1045_v33  ;;  %v1046_v35 = vmax.f32 %v1014_v34, 0.0  ;;  %v1413_v41 = vpop.f32.mrb[16].mxu1 }
 0x12a   : > { %1075 = vst.msk [vmem:[%s1762_s29 + $0x60] sm:$0xff] %vm272_vm1, %v1043_v38  ;;  %v1044_v42 = vmax.f32 %v1012_v40, 0.0  ;;  %v1447_v36 = vpop.f32.mrb[16].mxu0  ;;  %v635_v43 = vpop.f32.mrb[17].mxu1 }
 0x12b   : > { %1078 = vst.msk [vmem:[%s1762_s29 + $0x78] sm:$0xff] %vm272_vm1, %v1046_v35  ;;  %v1479_v44 = vadd.f32 %v1447_v36, %v1413_v41  ;;  %v897_v37 = vpop.f32.mrb[17].mxu0  ;;  %v1414_v45 = vpop.f32.mrb[18].mxu1 }
 0x12c   : > { %1076 = vst.msk [vmem:[%s1762_s29 + $0x68] sm:$0xff] %vm272_vm1, %v1044_v42  ;;  %v1480_v46 = vadd.f32 %v897_v37, %v635_v43  ;;  %v1448_v47 = vpop.f32.mrb[18].mxu0  ;;  %v638_v48 = vpop.f32.mrb[19].mxu1 }
 0x12d   : > { %v1017_v49 = vadd.f32 %v1479_v44, %v1755_v39  ;;  %v1481_v50 = vadd.f32 %v1448_v47, %v1414_v45  ;;  %v900_v51 = vpop.f32.mrb[19].mxu0 }
 0x12e   : > { %v1015_v52 = vadd.f32 %v1480_v46, %v1755_v39  ;;  %v1482_v53 = vadd.f32 %v900_v51, %v638_v48 }
 0x12f   : > { %v1049_v54 = vmax.f32 %v1017_v49, 0.0  ;;  %v1018_v55 = vadd.f32 %v1481_v50, %v1755_v39 }
 0x130   : > { %v1047_v56 = vmax.f32 %v1015_v52, 0.0  ;;  %v1016_v57 = vadd.f32 %v1482_v53, %v1755_v39 }
 0x131   : > { %1081 = vst.msk [vmem:[%s1762_s29 + $0x90] sm:$0xff] %vm272_vm1, %v1049_v54  ;;  %v1050_v58 = vmax.f32 %v1018_v55, 0.0  ;;  %v1417_v59 = vpop.f32.mrb[20].mxu1 }
 0x132   : > { %1079 = vst.msk [vmem:[%s1762_s29 + $0x80] sm:$0xff] %vm272_vm1, %v1047_v56  ;;  %v1048_v60 = vmax.f32 %v1016_v57, 0.0  ;;  %v1451_v61 = vpop.f32.mrb[20].mxu0  ;;  %v651_v62 = vpop.f32.mrb[21].mxu1 }
 0x133   : > { %1082 = vst.msk [vmem:[%s1762_s29 + $0x98] sm:$0xff] %vm272_vm1, %v1050_v58  ;;  %v1483_v63 = vadd.f32 %v1451_v61, %v1417_v59  ;;  %v913_v0 = vpop.f32.mrb[21].mxu0  ;;  %v1418_v1 = vpop.f32.mrb[22].mxu1 }
 0x134   : > { %1080 = vst.msk [vmem:[%s1762_s29 + $0x88] sm:$0xff] %vm272_vm1, %v1048_v60  ;;  %v1484_v2 = vadd.f32 %v913_v0, %v651_v62  ;;  %v1452_v3 = vpop.f32.mrb[22].mxu0  ;;  %v654_v4 = vpop.f32.mrb[23].mxu1 }
 0x135   : > { %v1021_v5 = vadd.f32 %v1483_v63, %v1755_v39  ;;  %v1485_v6 = vadd.f32 %v1452_v3, %v1418_v1  ;;  %v916_v7 = vpop.f32.mrb[23].mxu0 }
 0x136   : > { %v1019_v8 = vadd.f32 %v1484_v2, %v1755_v39  ;;  %v1486_v9 = vadd.f32 %v916_v7, %v654_v4 }
 0x137   : > { %v1053_v10 = vmax.f32 %v1021_v5, 0.0  ;;  %v1022_v11 = vadd.f32 %v1485_v6, %v1755_v39 }
 0x138   : > { %v1051_v12 = vmax.f32 %v1019_v8, 0.0  ;;  %v1020_v13 = vadd.f32 %v1486_v9, %v1755_v39 }
 0x139   : > { %1085 = vst.msk [vmem:[%s1762_s29 + $0xb0] sm:$0xff] %vm272_vm1, %v1053_v10  ;;  %v1054_v14 = vmax.f32 %v1022_v11, 0.0  ;;  %v1421_v15 = vpop.f32.mrb[24].mxu1 }
 0x13a   : > { %1083 = vst.msk [vmem:[%s1762_s29 + $0xa0] sm:$0xff] %vm272_vm1, %v1051_v12  ;;  %v1052_v16 = vmax.f32 %v1020_v13, 0.0  ;;  %v1455_v17 = vpop.f32.mrb[24].mxu0  ;;  %v667_v18 = vpop.f32.mrb[25].mxu1 }
 0x13b   : > { %1086 = vst.msk [vmem:[%s1762_s29 + $0xb8] sm:$0xff] %vm272_vm1, %v1054_v14  ;;  %v1487_v19 = vadd.f32 %v1455_v17, %v1421_v15  ;;  %v929_v20 = vpop.f32.mrb[25].mxu0  ;;  %v1422_v21 = vpop.f32.mrb[26].mxu1 }
 0x13c   : > { %1084 = vst.msk [vmem:[%s1762_s29 + $0xa8] sm:$0xff] %vm272_vm1, %v1052_v16  ;;  %v1488_v22 = vadd.f32 %v929_v20, %v667_v18  ;;  %v1456_v23 = vpop.f32.mrb[26].mxu0  ;;  %v670_v24 = vpop.f32.mrb[27].mxu1 }
 0x13d   : > { %v1025_v25 = vadd.f32 %v1487_v19, %v1755_v39  ;;  %v1489_v26 = vadd.f32 %v1456_v23, %v1422_v21  ;;  %v932_v27 = vpop.f32.mrb[27].mxu0 }
 0x13e   : > { %v1023_v28 = vadd.f32 %v1488_v22, %v1755_v39  ;;  %v1490_v29 = vadd.f32 %v932_v27, %v670_v24 }
 0x13f   : > { %v1057_v30 = vmax.f32 %v1025_v25, 0.0  ;;  %v1026_v31 = vadd.f32 %v1489_v26, %v1755_v39 }
 0x140   : > { %v1055_v32 = vmax.f32 %v1023_v28, 0.0  ;;  %v1024_v33 = vadd.f32 %v1490_v29, %v1755_v39 }
 0x141   : > { %1089 = vst.msk [vmem:[%s1762_s29 + $0xd0] sm:$0xff] %vm272_vm1, %v1057_v30  ;;  %v1058_v34 = vmax.f32 %v1026_v31, 0.0  ;;  %v1425_v38 = vpop.f32.mrb[28].mxu1 }
 0x142   : > { %1087 = vst.msk [vmem:[%s1762_s29 + $0xc0] sm:$0xff] %vm272_vm1, %v1055_v32  ;;  %v1056_v40 = vmax.f32 %v1024_v33, 0.0  ;;  %v1459_v35 = vpop.f32.mrb[28].mxu0  ;;  %v683_v41 = vpop.f32.mrb[29].mxu1 }
 0x143   : > { %1090 = vst.msk [vmem:[%s1762_s29 + $0xd8] sm:$0xff] %vm272_vm1, %v1058_v34  ;;  %v1491_v42 = vadd.f32 %v1459_v35, %v1425_v38  ;;  %v945_v36 = vpop.f32.mrb[29].mxu0  ;;  %v1426_v43 = vpop.f32.mrb[30].mxu1 }
 0x144   : > { %1088 = vst.msk [vmem:[%s1762_s29 + $0xc8] sm:$0xff] %vm272_vm1, %v1056_v40  ;;  %v1492_v44 = vadd.f32 %v945_v36, %v683_v41  ;;  %v1460_v37 = vpop.f32.mrb[30].mxu0  ;;  %v686_v45 = vpop.f32.mrb[31].mxu1 }
 0x145   : > { %v1029_v46 = vadd.f32 %v1491_v42, %v1755_v39  ;;  %v1493_v47 = vadd.f32 %v1460_v37, %v1426_v43  ;;  %v948_v48 = vpop.f32.mrb[31].mxu0 }
 0x146   : > { %v1027_v49 = vadd.f32 %v1492_v44, %v1755_v39  ;;  %v1494_v50 = vadd.f32 %v948_v48, %v686_v45 }
 0x147   : > { %v1061_v51 = vmax.f32 %v1029_v46, 0.0  ;;  %v1030_v52 = vadd.f32 %v1493_v47, %v1755_v39 }
 0x148   : > { %v1059_v53 = vmax.f32 %v1027_v49, 0.0  ;;  %v1028_v54 = vadd.f32 %v1494_v50, %v1755_v39 }
 0x149   : > { %1093 = vst.msk [vmem:[%s1762_s29 + $0xf0] sm:$0xff] %vm272_vm1, %v1061_v51  ;;  %v1062_v55 = vmax.f32 %v1030_v52, 0.0 }
 0x14a   : > { %1091 = vst.msk [vmem:[%s1762_s29 + $0xe0] sm:$0xff] %vm272_vm1, %v1059_v53  ;;  %v1060_v56 = vmax.f32 %v1028_v54, 0.0 }
 0x14b   : > { %1094 = vst.msk [vmem:[%s1762_s29 + $0xf8] sm:$0xff] %vm272_vm1, %v1062_v55 }
 0x14c   : > { %1092 = vst.msk [vmem:[%s1762_s29 + $0xe8] sm:$0xff] %vm272_vm1, %v1060_v56 }
 0x14d PF: > { %s13_s12 = sadd.s32 1, %s1546_s12  }
 0x14e   : > { %p10_p4 = scmp.ge.s32.totalorder %s13_s12, 4  }
 0x150   :  { %12 = sbr.rel (!%p10_p4) target bundleno = 1 (0x1), region = 65 }

</bundles_post_ra>
